<compile_context>
chip_gen: v7x
topology: tpu7x:2x2x1
jax: 0.10.0
libtpu: 0.0.40
codegen_flags: <defaults>
</compile_context>

<pallas_src>
import jax
import jax.numpy as jnp
from jax import lax
from jax.experimental import pallas as pl
from jax.experimental.pallas import tpu as pltpu

# "config" values (small synthetic sizes, consistent with the forward pass)
VOCAB = 50          # len(vocab_list)
EMBED_DIM = 16      # config.embedding_dim
HIDDEN = 32         # config.hidden_size
MAX_SEQ = 8         # config.max_seq  (== T, MaxPool1d kernel size)
BATCH = 2           # config.batch
NUM_LSTMS = 3
B_PAD = 8           # pad batch to a full f32 sublane group
VOCAB_PAD = 128     # one-hot lane width (vocab rows padded to one full vreg)


def _hbmp_kernel(tok_ref, mf_ref, mb_ref, whh_ref, bias_ref, u_ref, xp_ref):
    """3 chained BiLSTMs + online max-pool; whole problem VMEM-resident, 1 TC.

    tok_ref : (T*Bp, 2) int32  col 0 = token at time t, col 1 = token at T-1-t
    mf_ref  : (Vp, 3*2*4H) bf16  emb @ W_ih, fwd-direction gate cols (0 elsewhere)
    mb_ref  : (Vp, 3*2*4H) bf16  emb @ W_ih, bwd-direction gate cols (0 elsewhere)
    whh_ref : (3, 2H, 2*4H) bf16 block-diagonal recurrent weights per layer
    bias_ref: (1, 3*2*4H)  f32   b_ih + b_hh in the fused gate layout
    u_ref   : (Bp, 6H)     f32   output  [l0_f l0_b l1_f l1_b l2_f l2_b]
    xp_ref  : (T*Bp, 3*2*4H) f32 scratch: hoisted input projections
    """
    TB = tok_ref.shape[0]
    VP = mf_ref.shape[0]
    H2 = whh_ref.shape[1]          # 2*H   (fused [fwd|bwd] state width)
    GW = whh_ref.shape[2]          # 2*4*H (fused per-layer gate width)
    T = MAX_SEQ
    B = TB // T

    # (R5 + R1) in-kernel embedding lookup as a one-hot matmul, fused with the
    # hoisted input projection for all 3 layers x 2 directions, bias folded in;
    # ONE lane-dense f32 store to the xp scratch.
    iota_v = lax.broadcasted_iota(jnp.int32, (TB, VP), 1)
    oh_f = jnp.where(iota_v == tok_ref[:, 0:1], 1.0, 0.0).astype(jnp.bfloat16)
    oh_b = jnp.where(iota_v == tok_ref[:, 1:2], 1.0, 0.0).astype(jnp.bfloat16)
    xp_ref[...] = (
        jnp.dot(oh_f, mf_ref[...], preferred_element_type=jnp.float32)
        + jnp.dot(oh_b, mb_ref[...], preferred_element_type=jnp.float32)
        + bias_ref[...])                                       # (T*Bp, 3*GW)

    # Fused state: h = [h_fwd | h_bwd], c = [c_fwd | c_bwd]  -- f32, (B, 2H).
    h = jnp.zeros((B, H2), jnp.float32)    # self.init_h
    c = jnp.zeros((B, H2), jnp.float32)    # self.init_c
    pools = []

    for layer in range(NUM_LSTMS):
        whh_bd = whh_ref[layer]                        # (2H, GW) bf16, loaded once/layer
        m = jnp.full((B, H2), -jnp.inf, jnp.float32)   # running max-pool

        for t in range(T):                             # fully unrolled (T static)
            # (R1) 128-aligned row/column slice; the bwd-gate columns of this
            # row already correspond to time T-1-t (reversed tokens).
            xp_t = xp_ref[t * B:(t + 1) * B, layer * GW:(layer + 1) * GW]

            # (R2) single fused fwd+bwd recurrent matmul (bf16 in, f32 acc).
            g = xp_t + jnp.dot(h.astype(jnp.bfloat16), whh_bd,
                               preferred_element_type=jnp.float32)   # (B, GW)

            # (R7) sigmoid as 0.5*tanh(0.5*x)+0.5; full-tile transcendentals,
            # only the needed column slices are consumed (bounded functions).
            s = 0.5 * jnp.tanh(0.5 * g) + 0.5
            th = jnp.tanh(g)

            # Gate layout (PyTorch order i, f, g, o), each (B, 2H) = [fwd|bwd]:
            #   i = cols 0:2H, f = 2H:4H, g = 4H:6H, o = 6H:8H
            c = s[:, H2:2 * H2] * c + s[:, 0:H2] * th[:, 2 * H2:3 * H2]
            h = s[:, 3 * H2:4 * H2] * jnp.tanh(c)
            m = jnp.maximum(m, h)

        pools.append(m)                                # (B, 2H) = [pool_f | pool_b]

    # (R11) single output store: columns [l0_f l0_b l1_f l1_b l2_f l2_b]
    u_ref[...] = jnp.concatenate(pools, axis=1)


def pack_params(params):
    """(R6) One-time weight repacking -- NOT part of the per-call forward path.

    Per-layer fused gate layout (width GW = 2*4H), gate-type major:
        [ i_f i_b | f_f f_b | g_f g_b | o_f o_b ]      (each block H wide)
    so the fused [h_f|h_b] state maps through one block-diagonal W_hh and the
    gate math runs on contiguous (B, 2H) slices.  The embedding table is folded
    into the input projection (mf/mb rows = emb @ W_ih^T), selected in-kernel
    by a one-hot matmul.
    """
    emb, wih, whh, bih, bhh = params
    H = whh.shape[-1]
    GW = 2 * 4 * H
    W = NUM_LSTMS * GW
    V = emb.shape[0]

    emb_p = jnp.zeros((VOCAB_PAD, emb.shape[1]), jnp.float32).at[:V].set(emb)
    mf = jnp.zeros((VOCAB_PAD, W), jnp.float32)
    mb = jnp.zeros((VOCAB_PAD, W), jnp.float32)
    whh_bd = jnp.zeros((NUM_LSTMS, 2 * H, GW), jnp.float32)
    bias = jnp.zeros((1, W), jnp.float32)

    for l in range(NUM_LSTMS):
        for d in range(2):                           # 0 = fwd, 1 = bwd
            for q in range(4):                       # PyTorch gate order i, f, g, o
                gcol = q * 2 * H + d * H             # column offset inside layer block
                col = l * GW + gcol
                w_ih_q = wih[l, d, q * H:(q + 1) * H, :]          # (H, E)
                proj = emb_p @ w_ih_q.T                           # (Vp, H)
                if d == 0:
                    mf = mf.at[:, col:col + H].set(proj)
                else:
                    mb = mb.at[:, col:col + H].set(proj)
                w_hh_q = whh[l, d, q * H:(q + 1) * H, :]          # (H, H)
                whh_bd = whh_bd.at[l, d * H:(d + 1) * H, gcol:gcol + H].set(w_hh_q.T)
                bias = bias.at[0, col:col + H].set(
                    bih[l, d, q * H:(q + 1) * H] + bhh[l, d, q * H:(q + 1) * H])

    return (mf.astype(jnp.bfloat16), mb.astype(jnp.bfloat16),
            whh_bd.astype(jnp.bfloat16), bias)


@jax.jit
def sentence_encoder(tokens, packed):
    """tokens: (T, B) int32, seq-first like PyTorch nn.LSTM. packed: pack_params(...)."""
    mf, mb, whh_bd, bias = packed
    H2 = whh_bd.shape[1]
    T, B = tokens.shape
    W = mf.shape[1]

    # (R5) the only per-call glue left outside the kernel: pad the tiny int32
    # token matrix to 8 batch rows and pair each time step with its reversed
    # counterpart (column 1 feeds the bwd-direction gate columns).
    Bp = max(((B + 7) // 8) * 8, B_PAD)
    tok = jnp.pad(tokens.astype(jnp.int32), ((0, 0), (0, Bp - B)))
    tok2 = jnp.stack([tok, tok[::-1]], axis=-1).reshape(T * Bp, 2)

    # Whole problem (<1 MiB) is VMEM-resident: no grid, no tiling.
    # Scaling notes (from the review):
    #  * Real batch: add grid=(Bp // tile_b,) over batch tiles with
    #    dimension_semantics=("parallel",) and size the xp scratch per tile --
    #    a whole-batch f32 xp scratch hits v7x's 64 MiB VMEM first.
    #  * v7x dual TensorCore: splitting fwd/bwd across cores is mutually
    #    exclusive with the fused block-diagonal fwd+bwd matmul used here,
    #    which is the better trade on 1-TC v5e/v6e; kept single-core.
    u = pl.pallas_call(
        _hbmp_kernel,
        out_shape=jax.ShapeDtypeStruct((Bp, NUM_LSTMS * H2), jnp.float32),
        in_specs=[pl.BlockSpec(memory_space=pltpu.MemorySpace.VMEM)] * 5,
        out_specs=pl.BlockSpec(memory_space=pltpu.MemorySpace.VMEM),
        scratch_shapes=[pltpu.VMEM((T * Bp, W), jnp.float32)],
    )(tok2, mf, mb, whh_bd, bias)
    return u[:B]


def init_params(key):
    """Deterministic synthetic weights (PyTorch-style uniform(-1/sqrt(H), 1/sqrt(H)))."""
    k = 1.0 / (HIDDEN ** 0.5)
    k0, k1, k2, k3, k4 = jax.random.split(key, 5)
    emb = jax.random.normal(k0, (VOCAB, EMBED_DIM), jnp.float32) * 0.1
    wih = jax.random.uniform(k1, (NUM_LSTMS, 2, 4 * HIDDEN, EMBED_DIM), jnp.float32, -k, k)
    whh = jax.random.uniform(k2, (NUM_LSTMS, 2, 4 * HIDDEN, HIDDEN), jnp.float32, -k, k)
    bih = jax.random.uniform(k3, (NUM_LSTMS, 2, 4 * HIDDEN), jnp.float32, -k, k)
    bhh = jax.random.uniform(k4, (NUM_LSTMS, 2, 4 * HIDDEN), jnp.float32, -k, k)
    return emb, wih, whh, bih, bhh


def reference(tokens, params):
    """Pure-JAX f32 reference of the module forward pass (correctness check)."""
    emb, wih, whh, bih, bhh = params
    H = whh.shape[-1]
    x = jnp.take(emb, tokens, axis=0).astype(jnp.float32)    # (T, B, E)
    B = x.shape[1]

    def run_dir(wih_d, whh_d, b, h0, c0, reverse):
        xs = x[::-1] if reverse else x

        def step(carry, x_t):
            h, c = carry
            g = x_t @ wih_d.T + h @ whh_d.T + b
            i = jax.nn.sigmoid(g[:, :H])
            f = jax.nn.sigmoid(g[:, H:2 * H])
            gg = jnp.tanh(g[:, 2 * H:3 * H])
            o = jax.nn.sigmoid(g[:, 3 * H:])
            c = f * c + i * gg
            h = o * jnp.tanh(c)
            return (h, c), h

        (h, c), hs = lax.scan(step, (h0, c0), xs)
        return h, c, jnp.max(hs, axis=0)

    zeros = jnp.zeros((B, H), jnp.float32)
    h_f = c_f = h_b = c_b = zeros
    outs = []
    for l in range(NUM_LSTMS):
        h_f, c_f, m_f = run_dir(wih[l, 0], whh[l, 0], bih[l, 0] + bhh[l, 0], h_f, c_f, False)
        h_b, c_b, m_b = run_dir(wih[l, 1], whh[l, 1], bih[l, 1] + bhh[l, 1], h_b, c_b, True)
        outs += [m_f, m_b]
    return jnp.concatenate(outs, axis=1)


if __name__ == "__main__":
    key = jax.random.PRNGKey(0)
    k_tok, k_par = jax.random.split(key)
    # sentence: (seq_len, batch) of token ids, seq-first like PyTorch nn.LSTM default
    tokens = jax.random.randint(k_tok, (MAX_SEQ, BATCH), 0, VOCAB, dtype=jnp.int32)
    params = init_params(k_par)
    packed = pack_params(params)     # (R6) one-time packing, off the forward path

    u = jax.block_until_ready(sentence_encoder(tokens, packed))
    u_ref = jax.block_until_ready(reference(tokens, params))

    assert u.shape == (BATCH, 2 * NUM_LSTMS * HIDDEN), u.shape
    # kernel uses bf16 MXU inputs (f32 accumulation / state) -> compare against
    # the pure-f32 reference with a correspondingly relaxed tolerance.
    max_err = float(jnp.max(jnp.abs(u - u_ref)))
    assert jnp.allclose(u, u_ref, rtol=3e-2, atol=3e-2), max_err

    print("KERNEL_OK")
</pallas_src>

<mosaic_0001>
module attributes {stable_mosaic.version = 11 : i64} {
  func.func @_hbmp_kernel(%arg0: memref<64x2xi32, #tpu.memory_space<vmem>>, %arg1: memref<128x768xbf16, #tpu.memory_space<vmem>>, %arg2: memref<128x768xbf16, #tpu.memory_space<vmem>>, %arg3: memref<3x64x256xbf16, #tpu.memory_space<vmem>>, %arg4: memref<1x768xf32, #tpu.memory_space<vmem>>, %arg5: memref<8x192xf32, #tpu.memory_space<vmem>>, %arg6: memref<64x768xf32, #tpu.memory_space<vmem>>) attributes {dimension_semantics = [], scalar_prefetch = 0 : i64, scratch_operands = 1 : i64, tpu.core_type = #tpu.core_type<tc>} {
    %0 = tpu.iota {dimensions = array<i32: 1>} : vector<64x128xi32>
    %c0 = arith.constant 0 : index
    %c0_0 = arith.constant 0 : index
    %1 = vector.load %arg0[%c0, %c0_0] : memref<64x2xi32, #tpu.memory_space<vmem>>, vector<64x1xi32>
    %2 = vector.broadcast %1 : vector<64x1xi32> to vector<64x128xi32>
    %3 = arith.cmpi eq, %0, %2 : vector<64x128xi32>
    %cst = arith.constant 1.000000e+00 : f32
    %cst_1 = arith.constant 0.000000e+00 : f32
    %4 = vector.broadcast %cst : f32 to vector<64x128xf32>
    %5 = vector.broadcast %cst_1 : f32 to vector<64x128xf32>
    %6 = arith.select %3, %4, %5 : vector<64x128xi1>, vector<64x128xf32>
    %7 = arith.truncf %6 : vector<64x128xf32> to vector<64x128xbf16>
    %c0_2 = arith.constant 0 : index
    %c1 = arith.constant 1 : index
    %8 = vector.load %arg0[%c0_2, %c1] : memref<64x2xi32, #tpu.memory_space<vmem>>, vector<64x1xi32>
    %9 = vector.broadcast %8 : vector<64x1xi32> to vector<64x128xi32>
    %10 = arith.cmpi eq, %0, %9 : vector<64x128xi32>
    %cst_3 = arith.constant 1.000000e+00 : f32
    %cst_4 = arith.constant 0.000000e+00 : f32
    %11 = vector.broadcast %cst_3 : f32 to vector<64x128xf32>
    %12 = vector.broadcast %cst_4 : f32 to vector<64x128xf32>
    %13 = arith.select %10, %11, %12 : vector<64x128xi1>, vector<64x128xf32>
    %14 = arith.truncf %13 : vector<64x128xf32> to vector<64x128xbf16>
    %c0_5 = arith.constant 0 : index
    %c0_6 = arith.constant 0 : index
    %15 = vector.load %arg1[%c0_5, %c0_6] : memref<128x768xbf16, #tpu.memory_space<vmem>>, vector<128x768xbf16>
    %cst_7 = arith.constant dense<0.000000e+00> : vector<64x768xf32>
    %16 = tpu.matmul %7, %15, %cst_7 {dimension_numbers = #tpu.dot_dimension_numbers<[1], [0], [0], [1], [0, 0, 1, 1], [], []>} : vector<64x128xbf16>, vector<128x768xbf16>, vector<64x768xf32> -> vector<64x768xf32>
    %c0_8 = arith.constant 0 : index
    %c0_9 = arith.constant 0 : index
    %17 = vector.load %arg2[%c0_8, %c0_9] : memref<128x768xbf16, #tpu.memory_space<vmem>>, vector<128x768xbf16>
    %cst_10 = arith.constant dense<0.000000e+00> : vector<64x768xf32>
    %18 = tpu.matmul %14, %17, %cst_10 {dimension_numbers = #tpu.dot_dimension_numbers<[1], [0], [0], [1], [0, 0, 1, 1], [], []>} : vector<64x128xbf16>, vector<128x768xbf16>, vector<64x768xf32> -> vector<64x768xf32>
    %19 = arith.addf %16, %18 : vector<64x768xf32>
    %c0_11 = arith.constant 0 : index
    %c0_12 = arith.constant 0 : index
    %20 = vector.load %arg4[%c0_11, %c0_12] : memref<1x768xf32, #tpu.memory_space<vmem>>, vector<1x768xf32>
    %21 = vector.broadcast %20 : vector<1x768xf32> to vector<64x768xf32>
    %22 = arith.addf %19, %21 : vector<64x768xf32>
    %c0_13 = arith.constant 0 : index
    %c0_14 = arith.constant 0 : index
    %23 = vector.load %arg6[%c0_13, %c0_14] : memref<64x768xf32, #tpu.memory_space<vmem>>, vector<64x768xf32>
    tpu.vector_store %arg6[%c0_13, %c0_14], %22 {strides = array<i32>} : memref<64x768xf32, #tpu.memory_space<vmem>>, vector<64x768xf32>,
    %cst_15 = arith.constant 0.000000e+00 : f32
    %24 = vector.broadcast %cst_15 : f32 to vector<8x64xf32>
    %cst_16 = arith.constant 0.000000e+00 : f32
    %25 = vector.broadcast %cst_16 : f32 to vector<8x64xf32>
    %c0_17 = arith.constant 0 : index
    %c0_18 = arith.constant 0 : index
    %c0_19 = arith.constant 0 : index
    %26 = vector.load %arg3[%c0_17, %c0_18, %c0_19] : memref<3x64x256xbf16, #tpu.memory_space<vmem>>, vector<1x64x256xbf16>
    %27 = vector.shape_cast %26 : vector<1x64x256xbf16> to vector<64x256xbf16>
    %cst_20 = arith.constant 0xFF800000 : f32
    %28 = vector.broadcast %cst_20 : f32 to vector<8x64xf32>
    %c0_21 = arith.constant 0 : index
    %c0_22 = arith.constant 0 : index
    %29 = vector.load %arg6[%c0_21, %c0_22] : memref<64x768xf32, #tpu.memory_space<vmem>>, vector<8x256xf32>
    %30 = arith.truncf %24 : vector<8x64xf32> to vector<8x64xbf16>
    %cst_23 = arith.constant dense<0.000000e+00> : vector<8x256xf32>
    %31 = tpu.matmul %30, %27, %cst_23 {dimension_numbers = #tpu.dot_dimension_numbers<[1], [0], [0], [1], [0, 0, 1, 1], [], []>} : vector<8x64xbf16>, vector<64x256xbf16>, vector<8x256xf32> -> vector<8x256xf32>
    %32 = arith.addf %29, %31 : vector<8x256xf32>
    %cst_24 = arith.constant 5.000000e-01 : f32
    %33 = vector.broadcast %cst_24 : f32 to vector<8x256xf32>
    %34 = arith.mulf %33, %32 : vector<8x256xf32>
    %35 = math.tanh %34 : vector<8x256xf32>
    %cst_25 = arith.constant 5.000000e-01 : f32
    %36 = vector.broadcast %cst_25 : f32 to vector<8x256xf32>
    %37 = arith.mulf %36, %35 : vector<8x256xf32>
    %cst_26 = arith.constant 5.000000e-01 : f32
    %38 = vector.broadcast %cst_26 : f32 to vector<8x256xf32>
    %39 = arith.addf %37, %38 : vector<8x256xf32>
    %40 = math.tanh %32 : vector<8x256xf32>
    %41 = vector.extract_strided_slice %39 {offsets = [0, 64], sizes = [8, 64], strides = [1, 1]} : vector<8x256xf32> to vector<8x64xf32>
    %42 = arith.mulf %41, %25 : vector<8x64xf32>
    %43 = vector.extract_strided_slice %39 {offsets = [0, 0], sizes = [8, 64], strides = [1, 1]} : vector<8x256xf32> to vector<8x64xf32>
    %44 = vector.extract_strided_slice %40 {offsets = [0, 128], sizes = [8, 64], strides = [1, 1]} : vector<8x256xf32> to vector<8x64xf32>
    %45 = arith.mulf %43, %44 : vector<8x64xf32>
    %46 = arith.addf %42, %45 : vector<8x64xf32>
    %47 = vector.extract_strided_slice %39 {offsets = [0, 192], sizes = [8, 64], strides = [1, 1]} : vector<8x256xf32> to vector<8x64xf32>
    %48 = math.tanh %46 : vector<8x64xf32>
    %49 = arith.mulf %47, %48 : vector<8x64xf32>
    %50 = arith.maximumf %28, %49 : vector<8x64xf32>
    %c8 = arith.constant 8 : index
    %c0_27 = arith.constant 0 : index
    %51 = vector.load %arg6[%c8, %c0_27] : memref<64x768xf32, #tpu.memory_space<vmem>>, vector<8x256xf32>
    %52 = arith.truncf %49 : vector<8x64xf32> to vector<8x64xbf16>
    %cst_28 = arith.constant dense<0.000000e+00> : vector<8x256xf32>
    %53 = tpu.matmul %52, %27, %cst_28 {dimension_numbers = #tpu.dot_dimension_numbers<[1], [0], [0], [1], [0, 0, 1, 1], [], []>} : vector<8x64xbf16>, vector<64x256xbf16>, vector<8x256xf32> -> vector<8x256xf32>
    %54 = arith.addf %51, %53 : vector<8x256xf32>
    %cst_29 = arith.constant 5.000000e-01 : f32
    %55 = vector.broadcast %cst_29 : f32 to vector<8x256xf32>
    %56 = arith.mulf %55, %54 : vector<8x256xf32>
    %57 = math.tanh %56 : vector<8x256xf32>
    %cst_30 = arith.constant 5.000000e-01 : f32
    %58 = vector.broadcast %cst_30 : f32 to vector<8x256xf32>
    %59 = arith.mulf %58, %57 : vector<8x256xf32>
    %cst_31 = arith.constant 5.000000e-01 : f32
    %60 = vector.broadcast %cst_31 : f32 to vector<8x256xf32>
    %61 = arith.addf %59, %60 : vector<8x256xf32>
    %62 = math.tanh %54 : vector<8x256xf32>
    %63 = vector.extract_strided_slice %61 {offsets = [0, 64], sizes = [8, 64], strides = [1, 1]} : vector<8x256xf32> to vector<8x64xf32>
    %64 = arith.mulf %63, %46 : vector<8x64xf32>
    %65 = vector.extract_strided_slice %61 {offsets = [0, 0], sizes = [8, 64], strides = [1, 1]} : vector<8x256xf32> to vector<8x64xf32>
    %66 = vector.extract_strided_slice %62 {offsets = [0, 128], sizes = [8, 64], strides = [1, 1]} : vector<8x256xf32> to vector<8x64xf32>
    %67 = arith.mulf %65, %66 : vector<8x64xf32>
    %68 = arith.addf %64, %67 : vector<8x64xf32>
    %69 = vector.extract_strided_slice %61 {offsets = [0, 192], sizes = [8, 64], strides = [1, 1]} : vector<8x256xf32> to vector<8x64xf32>
    %70 = math.tanh %68 : vector<8x64xf32>
    %71 = arith.mulf %69, %70 : vector<8x64xf32>
    %72 = arith.maximumf %50, %71 : vector<8x64xf32>
    %c16 = arith.constant 16 : index
    %c0_32 = arith.constant 0 : index
    %73 = vector.load %arg6[%c16, %c0_32] : memref<64x768xf32, #tpu.memory_space<vmem>>, vector<8x256xf32>
    %74 = arith.truncf %71 : vector<8x64xf32> to vector<8x64xbf16>
    %cst_33 = arith.constant dense<0.000000e+00> : vector<8x256xf32>
    %75 = tpu.matmul %74, %27, %cst_33 {dimension_numbers = #tpu.dot_dimension_numbers<[1], [0], [0], [1], [0, 0, 1, 1], [], []>} : vector<8x64xbf16>, vector<64x256xbf16>, vector<8x256xf32> -> vector<8x256xf32>
    %76 = arith.addf %73, %75 : vector<8x256xf32>
    %cst_34 = arith.constant 5.000000e-01 : f32
    %77 = vector.broadcast %cst_34 : f32 to vector<8x256xf32>
    %78 = arith.mulf %77, %76 : vector<8x256xf32>
    %79 = math.tanh %78 : vector<8x256xf32>
    %cst_35 = arith.constant 5.000000e-01 : f32
    %80 = vector.broadcast %cst_35 : f32 to vector<8x256xf32>
    %81 = arith.mulf %80, %79 : vector<8x256xf32>
    %cst_36 = arith.constant 5.000000e-01 : f32
    %82 = vector.broadcast %cst_36 : f32 to vector<8x256xf32>
    %83 = arith.addf %81, %82 : vector<8x256xf32>
    %84 = math.tanh %76 : vector<8x256xf32>
    %85 = vector.extract_strided_slice %83 {offsets = [0, 64], sizes = [8, 64], strides = [1, 1]} : vector<8x256xf32> to vector<8x64xf32>
    %86 = arith.mulf %85, %68 : vector<8x64xf32>
    %87 = vector.extract_strided_slice %83 {offsets = [0, 0], sizes = [8, 64], strides = [1, 1]} : vector<8x256xf32> to vector<8x64xf32>
    %88 = vector.extract_strided_slice %84 {offsets = [0, 128], sizes = [8, 64], strides = [1, 1]} : vector<8x256xf32> to vector<8x64xf32>
    %89 = arith.mulf %87, %88 : vector<8x64xf32>
    %90 = arith.addf %86, %89 : vector<8x64xf32>
    %91 = vector.extract_strided_slice %83 {offsets = [0, 192], sizes = [8, 64], strides = [1, 1]} : vector<8x256xf32> to vector<8x64xf32>
    %92 = math.tanh %90 : vector<8x64xf32>
    %93 = arith.mulf %91, %92 : vector<8x64xf32>
    %94 = arith.maximumf %72, %93 : vector<8x64xf32>
    %c24 = arith.constant 24 : index
    %c0_37 = arith.constant 0 : index
    %95 = vector.load %arg6[%c24, %c0_37] : memref<64x768xf32, #tpu.memory_space<vmem>>, vector<8x256xf32>
    %96 = arith.truncf %93 : vector<8x64xf32> to vector<8x64xbf16>
    %cst_38 = arith.constant dense<0.000000e+00> : vector<8x256xf32>
    %97 = tpu.matmul %96, %27, %cst_38 {dimension_numbers = #tpu.dot_dimension_numbers<[1], [0], [0], [1], [0, 0, 1, 1], [], []>} : vector<8x64xbf16>, vector<64x256xbf16>, vector<8x256xf32> -> vector<8x256xf32>
    %98 = arith.addf %95, %97 : vector<8x256xf32>
    %cst_39 = arith.constant 5.000000e-01 : f32
    %99 = vector.broadcast %cst_39 : f32 to vector<8x256xf32>
    %100 = arith.mulf %99, %98 : vector<8x256xf32>
    %101 = math.tanh %100 : vector<8x256xf32>
    %cst_40 = arith.constant 5.000000e-01 : f32
    %102 = vector.broadcast %cst_40 : f32 to vector<8x256xf32>
    %103 = arith.mulf %102, %101 : vector<8x256xf32>
    %cst_41 = arith.constant 5.000000e-01 : f32
    %104 = vector.broadcast %cst_41 : f32 to vector<8x256xf32>
    %105 = arith.addf %103, %104 : vector<8x256xf32>
    %106 = math.tanh %98 : vector<8x256xf32>
    %107 = vector.extract_strided_slice %105 {offsets = [0, 64], sizes = [8, 64], strides = [1, 1]} : vector<8x256xf32> to vector<8x64xf32>
    %108 = arith.mulf %107, %90 : vector<8x64xf32>
    %109 = vector.extract_strided_slice %105 {offsets = [0, 0], sizes = [8, 64], strides = [1, 1]} : vector<8x256xf32> to vector<8x64xf32>
    %110 = vector.extract_strided_slice %106 {offsets = [0, 128], sizes = [8, 64], strides = [1, 1]} : vector<8x256xf32> to vector<8x64xf32>
    %111 = arith.mulf %109, %110 : vector<8x64xf32>
    %112 = arith.addf %108, %111 : vector<8x64xf32>
    %113 = vector.extract_strided_slice %105 {offsets = [0, 192], sizes = [8, 64], strides = [1, 1]} : vector<8x256xf32> to vector<8x64xf32>
    %114 = math.tanh %112 : vector<8x64xf32>
    %115 = arith.mulf %113, %114 : vector<8x64xf32>
    %116 = arith.maximumf %94, %115 : vector<8x64xf32>
    %c32 = arith.constant 32 : index
    %c0_42 = arith.constant 0 : index
    %117 = vector.load %arg6[%c32, %c0_42] : memref<64x768xf32, #tpu.memory_space<vmem>>, vector<8x256xf32>
    %118 = arith.truncf %115 : vector<8x64xf32> to vector<8x64xbf16>
    %cst_43 = arith.constant dense<0.000000e+00> : vector<8x256xf32>
    %119 = tpu.matmul %118, %27, %cst_43 {dimension_numbers = #tpu.dot_dimension_numbers<[1], [0], [0], [1], [0, 0, 1, 1], [], []>} : vector<8x64xbf16>, vector<64x256xbf16>, vector<8x256xf32> -> vector<8x256xf32>
    %120 = arith.addf %117, %119 : vector<8x256xf32>
    %cst_44 = arith.constant 5.000000e-01 : f32
    %121 = vector.broadcast %cst_44 : f32 to vector<8x256xf32>
    %122 = arith.mulf %121, %120 : vector<8x256xf32>
    %123 = math.tanh %122 : vector<8x256xf32>
    %cst_45 = arith.constant 5.000000e-01 : f32
    %124 = vector.broadcast %cst_45 : f32 to vector<8x256xf32>
    %125 = arith.mulf %124, %123 : vector<8x256xf32>
    %cst_46 = arith.constant 5.000000e-01 : f32
    %126 = vector.broadcast %cst_46 : f32 to vector<8x256xf32>
    %127 = arith.addf %125, %126 : vector<8x256xf32>
    %128 = math.tanh %120 : vector<8x256xf32>
    %129 = vector.extract_strided_slice %127 {offsets = [0, 64], sizes = [8, 64], strides = [1, 1]} : vector<8x256xf32> to vector<8x64xf32>
    %130 = arith.mulf %129, %112 : vector<8x64xf32>
    %131 = vector.extract_strided_slice %127 {offsets = [0, 0], sizes = [8, 64], strides = [1, 1]} : vector<8x256xf32> to vector<8x64xf32>
    %132 = vector.extract_strided_slice %128 {offsets = [0, 128], sizes = [8, 64], strides = [1, 1]} : vector<8x256xf32> to vector<8x64xf32>
    %133 = arith.mulf %131, %132 : vector<8x64xf32>
    %134 = arith.addf %130, %133 : vector<8x64xf32>
    %135 = vector.extract_strided_slice %127 {offsets = [0, 192], sizes = [8, 64], strides = [1, 1]} : vector<8x256xf32> to vector<8x64xf32>
    %136 = math.tanh %134 : vector<8x64xf32>
    %137 = arith.mulf %135, %136 : vector<8x64xf32>
    %138 = arith.maximumf %116, %137 : vector<8x64xf32>
    %c40 = arith.constant 40 : index
    %c0_47 = arith.constant 0 : index
    %139 = vector.load %arg6[%c40, %c0_47] : memref<64x768xf32, #tpu.memory_space<vmem>>, vector<8x256xf32>
    %140 = arith.truncf %137 : vector<8x64xf32> to vector<8x64xbf16>
    %cst_48 = arith.constant dense<0.000000e+00> : vector<8x256xf32>
    %141 = tpu.matmul %140, %27, %cst_48 {dimension_numbers = #tpu.dot_dimension_numbers<[1], [0], [0], [1], [0, 0, 1, 1], [], []>} : vector<8x64xbf16>, vector<64x256xbf16>, vector<8x256xf32> -> vector<8x256xf32>
    %142 = arith.addf %139, %141 : vector<8x256xf32>
    %cst_49 = arith.constant 5.000000e-01 : f32
    %143 = vector.broadcast %cst_49 : f32 to vector<8x256xf32>
    %144 = arith.mulf %143, %142 : vector<8x256xf32>
    %145 = math.tanh %144 : vector<8x256xf32>
    %cst_50 = arith.constant 5.000000e-01 : f32
    %146 = vector.broadcast %cst_50 : f32 to vector<8x256xf32>
    %147 = arith.mulf %146, %145 : vector<8x256xf32>
    %cst_51 = arith.constant 5.000000e-01 : f32
    %148 = vector.broadcast %cst_51 : f32 to vector<8x256xf32>
    %149 = arith.addf %147, %148 : vector<8x256xf32>
    %150 = math.tanh %142 : vector<8x256xf32>
    %151 = vector.extract_strided_slice %149 {offsets = [0, 64], sizes = [8, 64], strides = [1, 1]} : vector<8x256xf32> to vector<8x64xf32>
    %152 = arith.mulf %151, %134 : vector<8x64xf32>
    %153 = vector.extract_strided_slice %149 {offsets = [0, 0], sizes = [8, 64], strides = [1, 1]} : vector<8x256xf32> to vector<8x64xf32>
    %154 = vector.extract_strided_slice %150 {offsets = [0, 128], sizes = [8, 64], strides = [1, 1]} : vector<8x256xf32> to vector<8x64xf32>
    %155 = arith.mulf %153, %154 : vector<8x64xf32>
    %156 = arith.addf %152, %155 : vector<8x64xf32>
    %157 = vector.extract_strided_slice %149 {offsets = [0, 192], sizes = [8, 64], strides = [1, 1]} : vector<8x256xf32> to vector<8x64xf32>
    %158 = math.tanh %156 : vector<8x64xf32>
    %159 = arith.mulf %157, %158 : vector<8x64xf32>
    %160 = arith.maximumf %138, %159 : vector<8x64xf32>
    %c48 = arith.constant 48 : index
    %c0_52 = arith.constant 0 : index
    %161 = vector.load %arg6[%c48, %c0_52] : memref<64x768xf32, #tpu.memory_space<vmem>>, vector<8x256xf32>
    %162 = arith.truncf %159 : vector<8x64xf32> to vector<8x64xbf16>
    %cst_53 = arith.constant dense<0.000000e+00> : vector<8x256xf32>
    %163 = tpu.matmul %162, %27, %cst_53 {dimension_numbers = #tpu.dot_dimension_numbers<[1], [0], [0], [1], [0, 0, 1, 1], [], []>} : vector<8x64xbf16>, vector<64x256xbf16>, vector<8x256xf32> -> vector<8x256xf32>
    %164 = arith.addf %161, %163 : vector<8x256xf32>
    %cst_54 = arith.constant 5.000000e-01 : f32
    %165 = vector.broadcast %cst_54 : f32 to vector<8x256xf32>
    %166 = arith.mulf %165, %164 : vector<8x256xf32>
    %167 = math.tanh %166 : vector<8x256xf32>
    %cst_55 = arith.constant 5.000000e-01 : f32
    %168 = vector.broadcast %cst_55 : f32 to vector<8x256xf32>
    %169 = arith.mulf %168, %167 : vector<8x256xf32>
    %cst_56 = arith.constant 5.000000e-01 : f32
    %170 = vector.broadcast %cst_56 : f32 to vector<8x256xf32>
    %171 = arith.addf %169, %170 : vector<8x256xf32>
    %172 = math.tanh %164 : vector<8x256xf32>
    %173 = vector.extract_strided_slice %171 {offsets = [0, 64], sizes = [8, 64], strides = [1, 1]} : vector<8x256xf32> to vector<8x64xf32>
    %174 = arith.mulf %173, %156 : vector<8x64xf32>
    %175 = vector.extract_strided_slice %171 {offsets = [0, 0], sizes = [8, 64], strides = [1, 1]} : vector<8x256xf32> to vector<8x64xf32>
    %176 = vector.extract_strided_slice %172 {offsets = [0, 128], sizes = [8, 64], strides = [1, 1]} : vector<8x256xf32> to vector<8x64xf32>
    %177 = arith.mulf %175, %176 : vector<8x64xf32>
    %178 = arith.addf %174, %177 : vector<8x64xf32>
    %179 = vector.extract_strided_slice %171 {offsets = [0, 192], sizes = [8, 64], strides = [1, 1]} : vector<8x256xf32> to vector<8x64xf32>
    %180 = math.tanh %178 : vector<8x64xf32>
    %181 = arith.mulf %179, %180 : vector<8x64xf32>
    %182 = arith.maximumf %160, %181 : vector<8x64xf32>
    %c56 = arith.constant 56 : index
    %c0_57 = arith.constant 0 : index
    %183 = vector.load %arg6[%c56, %c0_57] : memref<64x768xf32, #tpu.memory_space<vmem>>, vector<8x256xf32>
    %184 = arith.truncf %181 : vector<8x64xf32> to vector<8x64xbf16>
    %cst_58 = arith.constant dense<0.000000e+00> : vector<8x256xf32>
    %185 = tpu.matmul %184, %27, %cst_58 {dimension_numbers = #tpu.dot_dimension_numbers<[1], [0], [0], [1], [0, 0, 1, 1], [], []>} : vector<8x64xbf16>, vector<64x256xbf16>, vector<8x256xf32> -> vector<8x256xf32>
    %186 = arith.addf %183, %185 : vector<8x256xf32>
    %cst_59 = arith.constant 5.000000e-01 : f32
    %187 = vector.broadcast %cst_59 : f32 to vector<8x256xf32>
    %188 = arith.mulf %187, %186 : vector<8x256xf32>
    %189 = math.tanh %188 : vector<8x256xf32>
    %cst_60 = arith.constant 5.000000e-01 : f32
    %190 = vector.broadcast %cst_60 : f32 to vector<8x256xf32>
    %191 = arith.mulf %190, %189 : vector<8x256xf32>
    %cst_61 = arith.constant 5.000000e-01 : f32
    %192 = vector.broadcast %cst_61 : f32 to vector<8x256xf32>
    %193 = arith.addf %191, %192 : vector<8x256xf32>
    %194 = math.tanh %186 : vector<8x256xf32>
    %195 = vector.extract_strided_slice %193 {offsets = [0, 64], sizes = [8, 64], strides = [1, 1]} : vector<8x256xf32> to vector<8x64xf32>
    %196 = arith.mulf %195, %178 : vector<8x64xf32>
    %197 = vector.extract_strided_slice %193 {offsets = [0, 0], sizes = [8, 64], strides = [1, 1]} : vector<8x256xf32> to vector<8x64xf32>
    %198 = vector.extract_strided_slice %194 {offsets = [0, 128], sizes = [8, 64], strides = [1, 1]} : vector<8x256xf32> to vector<8x64xf32>
    %199 = arith.mulf %197, %198 : vector<8x64xf32>
    %200 = arith.addf %196, %199 : vector<8x64xf32>
    %201 = vector.extract_strided_slice %193 {offsets = [0, 192], sizes = [8, 64], strides = [1, 1]} : vector<8x256xf32> to vector<8x64xf32>
    %202 = math.tanh %200 : vector<8x64xf32>
    %203 = arith.mulf %201, %202 : vector<8x64xf32>
    %204 = arith.maximumf %182, %203 : vector<8x64xf32>
    %c1_62 = arith.constant 1 : index
    %c0_63 = arith.constant 0 : index
    %c0_64 = arith.constant 0 : index
    %205 = vector.load %arg3[%c1_62, %c0_63, %c0_64] : memref<3x64x256xbf16, #tpu.memory_space<vmem>>, vector<1x64x256xbf16>
    %206 = vector.shape_cast %205 : vector<1x64x256xbf16> to vector<64x256xbf16>
    %cst_65 = arith.constant 0xFF800000 : f32
    %207 = vector.broadcast %cst_65 : f32 to vector<8x64xf32>
    %c0_66 = arith.constant 0 : index
    %c256 = arith.constant 256 : index
    %208 = vector.load %arg6[%c0_66, %c256] : memref<64x768xf32, #tpu.memory_space<vmem>>, vector<8x256xf32>
    %209 = arith.truncf %203 : vector<8x64xf32> to vector<8x64xbf16>
    %cst_67 = arith.constant dense<0.000000e+00> : vector<8x256xf32>
    %210 = tpu.matmul %209, %206, %cst_67 {dimension_numbers = #tpu.dot_dimension_numbers<[1], [0], [0], [1], [0, 0, 1, 1], [], []>} : vector<8x64xbf16>, vector<64x256xbf16>, vector<8x256xf32> -> vector<8x256xf32>
    %211 = arith.addf %208, %210 : vector<8x256xf32>
    %cst_68 = arith.constant 5.000000e-01 : f32
    %212 = vector.broadcast %cst_68 : f32 to vector<8x256xf32>
    %213 = arith.mulf %212, %211 : vector<8x256xf32>
    %214 = math.tanh %213 : vector<8x256xf32>
    %cst_69 = arith.constant 5.000000e-01 : f32
    %215 = vector.broadcast %cst_69 : f32 to vector<8x256xf32>
    %216 = arith.mulf %215, %214 : vector<8x256xf32>
    %cst_70 = arith.constant 5.000000e-01 : f32
    %217 = vector.broadcast %cst_70 : f32 to vector<8x256xf32>
    %218 = arith.addf %216, %217 : vector<8x256xf32>
    %219 = math.tanh %211 : vector<8x256xf32>
    %220 = vector.extract_strided_slice %218 {offsets = [0, 64], sizes = [8, 64], strides = [1, 1]} : vector<8x256xf32> to vector<8x64xf32>
    %221 = arith.mulf %220, %200 : vector<8x64xf32>
    %222 = vector.extract_strided_slice %218 {offsets = [0, 0], sizes = [8, 64], strides = [1, 1]} : vector<8x256xf32> to vector<8x64xf32>
    %223 = vector.extract_strided_slice %219 {offsets = [0, 128], sizes = [8, 64], strides = [1, 1]} : vector<8x256xf32> to vector<8x64xf32>
    %224 = arith.mulf %222, %223 : vector<8x64xf32>
    %225 = arith.addf %221, %224 : vector<8x64xf32>
    %226 = vector.extract_strided_slice %218 {offsets = [0, 192], sizes = [8, 64], strides = [1, 1]} : vector<8x256xf32> to vector<8x64xf32>
    %227 = math.tanh %225 : vector<8x64xf32>
    %228 = arith.mulf %226, %227 : vector<8x64xf32>
    %229 = arith.maximumf %207, %228 : vector<8x64xf32>
    %c8_71 = arith.constant 8 : index
    %c256_72 = arith.constant 256 : index
    %230 = vector.load %arg6[%c8_71, %c256_72] : memref<64x768xf32, #tpu.memory_space<vmem>>, vector<8x256xf32>
    %231 = arith.truncf %228 : vector<8x64xf32> to vector<8x64xbf16>
    %cst_73 = arith.constant dense<0.000000e+00> : vector<8x256xf32>
    %232 = tpu.matmul %231, %206, %cst_73 {dimension_numbers = #tpu.dot_dimension_numbers<[1], [0], [0], [1], [0, 0, 1, 1], [], []>} : vector<8x64xbf16>, vector<64x256xbf16>, vector<8x256xf32> -> vector<8x256xf32>
    %233 = arith.addf %230, %232 : vector<8x256xf32>
    %cst_74 = arith.constant 5.000000e-01 : f32
    %234 = vector.broadcast %cst_74 : f32 to vector<8x256xf32>
    %235 = arith.mulf %234, %233 : vector<8x256xf32>
    %236 = math.tanh %235 : vector<8x256xf32>
    %cst_75 = arith.constant 5.000000e-01 : f32
    %237 = vector.broadcast %cst_75 : f32 to vector<8x256xf32>
    %238 = arith.mulf %237, %236 : vector<8x256xf32>
    %cst_76 = arith.constant 5.000000e-01 : f32
    %239 = vector.broadcast %cst_76 : f32 to vector<8x256xf32>
    %240 = arith.addf %238, %239 : vector<8x256xf32>
    %241 = math.tanh %233 : vector<8x256xf32>
    %242 = vector.extract_strided_slice %240 {offsets = [0, 64], sizes = [8, 64], strides = [1, 1]} : vector<8x256xf32> to vector<8x64xf32>
    %243 = arith.mulf %242, %225 : vector<8x64xf32>
    %244 = vector.extract_strided_slice %240 {offsets = [0, 0], sizes = [8, 64], strides = [1, 1]} : vector<8x256xf32> to vector<8x64xf32>
    %245 = vector.extract_strided_slice %241 {offsets = [0, 128], sizes = [8, 64], strides = [1, 1]} : vector<8x256xf32> to vector<8x64xf32>
    %246 = arith.mulf %244, %245 : vector<8x64xf32>
    %247 = arith.addf %243, %246 : vector<8x64xf32>
    %248 = vector.extract_strided_slice %240 {offsets = [0, 192], sizes = [8, 64], strides = [1, 1]} : vector<8x256xf32> to vector<8x64xf32>
    %249 = math.tanh %247 : vector<8x64xf32>
    %250 = arith.mulf %248, %249 : vector<8x64xf32>
    %251 = arith.maximumf %229, %250 : vector<8x64xf32>
    %c16_77 = arith.constant 16 : index
    %c256_78 = arith.constant 256 : index
    %252 = vector.load %arg6[%c16_77, %c256_78] : memref<64x768xf32, #tpu.memory_space<vmem>>, vector<8x256xf32>
    %253 = arith.truncf %250 : vector<8x64xf32> to vector<8x64xbf16>
    %cst_79 = arith.constant dense<0.000000e+00> : vector<8x256xf32>
    %254 = tpu.matmul %253, %206, %cst_79 {dimension_numbers = #tpu.dot_dimension_numbers<[1], [0], [0], [1], [0, 0, 1, 1], [], []>} : vector<8x64xbf16>, vector<64x256xbf16>, vector<8x256xf32> -> vector<8x256xf32>
    %255 = arith.addf %252, %254 : vector<8x256xf32>
    %cst_80 = arith.constant 5.000000e-01 : f32
    %256 = vector.broadcast %cst_80 : f32 to vector<8x256xf32>
    %257 = arith.mulf %256, %255 : vector<8x256xf32>
    %258 = math.tanh %257 : vector<8x256xf32>
    %cst_81 = arith.constant 5.000000e-01 : f32
    %259 = vector.broadcast %cst_81 : f32 to vector<8x256xf32>
    %260 = arith.mulf %259, %258 : vector<8x256xf32>
    %cst_82 = arith.constant 5.000000e-01 : f32
    %261 = vector.broadcast %cst_82 : f32 to vector<8x256xf32>
    %262 = arith.addf %260, %261 : vector<8x256xf32>
    %263 = math.tanh %255 : vector<8x256xf32>
    %264 = vector.extract_strided_slice %262 {offsets = [0, 64], sizes = [8, 64], strides = [1, 1]} : vector<8x256xf32> to vector<8x64xf32>
    %265 = arith.mulf %264, %247 : vector<8x64xf32>
    %266 = vector.extract_strided_slice %262 {offsets = [0, 0], sizes = [8, 64], strides = [1, 1]} : vector<8x256xf32> to vector<8x64xf32>
    %267 = vector.extract_strided_slice %263 {offsets = [0, 128], sizes = [8, 64], strides = [1, 1]} : vector<8x256xf32> to vector<8x64xf32>
    %268 = arith.mulf %266, %267 : vector<8x64xf32>
    %269 = arith.addf %265, %268 : vector<8x64xf32>
    %270 = vector.extract_strided_slice %262 {offsets = [0, 192], sizes = [8, 64], strides = [1, 1]} : vector<8x256xf32> to vector<8x64xf32>
    %271 = math.tanh %269 : vector<8x64xf32>
    %272 = arith.mulf %270, %271 : vector<8x64xf32>
    %273 = arith.maximumf %251, %272 : vector<8x64xf32>
    %c24_83 = arith.constant 24 : index
    %c256_84 = arith.constant 256 : index
    %274 = vector.load %arg6[%c24_83, %c256_84] : memref<64x768xf32, #tpu.memory_space<vmem>>, vector<8x256xf32>
    %275 = arith.truncf %272 : vector<8x64xf32> to vector<8x64xbf16>
    %cst_85 = arith.constant dense<0.000000e+00> : vector<8x256xf32>
    %276 = tpu.matmul %275, %206, %cst_85 {dimension_numbers = #tpu.dot_dimension_numbers<[1], [0], [0], [1], [0, 0, 1, 1], [], []>} : vector<8x64xbf16>, vector<64x256xbf16>, vector<8x256xf32> -> vector<8x256xf32>
    %277 = arith.addf %274, %276 : vector<8x256xf32>
    %cst_86 = arith.constant 5.000000e-01 : f32
    %278 = vector.broadcast %cst_86 : f32 to vector<8x256xf32>
    %279 = arith.mulf %278, %277 : vector<8x256xf32>
    %280 = math.tanh %279 : vector<8x256xf32>
    %cst_87 = arith.constant 5.000000e-01 : f32
    %281 = vector.broadcast %cst_87 : f32 to vector<8x256xf32>
    %282 = arith.mulf %281, %280 : vector<8x256xf32>
    %cst_88 = arith.constant 5.000000e-01 : f32
    %283 = vector.broadcast %cst_88 : f32 to vector<8x256xf32>
    %284 = arith.addf %282, %283 : vector<8x256xf32>
    %285 = math.tanh %277 : vector<8x256xf32>
    %286 = vector.extract_strided_slice %284 {offsets = [0, 64], sizes = [8, 64], strides = [1, 1]} : vector<8x256xf32> to vector<8x64xf32>
    %287 = arith.mulf %286, %269 : vector<8x64xf32>
    %288 = vector.extract_strided_slice %284 {offsets = [0, 0], sizes = [8, 64], strides = [1, 1]} : vector<8x256xf32> to vector<8x64xf32>
    %289 = vector.extract_strided_slice %285 {offsets = [0, 128], sizes = [8, 64], strides = [1, 1]} : vector<8x256xf32> to vector<8x64xf32>
    %290 = arith.mulf %288, %289 : vector<8x64xf32>
    %291 = arith.addf %287, %290 : vector<8x64xf32>
    %292 = vector.extract_strided_slice %284 {offsets = [0, 192], sizes = [8, 64], strides = [1, 1]} : vector<8x256xf32> to vector<8x64xf32>
    %293 = math.tanh %291 : vector<8x64xf32>
    %294 = arith.mulf %292, %293 : vector<8x64xf32>
    %295 = arith.maximumf %273, %294 : vector<8x64xf32>
    %c32_89 = arith.constant 32 : index
    %c256_90 = arith.constant 256 : index
    %296 = vector.load %arg6[%c32_89, %c256_90] : memref<64x768xf32, #tpu.memory_space<vmem>>, vector<8x256xf32>
    %297 = arith.truncf %294 : vector<8x64xf32> to vector<8x64xbf16>
    %cst_91 = arith.constant dense<0.000000e+00> : vector<8x256xf32>
    %298 = tpu.matmul %297, %206, %cst_91 {dimension_numbers = #tpu.dot_dimension_numbers<[1], [0], [0], [1], [0, 0, 1, 1], [], []>} : vector<8x64xbf16>, vector<64x256xbf16>, vector<8x256xf32> -> vector<8x256xf32>
    %299 = arith.addf %296, %298 : vector<8x256xf32>
    %cst_92 = arith.constant 5.000000e-01 : f32
    %300 = vector.broadcast %cst_92 : f32 to vector<8x256xf32>
    %301 = arith.mulf %300, %299 : vector<8x256xf32>
    %302 = math.tanh %301 : vector<8x256xf32>
    %cst_93 = arith.constant 5.000000e-01 : f32
    %303 = vector.broadcast %cst_93 : f32 to vector<8x256xf32>
    %304 = arith.mulf %303, %302 : vector<8x256xf32>
    %cst_94 = arith.constant 5.000000e-01 : f32
    %305 = vector.broadcast %cst_94 : f32 to vector<8x256xf32>
    %306 = arith.addf %304, %305 : vector<8x256xf32>
    %307 = math.tanh %299 : vector<8x256xf32>
    %308 = vector.extract_strided_slice %306 {offsets = [0, 64], sizes = [8, 64], strides = [1, 1]} : vector<8x256xf32> to vector<8x64xf32>
    %309 = arith.mulf %308, %291 : vector<8x64xf32>
    %310 = vector.extract_strided_slice %306 {offsets = [0, 0], sizes = [8, 64], strides = [1, 1]} : vector<8x256xf32> to vector<8x64xf32>
    %311 = vector.extract_strided_slice %307 {offsets = [0, 128], sizes = [8, 64], strides = [1, 1]} : vector<8x256xf32> to vector<8x64xf32>
    %312 = arith.mulf %310, %311 : vector<8x64xf32>
    %313 = arith.addf %309, %312 : vector<8x64xf32>
    %314 = vector.extract_strided_slice %306 {offsets = [0, 192], sizes = [8, 64], strides = [1, 1]} : vector<8x256xf32> to vector<8x64xf32>
    %315 = math.tanh %313 : vector<8x64xf32>
    %316 = arith.mulf %314, %315 : vector<8x64xf32>
    %317 = arith.maximumf %295, %316 : vector<8x64xf32>
    %c40_95 = arith.constant 40 : index
    %c256_96 = arith.constant 256 : index
    %318 = vector.load %arg6[%c40_95, %c256_96] : memref<64x768xf32, #tpu.memory_space<vmem>>, vector<8x256xf32>
    %319 = arith.truncf %316 : vector<8x64xf32> to vector<8x64xbf16>
    %cst_97 = arith.constant dense<0.000000e+00> : vector<8x256xf32>
    %320 = tpu.matmul %319, %206, %cst_97 {dimension_numbers = #tpu.dot_dimension_numbers<[1], [0], [0], [1], [0, 0, 1, 1], [], []>} : vector<8x64xbf16>, vector<64x256xbf16>, vector<8x256xf32> -> vector<8x256xf32>
    %321 = arith.addf %318, %320 : vector<8x256xf32>
    %cst_98 = arith.constant 5.000000e-01 : f32
    %322 = vector.broadcast %cst_98 : f32 to vector<8x256xf32>
    %323 = arith.mulf %322, %321 : vector<8x256xf32>
    %324 = math.tanh %323 : vector<8x256xf32>
    %cst_99 = arith.constant 5.000000e-01 : f32
    %325 = vector.broadcast %cst_99 : f32 to vector<8x256xf32>
    %326 = arith.mulf %325, %324 : vector<8x256xf32>
    %cst_100 = arith.constant 5.000000e-01 : f32
    %327 = vector.broadcast %cst_100 : f32 to vector<8x256xf32>
    %328 = arith.addf %326, %327 : vector<8x256xf32>
    %329 = math.tanh %321 : vector<8x256xf32>
    %330 = vector.extract_strided_slice %328 {offsets = [0, 64], sizes = [8, 64], strides = [1, 1]} : vector<8x256xf32> to vector<8x64xf32>
    %331 = arith.mulf %330, %313 : vector<8x64xf32>
    %332 = vector.extract_strided_slice %328 {offsets = [0, 0], sizes = [8, 64], strides = [1, 1]} : vector<8x256xf32> to vector<8x64xf32>
    %333 = vector.extract_strided_slice %329 {offsets = [0, 128], sizes = [8, 64], strides = [1, 1]} : vector<8x256xf32> to vector<8x64xf32>
    %334 = arith.mulf %332, %333 : vector<8x64xf32>
    %335 = arith.addf %331, %334 : vector<8x64xf32>
    %336 = vector.extract_strided_slice %328 {offsets = [0, 192], sizes = [8, 64], strides = [1, 1]} : vector<8x256xf32> to vector<8x64xf32>
    %337 = math.tanh %335 : vector<8x64xf32>
    %338 = arith.mulf %336, %337 : vector<8x64xf32>
    %339 = arith.maximumf %317, %338 : vector<8x64xf32>
    %c48_101 = arith.constant 48 : index
    %c256_102 = arith.constant 256 : index
    %340 = vector.load %arg6[%c48_101, %c256_102] : memref<64x768xf32, #tpu.memory_space<vmem>>, vector<8x256xf32>
    %341 = arith.truncf %338 : vector<8x64xf32> to vector<8x64xbf16>
    %cst_103 = arith.constant dense<0.000000e+00> : vector<8x256xf32>
    %342 = tpu.matmul %341, %206, %cst_103 {dimension_numbers = #tpu.dot_dimension_numbers<[1], [0], [0], [1], [0, 0, 1, 1], [], []>} : vector<8x64xbf16>, vector<64x256xbf16>, vector<8x256xf32> -> vector<8x256xf32>
    %343 = arith.addf %340, %342 : vector<8x256xf32>
    %cst_104 = arith.constant 5.000000e-01 : f32
    %344 = vector.broadcast %cst_104 : f32 to vector<8x256xf32>
    %345 = arith.mulf %344, %343 : vector<8x256xf32>
    %346 = math.tanh %345 : vector<8x256xf32>
    %cst_105 = arith.constant 5.000000e-01 : f32
    %347 = vector.broadcast %cst_105 : f32 to vector<8x256xf32>
    %348 = arith.mulf %347, %346 : vector<8x256xf32>
    %cst_106 = arith.constant 5.000000e-01 : f32
    %349 = vector.broadcast %cst_106 : f32 to vector<8x256xf32>
    %350 = arith.addf %348, %349 : vector<8x256xf32>
    %351 = math.tanh %343 : vector<8x256xf32>
    %352 = vector.extract_strided_slice %350 {offsets = [0, 64], sizes = [8, 64], strides = [1, 1]} : vector<8x256xf32> to vector<8x64xf32>
    %353 = arith.mulf %352, %335 : vector<8x64xf32>
    %354 = vector.extract_strided_slice %350 {offsets = [0, 0], sizes = [8, 64], strides = [1, 1]} : vector<8x256xf32> to vector<8x64xf32>
    %355 = vector.extract_strided_slice %351 {offsets = [0, 128], sizes = [8, 64], strides = [1, 1]} : vector<8x256xf32> to vector<8x64xf32>
    %356 = arith.mulf %354, %355 : vector<8x64xf32>
    %357 = arith.addf %353, %356 : vector<8x64xf32>
    %358 = vector.extract_strided_slice %350 {offsets = [0, 192], sizes = [8, 64], strides = [1, 1]} : vector<8x256xf32> to vector<8x64xf32>
    %359 = math.tanh %357 : vector<8x64xf32>
    %360 = arith.mulf %358, %359 : vector<8x64xf32>
    %361 = arith.maximumf %339, %360 : vector<8x64xf32>
    %c56_107 = arith.constant 56 : index
    %c256_108 = arith.constant 256 : index
    %362 = vector.load %arg6[%c56_107, %c256_108] : memref<64x768xf32, #tpu.memory_space<vmem>>, vector<8x256xf32>
    %363 = arith.truncf %360 : vector<8x64xf32> to vector<8x64xbf16>
    %cst_109 = arith.constant dense<0.000000e+00> : vector<8x256xf32>
    %364 = tpu.matmul %363, %206, %cst_109 {dimension_numbers = #tpu.dot_dimension_numbers<[1], [0], [0], [1], [0, 0, 1, 1], [], []>} : vector<8x64xbf16>, vector<64x256xbf16>, vector<8x256xf32> -> vector<8x256xf32>
    %365 = arith.addf %362, %364 : vector<8x256xf32>
    %cst_110 = arith.constant 5.000000e-01 : f32
    %366 = vector.broadcast %cst_110 : f32 to vector<8x256xf32>
    %367 = arith.mulf %366, %365 : vector<8x256xf32>
    %368 = math.tanh %367 : vector<8x256xf32>
    %cst_111 = arith.constant 5.000000e-01 : f32
    %369 = vector.broadcast %cst_111 : f32 to vector<8x256xf32>
    %370 = arith.mulf %369, %368 : vector<8x256xf32>
    %cst_112 = arith.constant 5.000000e-01 : f32
    %371 = vector.broadcast %cst_112 : f32 to vector<8x256xf32>
    %372 = arith.addf %370, %371 : vector<8x256xf32>
    %373 = math.tanh %365 : vector<8x256xf32>
    %374 = vector.extract_strided_slice %372 {offsets = [0, 64], sizes = [8, 64], strides = [1, 1]} : vector<8x256xf32> to vector<8x64xf32>
    %375 = arith.mulf %374, %357 : vector<8x64xf32>
    %376 = vector.extract_strided_slice %372 {offsets = [0, 0], sizes = [8, 64], strides = [1, 1]} : vector<8x256xf32> to vector<8x64xf32>
    %377 = vector.extract_strided_slice %373 {offsets = [0, 128], sizes = [8, 64], strides = [1, 1]} : vector<8x256xf32> to vector<8x64xf32>
    %378 = arith.mulf %376, %377 : vector<8x64xf32>
    %379 = arith.addf %375, %378 : vector<8x64xf32>
    %380 = vector.extract_strided_slice %372 {offsets = [0, 192], sizes = [8, 64], strides = [1, 1]} : vector<8x256xf32> to vector<8x64xf32>
    %381 = math.tanh %379 : vector<8x64xf32>
    %382 = arith.mulf %380, %381 : vector<8x64xf32>
    %383 = arith.maximumf %361, %382 : vector<8x64xf32>
    %c2 = arith.constant 2 : index
    %c0_113 = arith.constant 0 : index
    %c0_114 = arith.constant 0 : index
    %384 = vector.load %arg3[%c2, %c0_113, %c0_114] : memref<3x64x256xbf16, #tpu.memory_space<vmem>>, vector<1x64x256xbf16>
    %385 = vector.shape_cast %384 : vector<1x64x256xbf16> to vector<64x256xbf16>
    %cst_115 = arith.constant 0xFF800000 : f32
    %386 = vector.broadcast %cst_115 : f32 to vector<8x64xf32>
    %c0_116 = arith.constant 0 : index
    %c512 = arith.constant 512 : index
    %387 = vector.load %arg6[%c0_116, %c512] : memref<64x768xf32, #tpu.memory_space<vmem>>, vector<8x256xf32>
    %388 = arith.truncf %382 : vector<8x64xf32> to vector<8x64xbf16>
    %cst_117 = arith.constant dense<0.000000e+00> : vector<8x256xf32>
    %389 = tpu.matmul %388, %385, %cst_117 {dimension_numbers = #tpu.dot_dimension_numbers<[1], [0], [0], [1], [0, 0, 1, 1], [], []>} : vector<8x64xbf16>, vector<64x256xbf16>, vector<8x256xf32> -> vector<8x256xf32>
    %390 = arith.addf %387, %389 : vector<8x256xf32>
    %cst_118 = arith.constant 5.000000e-01 : f32
    %391 = vector.broadcast %cst_118 : f32 to vector<8x256xf32>
    %392 = arith.mulf %391, %390 : vector<8x256xf32>
    %393 = math.tanh %392 : vector<8x256xf32>
    %cst_119 = arith.constant 5.000000e-01 : f32
    %394 = vector.broadcast %cst_119 : f32 to vector<8x256xf32>
    %395 = arith.mulf %394, %393 : vector<8x256xf32>
    %cst_120 = arith.constant 5.000000e-01 : f32
    %396 = vector.broadcast %cst_120 : f32 to vector<8x256xf32>
    %397 = arith.addf %395, %396 : vector<8x256xf32>
    %398 = math.tanh %390 : vector<8x256xf32>
    %399 = vector.extract_strided_slice %397 {offsets = [0, 64], sizes = [8, 64], strides = [1, 1]} : vector<8x256xf32> to vector<8x64xf32>
    %400 = arith.mulf %399, %379 : vector<8x64xf32>
    %401 = vector.extract_strided_slice %397 {offsets = [0, 0], sizes = [8, 64], strides = [1, 1]} : vector<8x256xf32> to vector<8x64xf32>
    %402 = vector.extract_strided_slice %398 {offsets = [0, 128], sizes = [8, 64], strides = [1, 1]} : vector<8x256xf32> to vector<8x64xf32>
    %403 = arith.mulf %401, %402 : vector<8x64xf32>
    %404 = arith.addf %400, %403 : vector<8x64xf32>
    %405 = vector.extract_strided_slice %397 {offsets = [0, 192], sizes = [8, 64], strides = [1, 1]} : vector<8x256xf32> to vector<8x64xf32>
    %406 = math.tanh %404 : vector<8x64xf32>
    %407 = arith.mulf %405, %406 : vector<8x64xf32>
    %408 = arith.maximumf %386, %407 : vector<8x64xf32>
    %c8_121 = arith.constant 8 : index
    %c512_122 = arith.constant 512 : index
    %409 = vector.load %arg6[%c8_121, %c512_122] : memref<64x768xf32, #tpu.memory_space<vmem>>, vector<8x256xf32>
    %410 = arith.truncf %407 : vector<8x64xf32> to vector<8x64xbf16>
    %cst_123 = arith.constant dense<0.000000e+00> : vector<8x256xf32>
    %411 = tpu.matmul %410, %385, %cst_123 {dimension_numbers = #tpu.dot_dimension_numbers<[1], [0], [0], [1], [0, 0, 1, 1], [], []>} : vector<8x64xbf16>, vector<64x256xbf16>, vector<8x256xf32> -> vector<8x256xf32>
    %412 = arith.addf %409, %411 : vector<8x256xf32>
    %cst_124 = arith.constant 5.000000e-01 : f32
    %413 = vector.broadcast %cst_124 : f32 to vector<8x256xf32>
    %414 = arith.mulf %413, %412 : vector<8x256xf32>
    %415 = math.tanh %414 : vector<8x256xf32>
    %cst_125 = arith.constant 5.000000e-01 : f32
    %416 = vector.broadcast %cst_125 : f32 to vector<8x256xf32>
    %417 = arith.mulf %416, %415 : vector<8x256xf32>
    %cst_126 = arith.constant 5.000000e-01 : f32
    %418 = vector.broadcast %cst_126 : f32 to vector<8x256xf32>
    %419 = arith.addf %417, %418 : vector<8x256xf32>
    %420 = math.tanh %412 : vector<8x256xf32>
    %421 = vector.extract_strided_slice %419 {offsets = [0, 64], sizes = [8, 64], strides = [1, 1]} : vector<8x256xf32> to vector<8x64xf32>
    %422 = arith.mulf %421, %404 : vector<8x64xf32>
    %423 = vector.extract_strided_slice %419 {offsets = [0, 0], sizes = [8, 64], strides = [1, 1]} : vector<8x256xf32> to vector<8x64xf32>
    %424 = vector.extract_strided_slice %420 {offsets = [0, 128], sizes = [8, 64], strides = [1, 1]} : vector<8x256xf32> to vector<8x64xf32>
    %425 = arith.mulf %423, %424 : vector<8x64xf32>
    %426 = arith.addf %422, %425 : vector<8x64xf32>
    %427 = vector.extract_strided_slice %419 {offsets = [0, 192], sizes = [8, 64], strides = [1, 1]} : vector<8x256xf32> to vector<8x64xf32>
    %428 = math.tanh %426 : vector<8x64xf32>
    %429 = arith.mulf %427, %428 : vector<8x64xf32>
    %430 = arith.maximumf %408, %429 : vector<8x64xf32>
    %c16_127 = arith.constant 16 : index
    %c512_128 = arith.constant 512 : index
    %431 = vector.load %arg6[%c16_127, %c512_128] : memref<64x768xf32, #tpu.memory_space<vmem>>, vector<8x256xf32>
    %432 = arith.truncf %429 : vector<8x64xf32> to vector<8x64xbf16>
    %cst_129 = arith.constant dense<0.000000e+00> : vector<8x256xf32>
    %433 = tpu.matmul %432, %385, %cst_129 {dimension_numbers = #tpu.dot_dimension_numbers<[1], [0], [0], [1], [0, 0, 1, 1], [], []>} : vector<8x64xbf16>, vector<64x256xbf16>, vector<8x256xf32> -> vector<8x256xf32>
    %434 = arith.addf %431, %433 : vector<8x256xf32>
    %cst_130 = arith.constant 5.000000e-01 : f32
    %435 = vector.broadcast %cst_130 : f32 to vector<8x256xf32>
    %436 = arith.mulf %435, %434 : vector<8x256xf32>
    %437 = math.tanh %436 : vector<8x256xf32>
    %cst_131 = arith.constant 5.000000e-01 : f32
    %438 = vector.broadcast %cst_131 : f32 to vector<8x256xf32>
    %439 = arith.mulf %438, %437 : vector<8x256xf32>
    %cst_132 = arith.constant 5.000000e-01 : f32
    %440 = vector.broadcast %cst_132 : f32 to vector<8x256xf32>
    %441 = arith.addf %439, %440 : vector<8x256xf32>
    %442 = math.tanh %434 : vector<8x256xf32>
    %443 = vector.extract_strided_slice %441 {offsets = [0, 64], sizes = [8, 64], strides = [1, 1]} : vector<8x256xf32> to vector<8x64xf32>
    %444 = arith.mulf %443, %426 : vector<8x64xf32>
    %445 = vector.extract_strided_slice %441 {offsets = [0, 0], sizes = [8, 64], strides = [1, 1]} : vector<8x256xf32> to vector<8x64xf32>
    %446 = vector.extract_strided_slice %442 {offsets = [0, 128], sizes = [8, 64], strides = [1, 1]} : vector<8x256xf32> to vector<8x64xf32>
    %447 = arith.mulf %445, %446 : vector<8x64xf32>
    %448 = arith.addf %444, %447 : vector<8x64xf32>
    %449 = vector.extract_strided_slice %441 {offsets = [0, 192], sizes = [8, 64], strides = [1, 1]} : vector<8x256xf32> to vector<8x64xf32>
    %450 = math.tanh %448 : vector<8x64xf32>
    %451 = arith.mulf %449, %450 : vector<8x64xf32>
    %452 = arith.maximumf %430, %451 : vector<8x64xf32>
    %c24_133 = arith.constant 24 : index
    %c512_134 = arith.constant 512 : index
    %453 = vector.load %arg6[%c24_133, %c512_134] : memref<64x768xf32, #tpu.memory_space<vmem>>, vector<8x256xf32>
    %454 = arith.truncf %451 : vector<8x64xf32> to vector<8x64xbf16>
    %cst_135 = arith.constant dense<0.000000e+00> : vector<8x256xf32>
    %455 = tpu.matmul %454, %385, %cst_135 {dimension_numbers = #tpu.dot_dimension_numbers<[1], [0], [0], [1], [0, 0, 1, 1], [], []>} : vector<8x64xbf16>, vector<64x256xbf16>, vector<8x256xf32> -> vector<8x256xf32>
    %456 = arith.addf %453, %455 : vector<8x256xf32>
    %cst_136 = arith.constant 5.000000e-01 : f32
    %457 = vector.broadcast %cst_136 : f32 to vector<8x256xf32>
    %458 = arith.mulf %457, %456 : vector<8x256xf32>
    %459 = math.tanh %458 : vector<8x256xf32>
    %cst_137 = arith.constant 5.000000e-01 : f32
    %460 = vector.broadcast %cst_137 : f32 to vector<8x256xf32>
    %461 = arith.mulf %460, %459 : vector<8x256xf32>
    %cst_138 = arith.constant 5.000000e-01 : f32
    %462 = vector.broadcast %cst_138 : f32 to vector<8x256xf32>
    %463 = arith.addf %461, %462 : vector<8x256xf32>
    %464 = math.tanh %456 : vector<8x256xf32>
    %465 = vector.extract_strided_slice %463 {offsets = [0, 64], sizes = [8, 64], strides = [1, 1]} : vector<8x256xf32> to vector<8x64xf32>
    %466 = arith.mulf %465, %448 : vector<8x64xf32>
    %467 = vector.extract_strided_slice %463 {offsets = [0, 0], sizes = [8, 64], strides = [1, 1]} : vector<8x256xf32> to vector<8x64xf32>
    %468 = vector.extract_strided_slice %464 {offsets = [0, 128], sizes = [8, 64], strides = [1, 1]} : vector<8x256xf32> to vector<8x64xf32>
    %469 = arith.mulf %467, %468 : vector<8x64xf32>
    %470 = arith.addf %466, %469 : vector<8x64xf32>
    %471 = vector.extract_strided_slice %463 {offsets = [0, 192], sizes = [8, 64], strides = [1, 1]} : vector<8x256xf32> to vector<8x64xf32>
    %472 = math.tanh %470 : vector<8x64xf32>
    %473 = arith.mulf %471, %472 : vector<8x64xf32>
    %474 = arith.maximumf %452, %473 : vector<8x64xf32>
    %c32_139 = arith.constant 32 : index
    %c512_140 = arith.constant 512 : index
    %475 = vector.load %arg6[%c32_139, %c512_140] : memref<64x768xf32, #tpu.memory_space<vmem>>, vector<8x256xf32>
    %476 = arith.truncf %473 : vector<8x64xf32> to vector<8x64xbf16>
    %cst_141 = arith.constant dense<0.000000e+00> : vector<8x256xf32>
    %477 = tpu.matmul %476, %385, %cst_141 {dimension_numbers = #tpu.dot_dimension_numbers<[1], [0], [0], [1], [0, 0, 1, 1], [], []>} : vector<8x64xbf16>, vector<64x256xbf16>, vector<8x256xf32> -> vector<8x256xf32>
    %478 = arith.addf %475, %477 : vector<8x256xf32>
    %cst_142 = arith.constant 5.000000e-01 : f32
    %479 = vector.broadcast %cst_142 : f32 to vector<8x256xf32>
    %480 = arith.mulf %479, %478 : vector<8x256xf32>
    %481 = math.tanh %480 : vector<8x256xf32>
    %cst_143 = arith.constant 5.000000e-01 : f32
    %482 = vector.broadcast %cst_143 : f32 to vector<8x256xf32>
    %483 = arith.mulf %482, %481 : vector<8x256xf32>
    %cst_144 = arith.constant 5.000000e-01 : f32
    %484 = vector.broadcast %cst_144 : f32 to vector<8x256xf32>
    %485 = arith.addf %483, %484 : vector<8x256xf32>
    %486 = math.tanh %478 : vector<8x256xf32>
    %487 = vector.extract_strided_slice %485 {offsets = [0, 64], sizes = [8, 64], strides = [1, 1]} : vector<8x256xf32> to vector<8x64xf32>
    %488 = arith.mulf %487, %470 : vector<8x64xf32>
    %489 = vector.extract_strided_slice %485 {offsets = [0, 0], sizes = [8, 64], strides = [1, 1]} : vector<8x256xf32> to vector<8x64xf32>
    %490 = vector.extract_strided_slice %486 {offsets = [0, 128], sizes = [8, 64], strides = [1, 1]} : vector<8x256xf32> to vector<8x64xf32>
    %491 = arith.mulf %489, %490 : vector<8x64xf32>
    %492 = arith.addf %488, %491 : vector<8x64xf32>
    %493 = vector.extract_strided_slice %485 {offsets = [0, 192], sizes = [8, 64], strides = [1, 1]} : vector<8x256xf32> to vector<8x64xf32>
    %494 = math.tanh %492 : vector<8x64xf32>
    %495 = arith.mulf %493, %494 : vector<8x64xf32>
    %496 = arith.maximumf %474, %495 : vector<8x64xf32>
    %c40_145 = arith.constant 40 : index
    %c512_146 = arith.constant 512 : index
    %497 = vector.load %arg6[%c40_145, %c512_146] : memref<64x768xf32, #tpu.memory_space<vmem>>, vector<8x256xf32>
    %498 = arith.truncf %495 : vector<8x64xf32> to vector<8x64xbf16>
    %cst_147 = arith.constant dense<0.000000e+00> : vector<8x256xf32>
    %499 = tpu.matmul %498, %385, %cst_147 {dimension_numbers = #tpu.dot_dimension_numbers<[1], [0], [0], [1], [0, 0, 1, 1], [], []>} : vector<8x64xbf16>, vector<64x256xbf16>, vector<8x256xf32> -> vector<8x256xf32>
    %500 = arith.addf %497, %499 : vector<8x256xf32>
    %cst_148 = arith.constant 5.000000e-01 : f32
    %501 = vector.broadcast %cst_148 : f32 to vector<8x256xf32>
    %502 = arith.mulf %501, %500 : vector<8x256xf32>
    %503 = math.tanh %502 : vector<8x256xf32>
    %cst_149 = arith.constant 5.000000e-01 : f32
    %504 = vector.broadcast %cst_149 : f32 to vector<8x256xf32>
    %505 = arith.mulf %504, %503 : vector<8x256xf32>
    %cst_150 = arith.constant 5.000000e-01 : f32
    %506 = vector.broadcast %cst_150 : f32 to vector<8x256xf32>
    %507 = arith.addf %505, %506 : vector<8x256xf32>
    %508 = math.tanh %500 : vector<8x256xf32>
    %509 = vector.extract_strided_slice %507 {offsets = [0, 64], sizes = [8, 64], strides = [1, 1]} : vector<8x256xf32> to vector<8x64xf32>
    %510 = arith.mulf %509, %492 : vector<8x64xf32>
    %511 = vector.extract_strided_slice %507 {offsets = [0, 0], sizes = [8, 64], strides = [1, 1]} : vector<8x256xf32> to vector<8x64xf32>
    %512 = vector.extract_strided_slice %508 {offsets = [0, 128], sizes = [8, 64], strides = [1, 1]} : vector<8x256xf32> to vector<8x64xf32>
    %513 = arith.mulf %511, %512 : vector<8x64xf32>
    %514 = arith.addf %510, %513 : vector<8x64xf32>
    %515 = vector.extract_strided_slice %507 {offsets = [0, 192], sizes = [8, 64], strides = [1, 1]} : vector<8x256xf32> to vector<8x64xf32>
    %516 = math.tanh %514 : vector<8x64xf32>
    %517 = arith.mulf %515, %516 : vector<8x64xf32>
    %518 = arith.maximumf %496, %517 : vector<8x64xf32>
    %c48_151 = arith.constant 48 : index
    %c512_152 = arith.constant 512 : index
    %519 = vector.load %arg6[%c48_151, %c512_152] : memref<64x768xf32, #tpu.memory_space<vmem>>, vector<8x256xf32>
    %520 = arith.truncf %517 : vector<8x64xf32> to vector<8x64xbf16>
    %cst_153 = arith.constant dense<0.000000e+00> : vector<8x256xf32>
    %521 = tpu.matmul %520, %385, %cst_153 {dimension_numbers = #tpu.dot_dimension_numbers<[1], [0], [0], [1], [0, 0, 1, 1], [], []>} : vector<8x64xbf16>, vector<64x256xbf16>, vector<8x256xf32> -> vector<8x256xf32>
    %522 = arith.addf %519, %521 : vector<8x256xf32>
    %cst_154 = arith.constant 5.000000e-01 : f32
    %523 = vector.broadcast %cst_154 : f32 to vector<8x256xf32>
    %524 = arith.mulf %523, %522 : vector<8x256xf32>
    %525 = math.tanh %524 : vector<8x256xf32>
    %cst_155 = arith.constant 5.000000e-01 : f32
    %526 = vector.broadcast %cst_155 : f32 to vector<8x256xf32>
    %527 = arith.mulf %526, %525 : vector<8x256xf32>
    %cst_156 = arith.constant 5.000000e-01 : f32
    %528 = vector.broadcast %cst_156 : f32 to vector<8x256xf32>
    %529 = arith.addf %527, %528 : vector<8x256xf32>
    %530 = math.tanh %522 : vector<8x256xf32>
    %531 = vector.extract_strided_slice %529 {offsets = [0, 64], sizes = [8, 64], strides = [1, 1]} : vector<8x256xf32> to vector<8x64xf32>
    %532 = arith.mulf %531, %514 : vector<8x64xf32>
    %533 = vector.extract_strided_slice %529 {offsets = [0, 0], sizes = [8, 64], strides = [1, 1]} : vector<8x256xf32> to vector<8x64xf32>
    %534 = vector.extract_strided_slice %530 {offsets = [0, 128], sizes = [8, 64], strides = [1, 1]} : vector<8x256xf32> to vector<8x64xf32>
    %535 = arith.mulf %533, %534 : vector<8x64xf32>
    %536 = arith.addf %532, %535 : vector<8x64xf32>
    %537 = vector.extract_strided_slice %529 {offsets = [0, 192], sizes = [8, 64], strides = [1, 1]} : vector<8x256xf32> to vector<8x64xf32>
    %538 = math.tanh %536 : vector<8x64xf32>
    %539 = arith.mulf %537, %538 : vector<8x64xf32>
    %540 = arith.maximumf %518, %539 : vector<8x64xf32>
    %c56_157 = arith.constant 56 : index
    %c512_158 = arith.constant 512 : index
    %541 = vector.load %arg6[%c56_157, %c512_158] : memref<64x768xf32, #tpu.memory_space<vmem>>, vector<8x256xf32>
    %542 = arith.truncf %539 : vector<8x64xf32> to vector<8x64xbf16>
    %cst_159 = arith.constant dense<0.000000e+00> : vector<8x256xf32>
    %543 = tpu.matmul %542, %385, %cst_159 {dimension_numbers = #tpu.dot_dimension_numbers<[1], [0], [0], [1], [0, 0, 1, 1], [], []>} : vector<8x64xbf16>, vector<64x256xbf16>, vector<8x256xf32> -> vector<8x256xf32>
    %544 = arith.addf %541, %543 : vector<8x256xf32>
    %cst_160 = arith.constant 5.000000e-01 : f32
    %545 = vector.broadcast %cst_160 : f32 to vector<8x256xf32>
    %546 = arith.mulf %545, %544 : vector<8x256xf32>
    %547 = math.tanh %546 : vector<8x256xf32>
    %cst_161 = arith.constant 5.000000e-01 : f32
    %548 = vector.broadcast %cst_161 : f32 to vector<8x256xf32>
    %549 = arith.mulf %548, %547 : vector<8x256xf32>
    %cst_162 = arith.constant 5.000000e-01 : f32
    %550 = vector.broadcast %cst_162 : f32 to vector<8x256xf32>
    %551 = arith.addf %549, %550 : vector<8x256xf32>
    %552 = math.tanh %544 : vector<8x256xf32>
    %553 = vector.extract_strided_slice %551 {offsets = [0, 64], sizes = [8, 64], strides = [1, 1]} : vector<8x256xf32> to vector<8x64xf32>
    %554 = arith.mulf %553, %536 : vector<8x64xf32>
    %555 = vector.extract_strided_slice %551 {offsets = [0, 0], sizes = [8, 64], strides = [1, 1]} : vector<8x256xf32> to vector<8x64xf32>
    %556 = vector.extract_strided_slice %552 {offsets = [0, 128], sizes = [8, 64], strides = [1, 1]} : vector<8x256xf32> to vector<8x64xf32>
    %557 = arith.mulf %555, %556 : vector<8x64xf32>
    %558 = arith.addf %554, %557 : vector<8x64xf32>
    %559 = vector.extract_strided_slice %551 {offsets = [0, 192], sizes = [8, 64], strides = [1, 1]} : vector<8x256xf32> to vector<8x64xf32>
    %560 = math.tanh %558 : vector<8x64xf32>
    %561 = arith.mulf %559, %560 : vector<8x64xf32>
    %562 = arith.maximumf %540, %561 : vector<8x64xf32>
    %563 = tpu.concatenate %204, %383, %562 in 1 : vector<8x64xf32>, vector<8x64xf32>, vector<8x64xf32> -> vector<8x192xf32>
    %c0_163 = arith.constant 0 : index
    %c0_164 = arith.constant 0 : index
    %564 = vector.load %arg5[%c0_163, %c0_164] : memref<8x192xf32, #tpu.memory_space<vmem>>, vector<8x192xf32>
    tpu.vector_store %arg5[%c0_163, %c0_164], %563 {strides = array<i32>} : memref<8x192xf32, #tpu.memory_space<vmem>>, vector<8x192xf32>,
    return
  }
}

</mosaic_0001>

<bundles_post_ra>
// kernel: sentence_encoder.1
= control target key start
LH: loop header
LB: loop body
LE: loop exit
PB: predicated region body
PF: predicated region fallthrough
CT: control target
= control target key end

     0   :  { %10 = vsyncpa [#allocation4], 0  ;;  %s4722_s0 = inlined_call_operand.vmem [shape: s32[64,2], index: 0, kind: input, shape index: {}]   ;;  %s4723_s1 = inlined_call_operand.hbm [shape: bf16[128,768], index: 1, kind: input, shape index: {}]   ;;  %s4724_s2 = inlined_call_operand.hbm [shape: bf16[128,768], index: 2, kind: input, shape index: {}]   ;;  %s4725_s3 = inlined_call_operand.hbm [shape: bf16[3,64,256], index: 3, kind: input, shape index: {}]   ;;  %s4726_s4 = inlined_call_operand.vmem [shape: f32[1,768], index: 4, kind: input, shape index: {}]   ;;  %s4727_s5 = inlined_call_operand.vmem [shape: f32[8,192], index: 5, kind: output, shape index: {}]  }
   0x1   :  { %11 = vsyncpa [#allocation6], 0  ;;  %s3860_s18 = smov [#allocation5]   ;;  %s3861_s20 = smov [#allocation3]  }
   0x2   :  { %s31_s19 = sshll.u32 %s3860_s18, 4  ;;  %s19_s21 = sshll.u32 %s3861_s20, 4  ;;  %s32_s19 = int_to_ptr.vmem [resolvable:$true] %s31_s19  ;;  %s3901_s21 = int_to_ptr.vmem [resolvable:$true] %s19_s21 }
   0x3   :  { %s3790_s24 = scalar_lea.hbm %s4724_s2, 6144 }
   0x4   :  { %p3791_p0 = scmp.ne.s32.totalorder %s4724_s2, %s3790_s24  ;;  %p3794_p1 = scmp.lt.u32.totalorder %s3790_s24, %s4724_s2 }
   0x6   :  { %p3796_p2 = pnand %p3794_p1, %p3791_p0 }
   0x8   :  { %3799 = shalt.err (!%p3796_p2)
}
   0x9   :  { %s3800_s29 = scalar_lea.vmem %s32_s19, 6144  ;;  %p3805_p4 = scmp.lt.s32.totalorder %s32_s19, %s32_s19 }
   0xa   :  { %p3801_p3 = scmp.ne.s32.totalorder %s32_s19, %s3800_s29  ;;  %p3806_p5 = scmp.lt.s32.totalorder %s3800_s29, %s3800_s29 }
   0xc   :  { %p3807_p6 = por %p3806_p5, %p3805_p4 }
   0xe   :  { %p3808_p7 = pnand %p3807_p6, %p3801_p3 }
  0x10   :  { %3811 = shalt.err (!%p3808_p7)
}
  0x11   :  { %s3862_s30 = smov 384   ;;  %s3863_s6 = smov 24  }
  0x12   :  { %37 = dma.hbm_to_vmem [thread:$0]  %s4724_s2, 6144, %s32_s19, [#allocation6], %s3862_s30, %s3862_s30, %s3863_s6  }
  0x13   :  { %s3812_s11 = scalar_lea.hbm %s4723_s1, 6144 }
  0x14   :  { %p3813_p8 = scmp.ne.s32.totalorder %s4723_s1, %s3812_s11  ;;  %p3816_p9 = scmp.lt.u32.totalorder %s3812_s11, %s4723_s1 }
  0x16   :  { %p3818_p10 = pnand %p3816_p9, %p3813_p8 }
  0x18   :  { %3821 = shalt.err (!%p3818_p10)
}
  0x19   :  { %s3822_s16 = scalar_lea.vmem %s3901_s21, 6144  ;;  %p3827_p12 = scmp.lt.s32.totalorder %s3901_s21, %s3901_s21 }
  0x1a   :  { %p3823_p11 = scmp.ne.s32.totalorder %s3901_s21, %s3822_s16  ;;  %p3828_p13 = scmp.lt.s32.totalorder %s3822_s16, %s3822_s16 }
  0x1c   :  { %p3829_p0 = por %p3828_p13, %p3827_p12 }
  0x1e   :  { %p3830_p1 = pnand %p3829_p0, %p3823_p11 }
  0x20   :  { %3833 = shalt.err (!%p3830_p1)
}
  0x21   :  { %25 = dma.hbm_to_vmem [thread:$0]  %s4723_s1, 6144, %s3901_s21, [#allocation4], %s3862_s30, %s3862_s30, %s3863_s6  }
  0x22   :  { %s3864_s18 = smov [#allocation7]   ;;  %s3834_s23 = scalar_lea.hbm %s4725_s3, 3072 }
  0x23   :  { %s43_s19 = sshll.u32 %s3864_s18, 4  ;;  %p3835_p2 = scmp.ne.s32.totalorder %s4725_s3, %s3834_s23  ;;  %s44_s19 = int_to_ptr.vmem [resolvable:$true] %s43_s19 }
  0x24   :  { %p3838_p3 = scmp.lt.u32.totalorder %s3834_s23, %s4725_s3 }
  0x26   :  { %p3840_p4 = pnand %p3838_p3, %p3835_p2 }
  0x28   :  { %3843 = shalt.err (!%p3840_p4)
}
  0x29   :  { %s3844_s28 = scalar_lea.vmem %s44_s19, 3072  ;;  %p3849_p6 = scmp.lt.s32.totalorder %s44_s19, %s44_s19 }
  0x2a   :  { %p3845_p5 = scmp.ne.s32.totalorder %s44_s19, %s3844_s28  ;;  %p3850_p7 = scmp.lt.s32.totalorder %s3844_s28, %s3844_s28 }
  0x2c   :  { %p3851_p8 = por %p3850_p7, %p3849_p6 }
  0x2e   :  { %p3852_p9 = pnand %p3851_p8, %p3845_p5 }
  0x30   :  { %3855 = shalt.err (!%p3852_p9)
}
  0x31   :  { %s3865_s1 = smov 128   ;;  %s3866_s21 = smov 8  }
  0x32   :  { %49 = dma.hbm_to_vmem [thread:$0]  %s4725_s3, 3072, %s44_s19, [#allocation6], %s3865_s1, %s3865_s1, %s3866_s21  }
  0x33   :  { %3856 = dma.done.wait [#allocation4], 6144  }
  0x34   :  { %3857 = vsyncadd [#allocation4], 4294961152 }
  0x35   :  { %3858 = dma.done.wait [#allocation6], 9216  }
  0x36   :  { %3859 = vsyncadd [#allocation6], 4294958080  ;;  %v3867_v0 = vmov 1   ;;  %v4728_v1 = vmov 0   ;;  %v66_v2 = vld [vmem:[%s4722_s0 + $0x10] sm:$0xff]  ;;  %v64_v3 = vld [vmem:[%s4722_s0] sm:$0xff]  ;;  %v62_v44 = vlaneseq }
  0x37   :  { %3414 = vset.pattern.permute.xlu1 %v3867_v0  ;;  %3413 = vset.pattern.permute.xlu0 %v3867_v0  ;;  %v67_v4 = vld [vmem:[%s4722_s0 + $0x18] sm:$0xff]  ;;  %v65_v5 = vld [vmem:[%s4722_s0 + $0x8] sm:$0xff]  ;;  %v68_v9 = vld [vmem:[%s4722_s0 + $0x20] sm:$0xff]  ;;  %v3869_v54 = vmov 1.0|1.0  }
  0x38   :  { %528 = vmatprep.mubr.bf16.mxu0 %v4728_v1  ;;  %601 = vmatprep.mubr.bf16.mxu1 %v4728_v1  ;;  %v3418_v6 = vld [vmem:[#allocation5 + $0x4] ss:$24 sps:$4 sm:$0xff]   ;;  %v3420_v7 = vld [vmem:[#allocation5] ss:$24 sps:$4 sm:$0xff]   ;;  %v69_v8 = vld [vmem:[%s4722_s0 + $0x28] sm:$0xff]  ;;  %v3976_v46 = vand.u32 127, %v62_v44 }
  0x39   :  { %123 = vperm.xlu1 %3414, %v66_v2   ;;  %117 = vperm.xlu0 %3413, %v64_v3   ;;  %v3421_v10 = vld [vmem:[#allocation5 + $0xc] ss:$24 sps:$4 sm:$0xff]   ;;  %v3423_v11 = vld [vmem:[#allocation5 + $0x8] ss:$24 sps:$4 sm:$0xff]   ;;  %v3427_v14 = vld [vmem:[#allocation5 + $0x3c] ss:$24 sps:$4 sm:$0xff]  }
  0x3a   :  { %496 = vmatprep.subr.bf16.mxu0 %v3418_v6  ;;  %569 = vmatprep.subr.bf16.mxu1 %v3421_v10  ;;  %v3424_v12 = vld [vmem:[#allocation5 + $0x34] ss:$24 sps:$4 sm:$0xff]   ;;  %v3426_v13 = vld [vmem:[#allocation5 + $0x30] ss:$24 sps:$4 sm:$0xff]   ;;  %v71_v16 = vld [vmem:[%s4722_s0 + $0x38] sm:$0xff] }
  0x3b   :  { %497 = vmatpush1.bf16.msra.mxu0 %v3420_v7  ;;  %570 = vmatpush1.bf16.msra.mxu1 %v3423_v11  ;;  %v3429_v15 = vld [vmem:[#allocation5 + $0x38] ss:$24 sps:$4 sm:$0xff]   ;;  %v3430_v17 = vld [vmem:[#allocation5 + $0x64] ss:$24 sps:$4 sm:$0xff]   ;;  %v3435_v21 = vld [vmem:[#allocation5 + $0x68] ss:$24 sps:$4 sm:$0xff]  }
  0x3c   :  { %498 = vmatprep.subr.bf16.mxu0 %v3424_v12  ;;  %v70_v18 = vld [vmem:[%s4722_s0 + $0x30] sm:$0xff]  ;;  %571 = vmatprep.subr.bf16.mxu1 %v3427_v14  ;;  %v3432_v19 = vld [vmem:[#allocation5 + $0x60] ss:$24 sps:$4 sm:$0xff]   ;;  %v3433_v20 = vld [vmem:[#allocation5 + $0x6c] ss:$24 sps:$4 sm:$0xff]  }
  0x3d   :  { %126 = vperm.xlu1 %3414, %v67_v4   ;;  %120 = vperm.xlu0 %3413, %v65_v5   ;;  %v3436_v22 = vld [vmem:[#allocation5 + $0x94] ss:$24 sps:$4 sm:$0xff]   ;;  %v3438_v24 = vld [vmem:[#allocation5 + $0x90] ss:$24 sps:$4 sm:$0xff]   ;;  %v3442_v26 = vld [vmem:[#allocation5 + $0xc4] ss:$24 sps:$4 sm:$0xff]  }
  0x3e   :  { %v3439_v23 = vld [vmem:[#allocation5 + $0x9c] ss:$24 sps:$4 sm:$0xff]   ;;  %v3441_v25 = vld [vmem:[#allocation5 + $0x98] ss:$24 sps:$4 sm:$0xff]   ;;  %v3445_v27 = vld [vmem:[#allocation5 + $0xcc] ss:$24 sps:$4 sm:$0xff]  }
  0x3f   :  { %499 = vmatpush1.bf16.msra.mxu0 %v3426_v13  ;;  %572 = vmatpush1.bf16.msra.mxu1 %v3429_v15  ;;  %v3444_v28 = vld [vmem:[#allocation5 + $0xc0] ss:$24 sps:$4 sm:$0xff]   ;;  %v3448_v30 = vld [vmem:[#allocation5 + $0xf4] ss:$24 sps:$4 sm:$0xff]   ;;  %v3450_v32 = vld [vmem:[#allocation5 + $0xf0] ss:$24 sps:$4 sm:$0xff]  }
  0x40   :  { %500 = vmatprep.subr.bf16.mxu0 %v3430_v17  ;;  %573 = vmatprep.subr.bf16.mxu1 %v3433_v20  ;;  %v3447_v29 = vld [vmem:[#allocation5 + $0xc8] ss:$24 sps:$4 sm:$0xff]   ;;  %v3451_v31 = vld [vmem:[#allocation5 + $0xfc] ss:$24 sps:$4 sm:$0xff]   ;;  %v3453_v33 = vld [vmem:[#allocation5 + $0xf8] ss:$24 sps:$4 sm:$0xff]  }
  0x41   :  { %132 = vperm.xlu1 %3414, %v69_v8   ;;  %129 = vperm.xlu0 %3413, %v68_v9   ;;  %v3454_v34 = vld [vmem:[#allocation5 + $0x124] ss:$24 sps:$4 sm:$0xff]   ;;  %v3456_v36 = vld [vmem:[#allocation5 + $0x120] ss:$24 sps:$4 sm:$0xff]   ;;  %v3460_v38 = vld [vmem:[#allocation5 + $0x154] ss:$24 sps:$4 sm:$0xff]  }
  0x42   :  { %v3457_v35 = vld [vmem:[#allocation5 + $0x12c] ss:$24 sps:$4 sm:$0xff]   ;;  %v3459_v37 = vld [vmem:[#allocation5 + $0x128] ss:$24 sps:$4 sm:$0xff]   ;;  %v3463_v39 = vld [vmem:[#allocation5 + $0x15c] ss:$24 sps:$4 sm:$0xff]  }
  0x43   :  { %501 = vmatpush1.bf16.msra.mxu0 %v3432_v19  ;;  %574 = vmatpush1.bf16.msra.mxu1 %v3435_v21  ;;  %v3462_v40 = vld [vmem:[#allocation5 + $0x150] ss:$24 sps:$4 sm:$0xff]   ;;  %v3468_v42 = vld [vmem:[#allocation5 + $0x14] ss:$24 sps:$4 sm:$0xff]   ;;  %v3474_v51 = vld [vmem:[#allocation5 + $0x44] ss:$24 sps:$4 sm:$0xff]  }
  0x44   :  { %502 = vmatprep.subr.bf16.mxu0 %v3436_v22  ;;  %575 = vmatprep.subr.bf16.mxu1 %v3439_v23  ;;  %v3465_v41 = vld [vmem:[#allocation5 + $0x158] ss:$24 sps:$4 sm:$0xff]   ;;  %v3471_v43 = vld [vmem:[#allocation3 + $0xc] ss:$24 sps:$4 sm:$0xff]   ;;  %v3469_v50 = vld [vmem:[#allocation3 + $0x8] ss:$24 sps:$4 sm:$0xff]  }
  0x45   :  { %138 = vperm.xlu1 %3414, %v71_v16   ;;  %135 = vperm.xlu0 %3413, %v70_v18   ;;  %v3466_v49 = vld [vmem:[#allocation5 + $0x10] ss:$24 sps:$4 sm:$0xff]   ;;  %v3477_v52 = vld [vmem:[#allocation3 + $0x3c] ss:$24 sps:$4 sm:$0xff]   ;;  %v3472_v55 = vld [vmem:[#allocation5 + $0x40] ss:$24 sps:$4 sm:$0xff]  }
  0x46   :  { %v3475_v56 = vld [vmem:[#allocation3 + $0x38] ss:$24 sps:$4 sm:$0xff]   ;;  %v3480_v57 = vld [vmem:[#allocation5 + $0x74] ss:$24 sps:$4 sm:$0xff]   ;;  %v3481_v61 = vld [vmem:[#allocation3 + $0x68] ss:$24 sps:$4 sm:$0xff]  }
  0x47   :  { %503 = vmatpush1.bf16.msra.mxu0 %v3438_v24  ;;  %576 = vmatpush1.bf16.msra.mxu1 %v3441_v25  ;;  %v3483_v58 = vld [vmem:[#allocation3 + $0x6c] ss:$24 sps:$4 sm:$0xff]   ;;  %v3478_v60 = vld [vmem:[#allocation5 + $0x70] ss:$24 sps:$4 sm:$0xff]   ;;  %v3489_v63 = vld [vmem:[#allocation3 + $0x9c] ss:$24 sps:$4 sm:$0xff]  }
  0x48   :  { %504 = vmatprep.subr.bf16.mxu0 %v3442_v26  ;;  %577 = vmatprep.subr.bf16.mxu1 %v3445_v27  ;;  %v3486_v62 = vld [vmem:[#allocation5 + $0xa4] ss:$24 sps:$4 sm:$0xff]   ;;  %v3492_v6 = vld [vmem:[#allocation5 + $0xd4] ss:$24 sps:$4 sm:$0xff]   ;;  %v3496_v15 = vld [vmem:[#allocation5 + $0x100] ss:$24 sps:$4 sm:$0xff]  }
  0x49   :  { %3416 = vset.pattern.permute.xlu1 %v4728_v1  ;;  %3415 = vset.pattern.permute.xlu0 %v4728_v1  ;;  %v3495_v7 = vld [vmem:[#allocation3 + $0xcc] ss:$24 sps:$4 sm:$0xff]   ;;  %v3501_v11 = vld [vmem:[#allocation3 + $0xfc] ss:$24 sps:$4 sm:$0xff]   ;;  %v3502_v19 = vld [vmem:[#allocation5 + $0x130] ss:$24 sps:$4 sm:$0xff]  }
  0x4a   :  { %76 = vperm.xlu1 %3416, %v65_v5   ;;  %73 = vperm.xlu0 %3415, %v64_v3   ;;  %v3487_v5 = vld [vmem:[#allocation3 + $0x98] ss:$24 sps:$4 sm:$0xff]   ;;  %v3498_v10 = vld [vmem:[#allocation5 + $0x104] ss:$24 sps:$4 sm:$0xff]   ;;  %v3504_v17 = vld [vmem:[#allocation5 + $0x134] ss:$24 sps:$4 sm:$0xff]  }
  0x4b   :  { %505 = vmatpush1.bf16.msra.mxu0 %v3444_v28  ;;  %578 = vmatpush1.bf16.msra.mxu1 %v3447_v29  ;;  %v3505_v20 = vld [vmem:[#allocation3 + $0x128] ss:$24 sps:$4 sm:$0xff]   ;;  %v3510_v21 = vld [vmem:[#allocation5 + $0x164] ss:$24 sps:$4 sm:$0xff]   ;;  %v3511_v27 = vld [vmem:[#allocation3 + $0x158] ss:$24 sps:$4 sm:$0xff]  }
  0x4c   :  { %506 = vmatprep.subr.bf16.mxu0 %v3448_v30  ;;  %579 = vmatprep.subr.bf16.mxu1 %v3451_v31  ;;  %v3513_v22 = vld [vmem:[#allocation3 + $0x15c] ss:$24 sps:$4 sm:$0xff]   ;;  %v3508_v26 = vld [vmem:[#allocation5 + $0x160] ss:$24 sps:$4 sm:$0xff]   ;;  %v4034_v29 = vld [vmem:[#allocation7 + $0x4] ss:$8 sps:$4 sm:$0xff]  }
  0x4d   :  { %v3516_v28 = vld [vmem:[#allocation3 + $0x4] ss:$24 sps:$4 sm:$0xff]   ;;  %v3514_v31 = vld [vmem:[#allocation3] ss:$24 sps:$4 sm:$0xff]  }
  0x4e   :  { %79 = vperm.xlu1 %3416, %v66_v2   ;;  %82 = vperm.xlu0 %3415, %v67_v4   ;;  %v3484_v4 = vld [vmem:[#allocation5 + $0xa0] ss:$24 sps:$4 sm:$0xff]  }
  0x4f   :  { %507 = vmatpush1.bf16.msra.mxu0 %v3450_v32  ;;  %580 = vmatpush1.bf16.msra.mxu1 %v3453_v33  ;;  %v4042_v32 = vld [vmem:[#allocation7] ss:$8 sps:$4 sm:$0xff]   ;;  %v3522_v33 = vld [vmem:[#allocation3 + $0x34] ss:$24 sps:$4 sm:$0xff]  }
  0x50   :  { %508 = vmatprep.subr.bf16.mxu0 %v3454_v34  ;;  %581 = vmatprep.subr.bf16.mxu1 %v3457_v35  ;;  %v4045_v34 = vld [vmem:[#allocation7 + $0x14] ss:$8 sps:$4 sm:$0xff]   ;;  %v3520_v35 = vld [vmem:[#allocation3 + $0x30] ss:$24 sps:$4 sm:$0xff]   ;;  %v3532_v53 = vld [vmem:[#allocation3 + $0xc0] ss:$24 sps:$4 sm:$0xff]  }
  0x51   :  { %v3565_v12 = vld [vmem:[#allocation3 + $0x100] ss:$24 sps:$4 sm:$0xff]  }
  0x52   :  { %85 = vperm.xlu1 %3416, %v68_v9   ;;  %88 = vperm.xlu0 %3415, %v69_v8   ;;  %v3490_v8 = vld [vmem:[#allocation5 + $0xd0] ss:$24 sps:$4 sm:$0xff]  }
  0x53   :  { %509 = vmatpush1.bf16.msra.mxu0 %v3456_v36  ;;  %582 = vmatpush1.bf16.msra.mxu1 %v3459_v37  ;;  %v3493_v9 = vld [vmem:[#allocation3 + $0xc8] ss:$24 sps:$4 sm:$0xff]   ;;  %v4054_v36 = vld [vmem:[#allocation7 + $0x10] ss:$8 sps:$4 sm:$0xff]   ;;  %v3525_v37 = vld [vmem:[#allocation3 + $0x64] ss:$24 sps:$4 sm:$0xff]  }
  0x54   :  { %510 = vmatprep.subr.bf16.mxu0 %v3460_v38  ;;  %583 = vmatprep.subr.bf16.mxu1 %v3463_v39  ;;  %v4057_v38 = vld [vmem:[#allocation7 + $0x24] ss:$8 sps:$4 sm:$0xff]  }
  0x56   :  { %91 = vperm.xlu1 %3416, %v70_v18   ;;  %94 = vperm.xlu0 %3415, %v71_v16   ;;  %v3499_v16 = vld [vmem:[#allocation3 + $0xf8] ss:$24 sps:$4 sm:$0xff]   ;;  %v3507_v18 = vld [vmem:[#allocation3 + $0x12c] ss:$24 sps:$4 sm:$0xff]  }
  0x57   :  { %511 = vmatpush1.bf16.msra.mxu0 %v3462_v40  ;;  %584 = vmatpush1.bf16.msra.mxu1 %v3465_v41  ;;  %v3523_v41 = vld [vmem:[#allocation3 + $0x60] ss:$24 sps:$4 sm:$0xff]  }
  0x58   :  { %642 = vmatprep.subr.bf16.mxu0 %v3468_v42  ;;  %1028 = vmatprep.subr.bf16.mxu1 %v3471_v43  ;;  %v3531_v42 = vld [vmem:[#allocation3 + $0x94] ss:$24 sps:$4 sm:$0xff]  }
  0x5a   :  { %3417 = vset.pattern.permute.xlu0 %v3867_v0  ;;  %v3547_v0 = vld [vmem:[#allocation3 + $0x150] ss:$24 sps:$4 sm:$0xff]  }
  0xb8   :  { %v118_v45 = vpop.permute.xlu0 %117  ;;  %v124_v48 = vpop.permute.xlu1 %123 }
  0xb9   :  { %vm140_vm1 = vcmp.eq.s32.totalorder %v3976_v46, %v118_v45  ;;  %vm142_vm3 = vcmp.eq.s32.totalorder %v3976_v46, %v124_v48  ;;  %v4069_v45 = vld [vmem:[#allocation7 + $0x20] ss:$8 sps:$4 sm:$0xff]  }
  0xba   :  { %v3529_v48 = vld [vmem:[#allocation3 + $0x90] ss:$24 sps:$4 sm:$0xff]  }
  0xbc   :  { %v121_v47 = vpop.permute.xlu0 %120  ;;  %v127_v59 = vpop.permute.xlu1 %126 }
  0xbd   :  { %vm141_vm0 = vcmp.eq.s32.totalorder %v3976_v46, %v121_v47  ;;  %vm143_vm4 = vcmp.eq.s32.totalorder %v3976_v46, %v127_v59  ;;  %v4077_v47 = vld [vmem:[#allocation7 + $0x34] ss:$8 sps:$4 sm:$0xff]   ;;  %v3538_v59 = vld [vmem:[#allocation3 + $0xf0] ss:$24 sps:$4 sm:$0xff]  }
  0xbe   :  { %vm3980_vm2 = vmpackc.low %vm141_vm0, %vm140_vm1 }
  0xbf   :  { %3212 = vmatmul.mubr.msk.bf16.vlgmr.msra.gmra.mrb[0].mxu0 %vm3980_vm2, %v3869_v54  ;;  %3220 = vmatmul.mubr.msk.bf16.vlgmr.msra.gmra.mrb[0].mxu1 %vm3980_vm2, %v3869_v54  ;;  %vm3994_vm5 = vmpackc.low %vm143_vm4, %vm142_vm3 }
  0xc0   :  { %643 = vmatpush1.bf16.msra.mxu0 %v3466_v49  ;;  %1029 = vmatpush1.bf16.msra.mxu1 %v3469_v50  ;;  %v133_v2 = vpop.permute.xlu1 %132  ;;  %v130_v3 = vpop.permute.xlu0 %129  ;;  %v3534_v49 = vld [vmem:[#allocation3 + $0xc4] ss:$24 sps:$4 sm:$0xff]  }
  0xc1   :  { %644 = vmatprep.subr.bf16.mxu0 %v3474_v51  ;;  %1030 = vmatprep.subr.bf16.mxu1 %v3477_v52  ;;  %vm145_vm6 = vcmp.eq.s32.totalorder %v3976_v46, %v133_v2  ;;  %vm144_vm7 = vcmp.eq.s32.totalorder %v3976_v46, %v130_v3  ;;  %v4082_v52 = vld [vmem:[#allocation7 + $0x30] ss:$8 sps:$4 sm:$0xff]   ;;  %v3555_v3 = vld [vmem:[#allocation3 + $0x44] ss:$24 sps:$4 sm:$0xff]  }
  0xc2   :  { %538 = vmatprep.mubr.bf16.mxu0 %v4728_v1  ;;  %611 = vmatprep.mubr.bf16.mxu1 %v4728_v1  ;;  %vm4008_vm8 = vmpackc.low %vm145_vm6, %vm144_vm7  ;;  %v3550_v2 = vld [vmem:[#allocation3 + $0x10] ss:$24 sps:$4 sm:$0xff]  }
  0xc4   :  { %645 = vmatpush1.bf16.msra.mxu0 %v3472_v55  ;;  %1031 = vmatpush1.bf16.msra.mxu1 %v3475_v56  ;;  %v139_v13 = vpop.permute.xlu1 %138  ;;  %v136_v14 = vpop.permute.xlu0 %135  ;;  %v3540_v55 = vld [vmem:[#allocation3 + $0xf4] ss:$24 sps:$4 sm:$0xff]  }
  0xc5   :  { %646 = vmatprep.subr.bf16.mxu0 %v3480_v57  ;;  %1032 = vmatprep.subr.bf16.mxu1 %v3483_v58  ;;  %vm147_vm9 = vcmp.eq.s32.totalorder %v3976_v46, %v139_v13  ;;  %vm146_vm10 = vcmp.eq.s32.totalorder %v3976_v46, %v136_v14  ;;  %v3570_v13 = vld [vmem:[#allocation3 + $0x134] ss:$24 sps:$4 sm:$0xff]   ;;  %v3568_v14 = vld [vmem:[#allocation3 + $0x130] ss:$24 sps:$4 sm:$0xff]  }
  0xc6   :  { %vm4022_vm11 = vmpackc.low %vm147_vm9, %vm146_vm10 }
  0xc7   :  { %3214 = vmatmul.mubr.msk.bf16.gmra.mrb[4].mxu0 %vm3994_vm5, %v3869_v54  ;;  %3222 = vmatmul.mubr.msk.bf16.gmra.mrb[4].mxu1 %vm3994_vm5, %v3869_v54 }
  0xc8   :  { %647 = vmatpush1.bf16.msra.mxu0 %v3478_v60  ;;  %1033 = vmatpush1.bf16.msra.mxu1 %v3481_v61  ;;  %v3543_v60 = vld [vmem:[#allocation3 + $0x124] ss:$24 sps:$4 sm:$0xff]   ;;  %v3541_v61 = vld [vmem:[#allocation3 + $0x120] ss:$24 sps:$4 sm:$0xff]  }
  0xc9   :  { %648 = vmatprep.subr.bf16.mxu0 %v3486_v62  ;;  %1034 = vmatprep.subr.bf16.mxu1 %v3489_v63  ;;  %v77_v24 = vpop.permute.xlu1 %76  ;;  %v74_v25 = vpop.permute.xlu0 %73  ;;  %v3549_v62 = vld [vmem:[#allocation3 + $0x154] ss:$24 sps:$4 sm:$0xff]  }
  0xca   :  { %548 = vmatprep.mubr.bf16.mxu0 %v4728_v1  ;;  %621 = vmatprep.mubr.bf16.mxu1 %v4728_v1  ;;  %vm97_vm12 = vcmp.eq.s32.totalorder %v3976_v46, %v77_v24  ;;  %vm96_vm13 = vcmp.eq.s32.totalorder %v3976_v46, %v74_v25 }
  0xcb   :  { %vm4038_vm14 = vmpackc.low %vm97_vm12, %vm96_vm13 }
  0xcc   :  { %649 = vmatpush1.bf16.msra.mxu0 %v3484_v4  ;;  %1035 = vmatpush1.bf16.msra.mxu1 %v3487_v5  ;;  %v3553_v4 = vld [vmem:[#allocation3 + $0x40] ss:$24 sps:$4 sm:$0xff]   ;;  %v3558_v5 = vld [vmem:[#allocation3 + $0x74] ss:$24 sps:$4 sm:$0xff]  }
  0xcd   :  { %650 = vmatprep.subr.bf16.mxu0 %v3492_v6  ;;  %1036 = vmatprep.subr.bf16.mxu1 %v3495_v7  ;;  %v80_v39 = vpop.permute.xlu1 %79  ;;  %v83_v40 = vpop.permute.xlu0 %82  ;;  %v3556_v6 = vld [vmem:[#allocation3 + $0x70] ss:$24 sps:$4 sm:$0xff]   ;;  %v3561_v7 = vld [vmem:[#allocation3 + $0xa4] ss:$24 sps:$4 sm:$0xff]  }
  0xce   :  { %vm98_vm15 = vcmp.eq.s32.totalorder %v3976_v46, %v80_v39  ;;  %vm99_vm0 = vcmp.eq.s32.totalorder %v3976_v46, %v83_v40 }
  0xcf   :  { %3216 = vmatmul.mubr.msk.bf16.gmra.mrb[8].mxu0 %vm4008_vm8, %v3869_v54  ;;  %3224 = vmatmul.mubr.msk.bf16.gmra.mrb[8].mxu1 %vm4008_vm8, %v3869_v54  ;;  %vm4065_vm1 = vmpackc.low %vm99_vm0, %vm98_vm15 }
  0xd0   :  { %651 = vmatpush1.bf16.msra.mxu0 %v3490_v8  ;;  %1037 = vmatpush1.bf16.msra.mxu1 %v3493_v9  ;;  %v3559_v8 = vld [vmem:[#allocation3 + $0xa0] ss:$24 sps:$4 sm:$0xff]   ;;  %v3564_v9 = vld [vmem:[#allocation3 + $0xd4] ss:$24 sps:$4 sm:$0xff]  }
  0xd1   :  { %652 = vmatprep.subr.bf16.mxu0 %v3498_v10  ;;  %1038 = vmatprep.subr.bf16.mxu1 %v3501_v11  ;;  %v86_v50 = vpop.permute.xlu1 %85  ;;  %v89_v51 = vpop.permute.xlu0 %88  ;;  %v3562_v10 = vld [vmem:[#allocation3 + $0xd0] ss:$24 sps:$4 sm:$0xff]   ;;  %v3567_v11 = vld [vmem:[#allocation3 + $0x104] ss:$24 sps:$4 sm:$0xff]  }
  0xd2   :  { %558 = vmatprep.mubr.bf16.mxu0 %v4728_v1  ;;  %631 = vmatprep.mubr.bf16.mxu1 %v4728_v1  ;;  %vm101_vm3 = vcmp.eq.s32.totalorder %v3976_v46, %v89_v51 }
  0xd4   :  { %653 = vmatpush1.bf16.msra.mxu0 %v3496_v15  ;;  %1039 = vmatpush1.bf16.msra.mxu1 %v3499_v16  ;;  %v3573_v15 = vld [vmem:[#allocation3 + $0x164] ss:$24 sps:$4 sm:$0xff]   ;;  %v3571_v16 = vld [vmem:[#allocation3 + $0x160] ss:$24 sps:$4 sm:$0xff]  }
  0xd5   :  { %654 = vmatprep.subr.bf16.mxu0 %v3504_v17  ;;  %1040 = vmatprep.subr.bf16.mxu1 %v3507_v18  ;;  %v92_v57 = vpop.permute.xlu1 %91  ;;  %v95_v58 = vpop.permute.xlu0 %94  ;;  %v4167_v17 = vshrl.u32 %v62_v44, 7 }
  0xd6   :  { %vm103_vm6 = vcmp.eq.s32.totalorder %v3976_v46, %v95_v58 }
  0xd7   :  { %3218 = vmatmul.mubr.msk.bf16.gmra.mrb[12].mxu0 %vm4022_vm11, %v3869_v54  ;;  %3226 = vmatmul.mubr.msk.bf16.gmra.mrb[12].mxu1 %vm4022_vm11, %v3869_v54  ;;  %v1186_v18 = vsub.s32 2, %v4167_v17 }
  0xd8   :  { %655 = vmatpush1.bf16.msra.mxu0 %v3502_v19  ;;  %1041 = vmatpush1.bf16.msra.mxu1 %v3505_v20  ;;  %v4173_v19 = vld [vmem:[%s4726_s4] sm:$0x3f]  ;;  %v1190_v20 = vsub.s32 3, %v4167_v17  ;;  %s3870_s4 = smov 64  }
  0xd9   :  { %656 = vmatprep.subr.bf16.mxu0 %v3510_v21  ;;  %1042 = vmatprep.subr.bf16.mxu1 %v3513_v22  ;;  %v4179_v22 = vrot.slane %v4173_v19, %v1186_v18 }
  0xda   :  { %674 = vmatprep.mubr.bf16.mxu0 %v4728_v1  ;;  %1060 = vmatprep.mubr.bf16.mxu1 %v4728_v1  ;;  %v4184_v23 = vrot.slane %v4173_v19, %v1190_v20 }
  0xdc   :  { %657 = vmatpush1.bf16.msra.mxu0 %v3508_v26  ;;  %1043 = vmatpush1.bf16.msra.mxu1 %v3511_v27 }
  0xdd   :  { %955 = vmatprep.subr.bf16.mxu0 %v3516_v28  ;;  %1356 = vmatprep.subr.bf16.mxu1 %v4034_v29 }
  0xdf   :  { %3228 = vmatmul.mubr.msk.bf16.vlgmr.msra.gmra.mrb[16].mxu0 %vm3980_vm2, %v3869_v54  ;;  %3292 = vmatmul.mubr.msk.bf16.vlgmr.msra.gmra.mrb[0].mxu1 %vm4038_vm14, %v3869_v54  ;;  %vm100_vm2 = vcmp.eq.s32.totalorder %v3976_v46, %v86_v50 }
  0xe0   :  { %956 = vmatpush1.bf16.msra.mxu0 %v3514_v31  ;;  %1357 = vmatpush1.bf16.msra.mxu1 %v4042_v32  ;;  %vm4087_vm4 = vmpackc.low %vm101_vm3, %vm100_vm2 }
  0xe1   :  { %957 = vmatprep.subr.bf16.mxu0 %v3522_v33  ;;  %684 = vmatprep.mubr.bf16.mxu0 %v4728_v1 }
  0xe2   :  { %1070 = vmatprep.mubr.bf16.mxu1 %v4728_v1  ;;  %1358 = vmatprep.subr.bf16.mxu1 %v4045_v34 }
  0xe4   :  { %958 = vmatpush1.bf16.msra.mxu0 %v3520_v35  ;;  %1359 = vmatpush1.bf16.msra.mxu1 %v4054_v36 }
  0xe5   :  { %959 = vmatprep.subr.bf16.mxu0 %v3525_v37  ;;  %1360 = vmatprep.subr.bf16.mxu1 %v4057_v38 }
  0xe7   :  { %3230 = vmatmul.mubr.msk.bf16.gmra.mrb[20].mxu0 %vm3994_vm5, %v3869_v54  ;;  %3294 = vmatmul.mubr.msk.bf16.gmra.mrb[4].mxu1 %vm4065_vm1, %v3869_v54  ;;  %vm102_vm5 = vcmp.eq.s32.totalorder %v3976_v46, %v92_v57  ;;  %v3552_v46 = vld [vmem:[#allocation3 + $0x14] ss:$24 sps:$4 sm:$0xff]   ;;  %v1178_v57 = vsub.s32 0, %v4167_v17 }
  0xe8   :  { %960 = vmatpush1.bf16.msra.mxu0 %v3523_v41  ;;  %694 = vmatprep.mubr.bf16.mxu0 %v4728_v1  ;;  %vm4103_vm7 = vmpackc.low %vm103_vm6, %vm102_vm5 }
  0xe9   :  { %961 = vmatprep.subr.bf16.mxu0 %v3531_v42  ;;  %1080 = vmatprep.mubr.bf16.mxu1 %v4728_v1 }
  0xea   :  { %1361 = vmatpush1.bf16.msra.mxu1 %v4069_v45 }
  0xeb   :  { %1362 = vmatprep.subr.bf16.mxu1 %v4077_v47 }
  0xec   :  { %962 = vmatpush1.bf16.msra.mxu0 %v3529_v48 }
  0xed   :  { %963 = vmatprep.subr.bf16.mxu0 %v3534_v49 }
  0xee   :  { %1363 = vmatpush1.bf16.msra.mxu1 %v4082_v52 }
  0xef   :  { %3232 = vmatmul.mubr.msk.bf16.gmra.mrb[24].mxu0 %vm4008_vm8, %v3869_v54  ;;  %3296 = vmatmul.mubr.msk.bf16.gmra.mrb[8].mxu1 %vm4087_vm4, %v3869_v54  ;;  %vm1352_vm8 = vcmask 523264  }
  0xf0   :  { %964 = vmatpush1.bf16.msra.mxu0 %v3532_v53  ;;  %704 = vmatprep.mubr.bf16.mxu0 %v4728_v1 }
  0xf1   :  { %965 = vmatprep.subr.bf16.mxu0 %v3540_v55  ;;  %1090 = vmatprep.mubr.bf16.mxu1 %v4728_v1 }
  0xf2   :  { %1426 = vmatprep.subr.bf16.mxu1 %v4034_v29 }
  0xf4   :  { %966 = vmatpush1.bf16.msra.mxu0 %v3538_v59 }
  0xf5   :  { %967 = vmatprep.subr.bf16.mxu0 %v3543_v60  ;;  %v1182_v60 = vsub.s32 1, %v4167_v17 }
  0xf7   :  { %3234 = vmatmul.mubr.msk.bf16.gmra.mrb[28].mxu0 %vm4022_vm11, %v3869_v54  ;;  %3298 = vmatmul.mubr.msk.bf16.gmra.mrb[12].mxu1 %vm4103_vm7, %v3869_v54 }
  0xf8   :  { %968 = vmatpush1.bf16.msra.mxu0 %v3541_v61  ;;  %987 = vmatprep.mubr.bf16.mxu0 %v4728_v1 }
  0xf9   :  { %969 = vmatprep.subr.bf16.mxu0 %v3549_v62  ;;  %1388 = vmatprep.mubr.bf16.mxu1 %v4728_v1 }
  0xfc   :  { %970 = vmatpush1.bf16.msra.mxu0 %v3547_v0  ;;  %v1179_v0 = vrot.slane %v4173_v19, %v1178_v57 }
  0xfd   :  { %1101 = vmatprep.subr.bf16.mxu0 %v3552_v46  ;;  %v1183_v46 = vrot.slane %v4173_v19, %v1182_v60 }
  0xff   :  { %3284 = vmatmul.mubr.msk.bf16.vlgmr.msra.gmra.mrb[0].mxu0 %vm4038_vm14, %v3869_v54  ;;  %1389 = vmatmul.mubr.bf16.vlgmr.msra.gmra.mrb[16].mxu1 %v4728_v1 }
 0x100   :  { %1102 = vmatpush1.bf16.msra.mxu0 %v3550_v2  ;;  %997 = vmatprep.mubr.bf16.mxu0 %v4728_v1 }
 0x101   :  { %1103 = vmatprep.subr.bf16.mxu0 %v3555_v3  ;;  %1427 = vmatpush1.bf16.msra.mxu1 %v4042_v32 }
 0x102   :  { %1428 = vmatprep.subr.bf16.mxu1 %v4045_v34  ;;  %1458 = vmatprep.mubr.bf16.mxu1 %v4728_v1 }
 0x104   :  { %1104 = vmatpush1.bf16.msra.mxu0 %v3553_v4 }
 0x105   :  { %1105 = vmatprep.subr.bf16.mxu0 %v3558_v5  ;;  %1429 = vmatpush1.bf16.msra.mxu1 %v4054_v36 }
 0x106   :  { %1430 = vmatprep.subr.bf16.mxu1 %v4057_v38 }
 0x107   :  { %3286 = vmatmul.mubr.msk.bf16.gmra.mrb[4].mxu0 %vm4065_vm1, %v3869_v54 }
 0x108   :  { %1106 = vmatpush1.bf16.msra.mxu0 %v3556_v6  ;;  %1007 = vmatprep.mubr.bf16.mxu0 %v4728_v1 }
 0x109   :  { %1107 = vmatprep.subr.bf16.mxu0 %v3561_v7  ;;  %1431 = vmatpush1.bf16.msra.mxu1 %v4069_v45 }
 0x10a   :  { %1432 = vmatprep.subr.bf16.mxu1 %v4077_v47 }
 0x10c   :  { %1108 = vmatpush1.bf16.msra.mxu0 %v3559_v8 }
 0x10d   :  { %1109 = vmatprep.subr.bf16.mxu0 %v3564_v9  ;;  %1433 = vmatpush1.bf16.msra.mxu1 %v4082_v52 }
 0x10e   :  { %1497 = vmatprep.subr.bf16.mxu1 %v4034_v29 }
 0x10f   :  { %3288 = vmatmul.mubr.msk.bf16.gmra.mrb[8].mxu0 %vm4087_vm4, %v3869_v54 }
 0x110   :  { %1110 = vmatpush1.bf16.msra.mxu0 %v3562_v10  ;;  %1017 = vmatprep.mubr.bf16.mxu0 %v4728_v1 }
 0x111   :  { %1111 = vmatprep.subr.bf16.mxu0 %v3567_v11 }
 0x114   :  { %1112 = vmatpush1.bf16.msra.mxu0 %v3565_v12 }
 0x115   :  { %1113 = vmatprep.subr.bf16.mxu0 %v3570_v13 }
 0x117   :  { %3290 = vmatmul.mubr.msk.bf16.gmra.mrb[12].mxu0 %vm4103_vm7, %v3869_v54 }
 0x118   :  { %1114 = vmatpush1.bf16.msra.mxu0 %v3568_v14  ;;  %1133 = vmatprep.mubr.bf16.mxu0 %v4728_v1 }
 0x119   :  { %1115 = vmatprep.subr.bf16.mxu0 %v3573_v15 }
 0x11c   :  { %1116 = vmatpush1.bf16.msra.mxu0 %v3571_v16 }
 0x11d   :  { %1639 = vmatprep.subr.bf16.mxu0 %v4034_v29 }
 0x11f   :  { %3300 = vmatmul.mubr.msk.bf16.vlgmr.msra.gmra.mrb[16].mxu0 %vm4038_vm14, %v3869_v54 }
 0x120   :  { %1143 = vmatprep.mubr.bf16.mxu0 %v4728_v1  ;;  %1640 = vmatpush1.bf16.msra.mxu0 %v4042_v32 }
 0x121   :  { %1641 = vmatprep.subr.bf16.mxu0 %v4045_v34 }
 0x124   :  { %1642 = vmatpush1.bf16.msra.mxu0 %v4054_v36 }
 0x125   :  { %1643 = vmatprep.subr.bf16.mxu0 %v4057_v38 }
 0x127   :  { %3302 = vmatmul.mubr.msk.bf16.gmra.mrb[20].mxu0 %vm4065_vm1, %v3869_v54 }
 0x128   :  { %1153 = vmatprep.mubr.bf16.mxu0 %v4728_v1  ;;  %1644 = vmatpush1.bf16.msra.mxu0 %v4069_v45 }
 0x129   :  { %1645 = vmatprep.subr.bf16.mxu0 %v4077_v47 }
 0x12c   :  { %1646 = vmatpush1.bf16.msra.mxu0 %v4082_v52 }
 0x12d   :  { %1781 = vmatprep.subr.bf16.mxu0 %v4034_v29 }
 0x12f   :  { %3304 = vmatmul.mubr.msk.bf16.gmra.mrb[24].mxu0 %vm4087_vm4, %v3869_v54 }
 0x130   :  { %1163 = vmatprep.mubr.bf16.mxu0 %v4728_v1 }
 0x137   :  { %3306 = vmatmul.mubr.msk.bf16.gmra.mrb[28].mxu0 %vm4103_vm7, %v3869_v54 }
 0x138   :  { %1671 = vmatprep.mubr.bf16.mxu0 %v4728_v1 }
 0x1b2   :  { %v4176_v21 = vpop.f32.mrb[0].mxu1 }
 0x1b3   :  { %v4181_v54 = vpop.f32.mrb[1].mxu1 }
 0x1b4   :  { %v1066_v44 = vpop.f32.mrb[2].mxu1 }
 0x1b5   :  { %v4187_v24 = vadd.f32 %v4179_v22, %v1066_v44  ;;  %v1068_v25 = vpop.f32.mrb[3].mxu1 }
 0x1b6   :  { %v4190_v26 = vadd.f32 %v4184_v23, %v1068_v25 }
 0x1ba   :  { %v1072_v27 = vpop.f32.mrb[4].mxu1 }
 0x1bb   :  { %v4193_v28 = vadd.f32 %v4179_v22, %v1072_v27  ;;  %v1074_v30 = vpop.f32.mrb[5].mxu1 }
 0x1bc   :  { %v4196_v31 = vadd.f32 %v4184_v23, %v1074_v30  ;;  %v1076_v33 = vpop.f32.mrb[6].mxu1 }
 0x1bd   :  { %v4199_v35 = vadd.f32 %v4179_v22, %v1076_v33  ;;  %v1078_v37 = vpop.f32.mrb[7].mxu1 }
 0x1be   :  { %v4202_v39 = vadd.f32 %v4184_v23, %v1078_v37 }
 0x1c2   :  { %v1082_v40 = vpop.f32.mrb[8].mxu1 }
 0x1c3   :  { %v4205_v41 = vadd.f32 %v4179_v22, %v1082_v40  ;;  %v1084_v42 = vpop.f32.mrb[9].mxu1 }
 0x1c4   :  { %v4208_v43 = vadd.f32 %v4184_v23, %v1084_v42  ;;  %v1086_v48 = vpop.f32.mrb[10].mxu1 }
 0x1c5   :  { %v4211_v49 = vadd.f32 %v4179_v22, %v1086_v48  ;;  %v1088_v50 = vpop.f32.mrb[11].mxu1 }
 0x1c6   :  { %v4214_v51 = vadd.f32 %v4184_v23, %v1088_v50 }
 0x1ca   :  { %v1092_v53 = vpop.f32.mrb[12].mxu1 }
 0x1cb   :  { %v4217_v55 = vadd.f32 %v4179_v22, %v1092_v53  ;;  %v1094_v56 = vpop.f32.mrb[13].mxu1 }
 0x1cc   :  { %v4221_v58 = vadd.f32 %v4184_v23, %v1094_v56  ;;  %v1096_v59 = vpop.f32.mrb[14].mxu1 }
 0x1cd   :  { %v4225_v61 = vadd.f32 %v4179_v22, %v1096_v59  ;;  %v1098_v62 = vpop.f32.mrb[15].mxu1 }
 0x1ce   :  { %v4228_v63 = vadd.f32 %v4184_v23, %v1098_v62 }
 0x1d2   :  { %v989_v2 = vpop.f32.mrb[0].mxu0  ;;  %v1390_v3 = vpop.f32.mrb[16].mxu1 }
 0x1d3   :  { %v1206_v4 = vadd.f32 %v1179_v0, %v989_v2  ;;  %v991_v5 = vpop.f32.mrb[1].mxu0  ;;  %v1392_v6 = vpop.f32.mrb[17].mxu1 }
 0x1d4   :  { %v1207_v7 = vadd.f32 %v1183_v46, %v991_v5  ;;  %v993_v8 = vpop.f32.mrb[2].mxu0  ;;  %v1394_v9 = vpop.f32.mrb[18].mxu1 }
 0x1d5   :  { %v1397_v10 = vadd.f32 %v1390_v3, %v1206_v4  ;;  %v4232_v11 = vadd.f32 %v1179_v0, %v993_v8  ;;  %v995_v12 = vpop.f32.mrb[3].mxu0  ;;  %v1395_v13 = vpop.f32.mrb[19].mxu1 }
 0x1d6   :  { %v4234_v14 = vadd.f32 %v1392_v6, %v1207_v7  ;;  %v4236_v15 = vadd.f32 %v1183_v46, %v995_v12 }
 0x1d7   :  { %v1399_v16 = vmul.f32 0.5, %v1397_v10 }
 0x1d9   :  { %3598 = vtanh.f32 %v1399_v16  ;;  %v1194_v16 = vsub.s32 4, %v4167_v17 }
 0x1da   :  { %v999_v18 = vpop.f32.mrb[4].mxu0  ;;  %3600 = vtanh.f32 %v4234_v14 }
 0x1db   :  { %v4238_v20 = vadd.f32 %v1179_v0, %v999_v18  ;;  %v1001_v44 = vpop.f32.mrb[5].mxu0  ;;  %v1198_v18 = vsub.s32 5, %v4167_v17 }
 0x1dc   :  { %v4240_v25 = vadd.f32 %v1183_v46, %v1001_v44  ;;  %v1003_v27 = vpop.f32.mrb[6].mxu0 }
 0x1dd   :  { %v4243_v30 = vadd.f32 %v1179_v0, %v1003_v27  ;;  %v1005_v33 = vpop.f32.mrb[7].mxu0  ;;  %v4269_v27 = vrot.slane %v4173_v19, %v1194_v16 }
 0x1de   :  { %v4245_v37 = vadd.f32 %v1183_v46, %v1005_v33 }
 0x1e2   :  { %v1009_v40 = vpop.f32.mrb[8].mxu0 }
 0x1e3   :  { %v3599_v42 = vpop.eup %3598  ;;  %v4247_v48 = vadd.f32 %v1179_v0, %v1009_v40  ;;  %v1011_v50 = vpop.f32.mrb[9].mxu0  ;;  %v4274_v40 = vrot.slane %v4173_v19, %v1198_v18 }
 0x1e4   :  { %v1403_v53 = vmul.f32 0.5, %v3599_v42  ;;  %v4249_v56 = vadd.f32 %v1183_v46, %v1011_v50  ;;  %v1013_v57 = vpop.f32.mrb[10].mxu0  ;;  %v3601_v3 = vpop.eup %3600 }
 0x1e5   :  { %v4251_v59 = vadd.f32 %v1179_v0, %v1013_v57  ;;  %v1015_v60 = vpop.f32.mrb[11].mxu0 }
 0x1e6   :  { %v1405_v62 = vadd.f32 0.5, %v1403_v53  ;;  %v4253_v2 = vadd.f32 %v1183_v46, %v1015_v60 }
 0x1e8   :  { %v1409_v4 = vmul.f32 %v3601_v3, %v1405_v62 }
 0x1ea   :  { %1411 = vrot.lane.b32.xlu1 %v1409_v4, %s3870_s4  ;;  %v1019_v5 = vpop.f32.mrb[12].mxu0 }
 0x1eb   :  { %v4256_v6 = vadd.f32 %v1179_v0, %v1019_v5  ;;  %v1021_v7 = vpop.f32.mrb[13].mxu0 }
 0x1ec   :  { %v4258_v8 = vadd.f32 %v1183_v46, %v1021_v7  ;;  %v1023_v9 = vpop.f32.mrb[14].mxu0 }
 0x1ed   :  { %v4260_v10 = vadd.f32 %v1179_v0, %v1023_v9  ;;  %v1025_v12 = vpop.f32.mrb[15].mxu0 }
 0x1ee   :  { %v4262_v13 = vadd.f32 %v1183_v46, %v1025_v12 }
 0x1f2   :  { %v4266_v44 = vpop.f32.mrb[16].mxu0 }
 0x1f3   :  { %v4271_v33 = vpop.f32.mrb[17].mxu0 }
 0x1f4   :  { %v1139_v42 = vpop.f32.mrb[18].mxu0 }
 0x1f5   :  { %v4277_v0 = vadd.f32 %v4269_v27, %v1139_v42  ;;  %v1141_v46 = vpop.f32.mrb[19].mxu0 }
 0x1f6   :  { %v4280_v50 = vadd.f32 %v4274_v40, %v1141_v46 }
 0x1fa   :  { %v1145_v53 = vpop.f32.mrb[20].mxu0 }
 0x1fb   :  { %v4283_v17 = vadd.f32 %v4269_v27, %v1145_v53  ;;  %v1147_v57 = vpop.f32.mrb[21].mxu0 }
 0x1fc   :  { %v4286_v60 = vadd.f32 %v4274_v40, %v1147_v57  ;;  %v1149_v3 = vpop.f32.mrb[22].mxu0 }
 0x1fd   :  { %4746 = vst [vmem:[#allocation10_spill] sm:$0xff] %v4283_v17  ;;  %v4289_v19 = vadd.f32 %v4269_v27, %v1149_v3  ;;  %v1151_v4 = vpop.f32.mrb[23].mxu0 }
 0x1fe   :  { %4747 = vst [vmem:[#allocation11_spill] sm:$0xff] %v4286_v60  ;;  %v4292_v5 = vadd.f32 %v4274_v40, %v1151_v4 }
 0x1ff   :  { %4748 = vst [vmem:[#allocation12_spill] sm:$0xff] %v4289_v19 }
 0x200   :  { %4749 = vst [vmem:[#allocation13_spill] sm:$0xff] %v4292_v5 }
 0x202   :  { %v1155_v7 = vpop.f32.mrb[24].mxu0 }
 0x203   :  { %v4295_v9 = vadd.f32 %v4269_v27, %v1155_v7  ;;  %v1157_v12 = vpop.f32.mrb[25].mxu0 }
 0x204   :  { %v4298_v16 = vadd.f32 %v4274_v40, %v1157_v12  ;;  %v1159_v18 = vpop.f32.mrb[26].mxu0 }
 0x205   :  { %4750 = vst [vmem:[#allocation14_spill] sm:$0xff] %v4295_v9  ;;  %v4301_v42 = vadd.f32 %v4269_v27, %v1159_v18  ;;  %v1161_v46 = vpop.f32.mrb[27].mxu0 }
 0x206   :  { %4751 = vst [vmem:[#allocation15_spill] sm:$0xff] %v4298_v16  ;;  %v4304_v53 = vadd.f32 %v4274_v40, %v1161_v46  ;;  %v1408_v46 = vmul.f32 0.0, %v1405_v62 }
 0x207   :  { %4752 = vst [vmem:[#allocation16_spill] sm:$0xff] %v4301_v42  ;;  %v1400_v42 = vmul.f32 0.5, %v4234_v14  ;;  %v4758_v14 = vmov 0  }
 0x208   :  { %4753 = vst [vmem:[#allocation17_spill] sm:$0xff] %v4304_v53 }
 0x209   :  { %3602 = vtanh.f32 %v1400_v42 }
 0x20a   :  { %v1165_v57 = vpop.f32.mrb[28].mxu0 }
 0x20b   :  { %v4307_v3 = vadd.f32 %v4269_v27, %v1165_v57  ;;  %v1167_v4 = vpop.f32.mrb[29].mxu0 }
 0x20c   :  { %v4310_v7 = vadd.f32 %v4274_v40, %v1167_v4  ;;  %v1169_v1 = vpop.f32.mrb[30].mxu0 }
 0x20d   :  { %4754 = vst [vmem:[#allocation18_spill] sm:$0xff] %v4307_v3  ;;  %v4313_v12 = vadd.f32 %v4269_v27, %v1169_v1  ;;  %v1171_v16 = vpop.f32.mrb[31].mxu0 }
 0x20e   :  { %4755 = vst [vmem:[#allocation19_spill] sm:$0xff] %v4310_v7  ;;  %v4316_v18 = vadd.f32 %v4274_v40, %v1171_v16 }
 0x20f   :  { %4756 = vst [vmem:[#allocation20_spill] sm:$0xff] %v4313_v12 }
 0x210   :  { %4757 = vst [vmem:[#allocation21_spill] sm:$0xff] %v4316_v18 }
 0x213   :  { %v3603_v57 = vpop.eup %3602 }
 0x214   :  { %v1404_v3 = vmul.f32 0.5, %v3603_v57 }
 0x216   :  { %v1406_v5 = vadd.f32 0.5, %v1404_v3 }
 0x25c   :  { %v1412_v53 = vpop.permute.xlu1 %1411 }
 0x25d   :  { %v1414_v9 = vadd.f32 %v1412_v53, %v1408_v46 }
 0x25f   :  { %3604 = vtanh.f32 %v1414_v9 }
 0x269   :  { %v3605_v4 = vpop.eup %3604 }
 0x26a   :  { %v4319_v7 = vmul.f32 %v3605_v4, %v1406_v5 }
 0x26c   :  { %v1419_v1 = vpack.c.bf16 %v4319_v7, %v4319_v7 }
 0x26e   :  { %1421 = vrot.lane.b32.xlu0 %v1419_v1, %s3870_s4 }
 0x2e0   :  { %v1422_v16 = vpop.permute.xlu0 %1421 }
 0x2e1   :  { %3315 = vmatmul.mubr.msk.bf16.vlgmr.msra.gmra.mrb[20].mxu1 %vm1352_vm8, %v1422_v16 }
 0x2e2   :  { %1498 = vmatpush1.bf16.msra.mxu1 %v4042_v32  ;;  %1529 = vmatprep.mubr.bf16.mxu1 %v4758_v14 }
 0x2e3   :  { %1499 = vmatprep.subr.bf16.mxu1 %v4045_v34 }
 0x2e6   :  { %1500 = vmatpush1.bf16.msra.mxu1 %v4054_v36 }
 0x2e7   :  { %1501 = vmatprep.subr.bf16.mxu1 %v4057_v38 }
 0x2ea   :  { %1502 = vmatpush1.bf16.msra.mxu1 %v4069_v45 }
 0x2eb   :  { %1503 = vmatprep.subr.bf16.mxu1 %v4077_v47 }
 0x2ee   :  { %1504 = vmatpush1.bf16.msra.mxu1 %v4082_v52 }
 0x2ef   :  { %1568 = vmatprep.subr.bf16.mxu1 %v4034_v29 }
 0x3b4   :  { %v1460_v62 = vpop.f32.mrb[20].mxu1 }
 0x3b5   :  { %v1467_v5 = vadd.f32 %v1460_v62, %v4232_v11  ;;  %v1462_v42 = vpop.f32.mrb[21].mxu1 }
 0x3b6   :  { %v1468_v53 = vadd.f32 %v1462_v42, %v4236_v15  ;;  %v1464_v3 = vpop.f32.mrb[22].mxu1 }
 0x3b7   :  { %v1469_v46 = vmul.f32 0.5, %v1467_v5  ;;  %v1465_v57 = vpop.f32.mrb[23].mxu1 }
 0x3b8   :  { %v1470_v19 = vmul.f32 0.5, %v1468_v53 }
 0x3b9   :  { %3606 = vtanh.f32 %v1469_v46 }
 0x3ba   :  { %3608 = vtanh.f32 %v1468_v53 }
 0x3bb   :  { %3610 = vtanh.f32 %v1470_v19 }
 0x3c3   :  { %v3607_v4 = vpop.eup %3606 }
 0x3c4   :  { %v1473_v1 = vmul.f32 0.5, %v3607_v4  ;;  %v3609_v18 = vpop.eup %3608 }
 0x3c5   :  { %v3611_v62 = vpop.eup %3610 }
 0x3c6   :  { %v1475_v16 = vadd.f32 0.5, %v1473_v1  ;;  %v1474_v15 = vmul.f32 0.5, %v3611_v62 }
 0x3c8   :  { %v1479_v12 = vmul.f32 %v3609_v18, %v1475_v16  ;;  %v1478_v60 = vmul.f32 %v1475_v16, %v1414_v9  ;;  %v1476_v42 = vadd.f32 0.5, %v1474_v15 }
 0x3ca   :  { %1481 = vrot.lane.b32.xlu1 %v1479_v12, %s3870_s4 }
 0x43c   :  { %v1482_v17 = vpop.permute.xlu1 %1481 }
 0x43d   :  { %v1484_v11 = vadd.f32 %v1482_v17, %v1478_v60 }
 0x43f   :  { %3612 = vtanh.f32 %v1484_v11 }
 0x449   :  { %v3613_v5 = vpop.eup %3612 }
 0x44a   :  { %v1486_v3 = vmul.f32 %v3613_v5, %v1476_v42 }
 0x44c   :  { %v1490_v46 = vpack.c.bf16 %v1486_v3, %v1486_v3 }
 0x44e   :  { %1492 = vrot.lane.b32.xlu0 %v1490_v46, %s3870_s4 }
 0x4c0   :  { %v1493_v57 = vpop.permute.xlu0 %1492 }
 0x4c1   :  { %3316 = vmatmul.mubr.msk.bf16.vlgmr.msra.gmra.mrb[24].mxu1 %vm1352_vm8, %v1493_v57 }
 0x4c2   :  { %1569 = vmatpush1.bf16.msra.mxu1 %v4042_v32  ;;  %1600 = vmatprep.mubr.bf16.mxu1 %v4758_v14 }
 0x4c3   :  { %1570 = vmatprep.subr.bf16.mxu1 %v4045_v34 }
 0x4c6   :  { %1571 = vmatpush1.bf16.msra.mxu1 %v4054_v36 }
 0x4c7   :  { %1572 = vmatprep.subr.bf16.mxu1 %v4057_v38 }
 0x4ca   :  { %1573 = vmatpush1.bf16.msra.mxu1 %v4069_v45 }
 0x4cb   :  { %1574 = vmatprep.subr.bf16.mxu1 %v4077_v47 }
 0x4ce   :  { %1575 = vmatpush1.bf16.msra.mxu1 %v4082_v52 }
 0x4cf   :  { %1710 = vmatprep.subr.bf16.mxu1 %v4034_v29 }
 0x594   :  { %v1531_v17 = vpop.f32.mrb[24].mxu1 }
 0x595   :  { %v1538_v60 = vadd.f32 %v1531_v17, %v4238_v20  ;;  %v1533_v19 = vpop.f32.mrb[25].mxu1 }
 0x596   :  { %v1539_v9 = vadd.f32 %v1533_v19, %v4240_v25  ;;  %v1535_v12 = vpop.f32.mrb[26].mxu1  ;;  %v1487_v19 = vmax.f32 %v4319_v7, %v1486_v3 }
 0x597   :  { %v1540_v18 = vmul.f32 0.5, %v1538_v60  ;;  %v1536_v53 = vpop.f32.mrb[27].mxu1 }
 0x598   :  { %v1541_v42 = vmul.f32 0.5, %v1539_v9 }
 0x599   :  { %3614 = vtanh.f32 %v1540_v18 }
 0x59a   :  { %3616 = vtanh.f32 %v1539_v9 }
 0x59b   :  { %3618 = vtanh.f32 %v1541_v42 }
 0x5a3   :  { %v3615_v4 = vpop.eup %3614 }
 0x5a4   :  { %v1544_v1 = vmul.f32 0.5, %v3615_v4  ;;  %v3617_v62 = vpop.eup %3616 }
 0x5a5   :  { %v3619_v57 = vpop.eup %3618 }
 0x5a6   :  { %v1546_v16 = vadd.f32 0.5, %v1544_v1  ;;  %v1545_v25 = vmul.f32 0.5, %v3619_v57 }
 0x5a8   :  { %v1550_v15 = vmul.f32 %v3617_v62, %v1546_v16  ;;  %v1549_v5 = vmul.f32 %v1546_v16, %v1484_v11  ;;  %v1547_v17 = vadd.f32 0.5, %v1545_v25 }
 0x5aa   :  { %1552 = vrot.lane.b32.xlu1 %v1550_v15, %s3870_s4 }
 0x61c   :  { %v1553_v46 = vpop.permute.xlu1 %1552 }
 0x61d   :  { %v1555_v20 = vadd.f32 %v1553_v46, %v1549_v5 }
 0x61f   :  { %3620 = vtanh.f32 %v1555_v20 }
 0x629   :  { %v3621_v60 = vpop.eup %3620 }
 0x62a   :  { %v1557_v12 = vmul.f32 %v3621_v60, %v1547_v17 }
 0x62c   :  { %v1561_v18 = vpack.c.bf16 %v1557_v12, %v1557_v12  ;;  %v4352_v53 = vmax.f32 %v1487_v19, %v1557_v12 }
 0x62e   :  { %1563 = vrot.lane.b32.xlu0 %v1561_v18, %s3870_s4 }
 0x6a0   :  { %v1564_v4 = vpop.permute.xlu0 %1563 }
 0x6a1   :  { %3317 = vmatmul.mubr.msk.bf16.vlgmr.msra.gmra.mrb[28].mxu1 %vm1352_vm8, %v1564_v4 }
 0x6a2   :  { %1711 = vmatpush1.bf16.msra.mxu1 %v4042_v32  ;;  %1742 = vmatprep.mubr.bf16.mxu1 %v4758_v14 }
 0x6a3   :  { %1712 = vmatprep.subr.bf16.mxu1 %v4045_v34 }
 0x6a6   :  { %1713 = vmatpush1.bf16.msra.mxu1 %v4054_v36 }
 0x6a7   :  { %1714 = vmatprep.subr.bf16.mxu1 %v4057_v38 }
 0x6aa   :  { %1715 = vmatpush1.bf16.msra.mxu1 %v4069_v45 }
 0x6ab   :  { %1716 = vmatprep.subr.bf16.mxu1 %v4077_v47 }
 0x6ae   :  { %1717 = vmatpush1.bf16.msra.mxu1 %v4082_v52 }
 0x6af   :  { %1852 = vmatprep.subr.bf16.mxu1 %v4034_v29 }
 0x774   :  { %v1602_v7 = vpop.f32.mrb[28].mxu1 }
 0x775   :  { %v1609_v11 = vadd.f32 %v1602_v7, %v4243_v30  ;;  %v1604_v3 = vpop.f32.mrb[29].mxu1 }
 0x776   :  { %v1610_v9 = vadd.f32 %v1604_v3, %v4245_v37  ;;  %v1606_v1 = vpop.f32.mrb[30].mxu1 }
 0x777   :  { %v1611_v16 = vmul.f32 0.5, %v1609_v11  ;;  %v1607_v62 = vpop.f32.mrb[31].mxu1 }
 0x778   :  { %v1612_v25 = vmul.f32 0.5, %v1610_v9 }
 0x779   :  { %3622 = vtanh.f32 %v1611_v16 }
 0x77a   :  { %3624 = vtanh.f32 %v1610_v9 }
 0x77b   :  { %3626 = vtanh.f32 %v1612_v25 }
 0x783   :  { %v3623_v15 = vpop.eup %3622 }
 0x784   :  { %v1615_v42 = vmul.f32 0.5, %v3623_v15  ;;  %v3625_v46 = vpop.eup %3624 }
 0x785   :  { %v3627_v60 = vpop.eup %3626 }
 0x786   :  { %v1617_v5 = vadd.f32 0.5, %v1615_v42  ;;  %v1616_v37 = vmul.f32 0.5, %v3627_v60 }
 0x788   :  { %v1621_v57 = vmul.f32 %v3625_v46, %v1617_v5  ;;  %v1620_v29 = vmul.f32 %v1617_v5, %v1555_v20  ;;  %v1618_v19 = vadd.f32 0.5, %v1616_v37 }
 0x78a   :  { %1623 = vrot.lane.b32.xlu1 %v1621_v57, %s3870_s4 }
 0x7fc   :  { %v1624_v17 = vpop.permute.xlu1 %1623 }
 0x7fd   :  { %v1626_v30 = vadd.f32 %v1624_v17, %v1620_v29 }
 0x7ff   :  { %3628 = vtanh.f32 %v1626_v30 }
 0x809   :  { %v3629_v12 = vpop.eup %3628 }
 0x80a   :  { %v1628_v18 = vmul.f32 %v3629_v12, %v1618_v19 }
 0x80c   :  { %v1632_v4 = vpack.c.bf16 %v1628_v18, %v1628_v18  ;;  %v1629_v7 = vmax.f32 %v4352_v53, %v1628_v18 }
 0x80e   :  { %1634 = vrot.lane.b32.xlu0 %v1632_v4, %s3870_s4 }
 0x880   :  { %v1635_v11 = vpop.permute.xlu0 %1634 }
 0x881   :  { %3318 = vmatmul.mubr.msk.bf16.vlgmr.msra.gmra.mrb[32].mxu0 %vm1352_vm8, %v1635_v11 }
 0x882   :  { %1782 = vmatpush1.bf16.msra.mxu0 %v4042_v32  ;;  %1813 = vmatprep.mubr.bf16.mxu0 %v4758_v14 }
 0x883   :  { %1783 = vmatprep.subr.bf16.mxu0 %v4045_v34 }
 0x886   :  { %1784 = vmatpush1.bf16.msra.mxu0 %v4054_v36 }
 0x887   :  { %1785 = vmatprep.subr.bf16.mxu0 %v4057_v38 }
 0x88a   :  { %1786 = vmatpush1.bf16.msra.mxu0 %v4069_v45 }
 0x88b   :  { %1787 = vmatprep.subr.bf16.mxu0 %v4077_v47 }
 0x88e   :  { %1788 = vmatpush1.bf16.msra.mxu0 %v4082_v52 }
 0x954   :  { %v1673_v20 = vpop.f32.mrb[32].mxu0 }
 0x955   :  { %v1680_v53 = vadd.f32 %v1673_v20, %v4247_v48  ;;  %v1675_v3 = vpop.f32.mrb[33].mxu0 }
 0x956   :  { %v1681_v9 = vadd.f32 %v1675_v3, %v4249_v56  ;;  %v1677_v1 = vpop.f32.mrb[34].mxu0 }
 0x957   :  { %v1682_v16 = vmul.f32 0.5, %v1680_v53  ;;  %v1678_v62 = vpop.f32.mrb[35].mxu0 }
 0x958   :  { %v1683_v25 = vmul.f32 0.5, %v1681_v9 }
 0x959   :  { %3630 = vtanh.f32 %v1682_v16 }
 0x95a   :  { %3632 = vtanh.f32 %v1681_v9 }
 0x95b   :  { %3634 = vtanh.f32 %v1683_v25 }
 0x963   :  { %v3631_v15 = vpop.eup %3630 }
 0x964   :  { %v1686_v42 = vmul.f32 0.5, %v3631_v15  ;;  %v3633_v46 = vpop.eup %3632 }
 0x965   :  { %v3635_v60 = vpop.eup %3634 }
 0x966   :  { %v1688_v5 = vadd.f32 0.5, %v1686_v42  ;;  %v1687_v56 = vmul.f32 0.5, %v3635_v60 }
 0x968   :  { %v1692_v57 = vmul.f32 %v3633_v46, %v1688_v5  ;;  %v1691_v29 = vmul.f32 %v1688_v5, %v1626_v30  ;;  %v1689_v37 = vadd.f32 0.5, %v1687_v56 }
 0x96a   :  { %1694 = vrot.lane.b32.xlu1 %v1692_v57, %s3870_s4 }
 0x9dc   :  { %v1695_v17 = vpop.permute.xlu1 %1694 }
 0x9dd   :  { %v1697_v48 = vadd.f32 %v1695_v17, %v1691_v29 }
 0x9df   :  { %3636 = vtanh.f32 %v1697_v48 }
 0x9e9   :  { %v3637_v19 = vpop.eup %3636 }
 0x9ea   :  { %v1699_v12 = vmul.f32 %v3637_v19, %v1689_v37 }
 0x9ec   :  { %v1703_v18 = vpack.c.bf16 %v1699_v12, %v1699_v12  ;;  %v4382_v4 = vmax.f32 %v1629_v7, %v1699_v12 }
 0x9ee   :  { %1705 = vrot.lane.b32.xlu0 %v1703_v18, %s3870_s4 }
 0xa60   :  { %v1706_v11 = vpop.permute.xlu0 %1705 }
 0xa61   :  { %3319 = vmatmul.mubr.msk.bf16.vlgmr.msra.gmra.mrb[32].mxu1 %vm1352_vm8, %v1706_v11 }
 0xa62   :  { %1853 = vmatpush1.bf16.msra.mxu1 %v4042_v32  ;;  %1884 = vmatprep.mubr.bf16.mxu1 %v4758_v14 }
 0xa63   :  { %1854 = vmatprep.subr.bf16.mxu1 %v4045_v34 }
 0xa66   :  { %1855 = vmatpush1.bf16.msra.mxu1 %v4054_v36 }
 0xa67   :  { %1856 = vmatprep.subr.bf16.mxu1 %v4057_v38 }
 0xa6a   :  { %1857 = vmatpush1.bf16.msra.mxu1 %v4069_v45 }
 0xa6b   :  { %1858 = vmatprep.subr.bf16.mxu1 %v4077_v47 }
 0xa6e   :  { %1859 = vmatpush1.bf16.msra.mxu1 %v4082_v52 }
 0xb34   :  { %v1744_v30 = vpop.f32.mrb[32].mxu1 }
 0xb35   :  { %v1751_v7 = vadd.f32 %v1744_v30, %v4251_v59  ;;  %v1746_v20 = vpop.f32.mrb[33].mxu1 }
 0xb36   :  { %v1752_v32 = vadd.f32 %v1746_v20, %v4253_v2  ;;  %v1748_v53 = vpop.f32.mrb[34].mxu1 }
 0xb37   :  { %v1753_v3 = vmul.f32 0.5, %v1751_v7  ;;  %v1749_v9 = vpop.f32.mrb[35].mxu1 }
 0xb38   :  { %v1754_v47 = vmul.f32 0.5, %v1752_v32 }
 0xb39   :  { %3638 = vtanh.f32 %v1753_v3 }
 0xb3a   :  { %3640 = vtanh.f32 %v1752_v32 }
 0xb3b   :  { %3642 = vtanh.f32 %v1754_v47 }
 0xb43   :  { %v3639_v34 = vpop.eup %3638 }
 0xb44   :  { %v1757_v36 = vmul.f32 0.5, %v3639_v34  ;;  %v3641_v1 = vpop.eup %3640 }
 0xb45   :  { %v3643_v62 = vpop.eup %3642 }
 0xb46   :  { %v1759_v38 = vadd.f32 0.5, %v1757_v36  ;;  %v1758_v2 = vmul.f32 0.5, %v3643_v62 }
 0xb48   :  { %v1763_v45 = vmul.f32 %v3641_v1, %v1759_v38  ;;  %v1762_v52 = vmul.f32 %v1759_v38, %v1697_v48  ;;  %v1760_v15 = vadd.f32 0.5, %v1758_v2 }
 0xb4a   :  { %1765 = vrot.lane.b32.xlu1 %v1763_v45, %s3870_s4 }
 0xbbc   :  { %v1766_v16 = vpop.permute.xlu1 %1765 }
 0xbbd   :  { %v1768_v59 = vadd.f32 %v1766_v16, %v1762_v52 }
 0xbbf   :  { %3644 = vtanh.f32 %v1768_v59 }
 0xbc9   :  { %v3645_v42 = vpop.eup %3644 }
 0xbca   :  { %v1770_v5 = vmul.f32 %v3645_v42, %v1760_v15 }
 0xbcc   :  { %v1774_v46 = vpack.c.bf16 %v1770_v5, %v1770_v5  ;;  %v1771_v57 = vmax.f32 %v4382_v4, %v1770_v5 }
 0xbce   :  { %1776 = vrot.lane.b32.xlu0 %v1774_v46, %s3870_s4 }
 0xc40   :  { %v1777_v25 = vpop.permute.xlu0 %1776 }
 0xc41   :  { %3320 = vmatmul.mubr.msk.bf16.vlgmr.msra.gmra.mrb[36].mxu0 %vm1352_vm8, %v1777_v25  ;;  %v4412_v25 = vld [vmem:[#allocation7 + $0x44] ss:$8 sps:$4 sm:$0xff]  }
 0xc42   :  { %2004 = vmatprep.mubr.bf16.mxu0 %v4758_v14  ;;  %1972 = vmatprep.subr.bf16.mxu0 %v4412_v25 }
 0xc43   :  { %2042 = vmatprep.subr.bf16.mxu1 %v4412_v25 }
 0xd14   :  { %v1815_v29 = vpop.f32.mrb[36].mxu0 }
 0xd15   :  { %v1822_v17 = vadd.f32 %v1815_v29, %v4256_v6  ;;  %v1817_v48 = vpop.f32.mrb[37].mxu0  ;;  %v4414_v29 = vld [vmem:[#allocation7 + $0x40] ss:$8 sps:$4 sm:$0xff]  }
 0xd16   :  { %v1823_v60 = vadd.f32 %v1817_v48, %v4258_v8  ;;  %v1819_v56 = vpop.f32.mrb[38].mxu0  ;;  %1973 = vmatpush1.bf16.msra.mxu0 %v4414_v29  ;;  %v4429_v48 = vld [vmem:[#allocation7 + $0x60] ss:$8 sps:$4 sm:$0xff]  }
 0xd17   :  { %v1824_v37 = vmul.f32 0.5, %v1822_v17  ;;  %v1820_v19 = vpop.f32.mrb[39].mxu0  ;;  %v4425_v17 = vld [vmem:[#allocation7 + $0x64] ss:$8 sps:$4 sm:$0xff]   ;;  %v4437_v56 = vld [vmem:[#allocation7 + $0x70] ss:$8 sps:$4 sm:$0xff]  }
 0xd18   :  { %v1825_v7 = vmul.f32 0.5, %v1823_v60 }
 0xd19   :  { %3646 = vtanh.f32 %v1824_v37 }
 0xd1a   :  { %3648 = vtanh.f32 %v1823_v60  ;;  %v4433_v60 = vld [vmem:[#allocation7 + $0x74] ss:$8 sps:$4 sm:$0xff]  }
 0xd1b   :  { %3650 = vtanh.f32 %v1825_v7 }
 0xd23   :  { %v3647_v12 = vpop.eup %3646 }
 0xd24   :  { %v1828_v18 = vmul.f32 0.5, %v3647_v12  ;;  %v3649_v11 = vpop.eup %3648 }
 0xd25   :  { %v3651_v53 = vpop.eup %3650 }
 0xd26   :  { %v1830_v4 = vadd.f32 0.5, %v1828_v18  ;;  %v1829_v8 = vmul.f32 0.5, %v3651_v53 }
 0xd28   :  { %v1834_v30 = vmul.f32 %v3649_v11, %v1830_v4  ;;  %v1833_v20 = vmul.f32 %v1830_v4, %v1768_v59  ;;  %v1831_v3 = vadd.f32 0.5, %v1829_v8 }
 0xd2a   :  { %1836 = vrot.lane.b32.xlu1 %v1834_v30, %s3870_s4 }
 0xd9c   :  { %v1837_v32 = vpop.permute.xlu1 %1836 }
 0xd9d   :  { %v1839_v6 = vadd.f32 %v1837_v32, %v1833_v20 }
 0xd9f   :  { %3652 = vtanh.f32 %v1839_v6 }
 0xda9   :  { %v3653_v9 = vpop.eup %3652 }
 0xdaa   :  { %v1841_v34 = vmul.f32 %v3653_v9, %v1831_v3  ;;  %v1209_v3 = vadd.f32 %v4184_v23, %v4181_v54 }
 0xdac   :  { %v1845_v36 = vpack.c.bf16 %v1841_v34, %v1841_v34  ;;  %v4404_v38 = vmax.f32 %v1771_v57, %v1841_v34 }
 0xdae   :  { %1847 = vrot.lane.b32.xlu0 %v1845_v36, %s3870_s4 }
 0xe20   :  { %v1848_v1 = vpop.permute.xlu0 %1847 }
 0xe21   :  { %3321 = vmatmul.mubr.msk.bf16.vlgmr.msra.gmra.mrb[36].mxu1 %vm1352_vm8, %v1848_v1 }
 0xe22   :  { %2074 = vmatprep.mubr.bf16.mxu1 %v4758_v14  ;;  %2043 = vmatpush1.bf16.msra.mxu1 %v4414_v29 }
 0xef4   :  { %v1886_v45 = vpop.f32.mrb[36].mxu1 }
 0xef5   :  { %v1893_v47 = vadd.f32 %v1886_v45, %v4260_v10  ;;  %v1888_v52 = vpop.f32.mrb[37].mxu1  ;;  %v4416_v10 = vld [vmem:[#allocation7 + $0x54] ss:$8 sps:$4 sm:$0xff]  }
 0xef6   :  { %v1894_v16 = vadd.f32 %v1888_v52, %v4262_v13  ;;  %v1890_v59 = vpop.f32.mrb[38].mxu1  ;;  %v4421_v13 = vld [vmem:[#allocation7 + $0x50] ss:$8 sps:$4 sm:$0xff]   ;;  %1974 = vmatprep.subr.bf16.mxu0 %v4416_v10  ;;  %2044 = vmatprep.subr.bf16.mxu1 %v4416_v10 }
 0xef7   :  { %v1895_v62 = vmul.f32 0.5, %v1893_v47  ;;  %v1891_v2 = vpop.f32.mrb[39].mxu1  ;;  %1975 = vmatpush1.bf16.msra.mxu0 %v4421_v13  ;;  %2045 = vmatpush1.bf16.msra.mxu1 %v4421_v13 }
 0xef8   :  { %1976 = vmatprep.subr.bf16.mxu0 %v4425_v17  ;;  %2046 = vmatprep.subr.bf16.mxu1 %v4425_v17  ;;  %v1896_v37 = vmul.f32 0.5, %v1894_v16 }
 0xef9   :  { %3654 = vtanh.f32 %v1895_v62 }
 0xefa   :  { %3656 = vtanh.f32 %v1894_v16 }
 0xefb   :  { %1977 = vmatpush1.bf16.msra.mxu0 %v4429_v48  ;;  %2047 = vmatpush1.bf16.msra.mxu1 %v4429_v48  ;;  %3658 = vtanh.f32 %v1896_v37 }
 0xefc   :  { %1978 = vmatprep.subr.bf16.mxu0 %v4433_v60  ;;  %2048 = vmatprep.subr.bf16.mxu1 %v4433_v60 }
 0xeff   :  { %1979 = vmatpush1.bf16.msra.mxu0 %v4437_v56  ;;  %2049 = vmatpush1.bf16.msra.mxu1 %v4437_v56 }
 0xf00   :  { %2113 = vmatprep.subr.bf16.mxu0 %v4412_v25  ;;  %2184 = vmatprep.subr.bf16.mxu1 %v4412_v25 }
 0xf03   :  { %v3655_v15 = vpop.eup %3654 }
 0xf04   :  { %v1899_v42 = vmul.f32 0.5, %v3655_v15  ;;  %v3657_v46 = vpop.eup %3656 }
 0xf05   :  { %v3659_v4 = vpop.eup %3658 }
 0xf06   :  { %v1901_v5 = vadd.f32 0.5, %v1899_v42  ;;  %v1900_v11 = vmul.f32 0.5, %v3659_v4 }
 0xf08   :  { %v1905_v57 = vmul.f32 %v3657_v46, %v1901_v5  ;;  %v1904_v19 = vmul.f32 %v1901_v5, %v1839_v6  ;;  %v1902_v30 = vadd.f32 0.5, %v1900_v11  ;;  %v1208_v6 = vadd.f32 %v4179_v22, %v4176_v21 }
 0xf0a   :  { %1907 = vrot.lane.b32.xlu1 %v1905_v57, %s3870_s4 }
 0xf7c   :  { %v1908_v12 = vpop.permute.xlu1 %1907 }
 0xf7d   :  { %v1910_v18 = vadd.f32 %v1908_v12, %v1904_v19 }
 0xf7f   :  { %3660 = vtanh.f32 %v1910_v18 }
 0xf89   :  { %v3661_v7 = vpop.eup %3660 }
 0xf8a   :  { %v4446_v20 = vmul.f32 %v3661_v7, %v1902_v30 }
 0xf8c   :  { %v1925_v32 = vpack.c.bf16 %v4446_v20, %v4446_v20  ;;  %v1913_v53 = vmax.f32 %v4404_v38, %v4446_v20 }
 0xf8e   :  { %1927 = vrot.lane.b32.xlu0 %v1925_v32, %s3870_s4 }
0x1000   :  { %v1928_v8 = vpop.permute.xlu0 %1927 }
0x1001   :  { %3330 = vmatmul.mubr.msk.bf16.vlgmr.msra.gmra.mrb[40].mxu0 %vm1352_vm8, %v1928_v8 }
0x1002   :  { %2114 = vmatpush1.bf16.msra.mxu0 %v4414_v29  ;;  %2145 = vmatprep.mubr.bf16.mxu0 %v4758_v14 }
0x1003   :  { %2115 = vmatprep.subr.bf16.mxu0 %v4416_v10 }
0x1006   :  { %2116 = vmatpush1.bf16.msra.mxu0 %v4421_v13 }
0x1007   :  { %2117 = vmatprep.subr.bf16.mxu0 %v4425_v17 }
0x100a   :  { %2118 = vmatpush1.bf16.msra.mxu0 %v4429_v48 }
0x100b   :  { %2119 = vmatprep.subr.bf16.mxu0 %v4433_v60 }
0x100e   :  { %2120 = vmatpush1.bf16.msra.mxu0 %v4437_v56 }
0x100f   :  { %2255 = vmatprep.subr.bf16.mxu0 %v4412_v25 }
0x10d4   :  { %v2006_v9 = vpop.f32.mrb[40].mxu0 }
0x10d5   :  { %v2013_v34 = vadd.f32 %v2006_v9, %v1208_v6  ;;  %v2008_v36 = vpop.f32.mrb[41].mxu0 }
0x10d6   :  { %v2014_v1 = vadd.f32 %v2008_v36, %v1209_v3  ;;  %v2010_v45 = vpop.f32.mrb[42].mxu0 }
0x10d7   :  { %v2015_v47 = vmul.f32 0.5, %v2013_v34  ;;  %v2011_v52 = vpop.f32.mrb[43].mxu0 }
0x10d8   :  { %v2016_v21 = vmul.f32 0.5, %v2014_v1 }
0x10d9   :  { %3662 = vtanh.f32 %v2015_v47 }
0x10da   :  { %3664 = vtanh.f32 %v2014_v1 }
0x10db   :  { %3666 = vtanh.f32 %v2016_v21 }
0x10e3   :  { %v3663_v16 = vpop.eup %3662 }
0x10e4   :  { %v2019_v59 = vmul.f32 0.5, %v3663_v16  ;;  %v3665_v2 = vpop.eup %3664 }
0x10e5   :  { %v3667_v42 = vpop.eup %3666 }
0x10e6   :  { %v2021_v62 = vadd.f32 0.5, %v2019_v59  ;;  %v2020_v5 = vmul.f32 0.5, %v3667_v42 }
0x10e8   :  { %v2025_v15 = vmul.f32 %v3665_v2, %v2021_v62  ;;  %v2024_v22 = vmul.f32 %v2021_v62, %v1910_v18  ;;  %v2022_v46 = vadd.f32 0.5, %v2020_v5 }
0x10ea   :  { %2027 = vrot.lane.b32.xlu1 %v2025_v15, %s3870_s4 }
0x115c   :  { %v2028_v54 = vpop.permute.xlu1 %2027 }
0x115d   :  { %v2030_v23 = vadd.f32 %v2028_v54, %v2024_v22 }
0x115f   :  { %3668 = vtanh.f32 %v2030_v23 }
0x1169   :  { %v3669_v57 = vpop.eup %3668 }
0x116a   :  { %v4468_v37 = vmul.f32 %v3669_v57, %v2022_v46 }
0x116c   :  { %v2035_v19 = vpack.c.bf16 %v4468_v37, %v4468_v37 }
0x116e   :  { %2037 = vrot.lane.b32.xlu0 %v2035_v19, %s3870_s4 }
0x11e0   :  { %v2038_v12 = vpop.permute.xlu0 %2037 }
0x11e1   :  { %3331 = vmatmul.mubr.msk.bf16.vlgmr.msra.gmra.mrb[40].mxu1 %vm1352_vm8, %v2038_v12 }
0x11e2   :  { %2185 = vmatpush1.bf16.msra.mxu1 %v4414_v29  ;;  %2216 = vmatprep.mubr.bf16.mxu1 %v4758_v14 }
0x11e3   :  { %2186 = vmatprep.subr.bf16.mxu1 %v4416_v10 }
0x11e6   :  { %2187 = vmatpush1.bf16.msra.mxu1 %v4421_v13 }
0x11e7   :  { %2188 = vmatprep.subr.bf16.mxu1 %v4425_v17 }
0x11ea   :  { %2189 = vmatpush1.bf16.msra.mxu1 %v4429_v48 }
0x11eb   :  { %2190 = vmatprep.subr.bf16.mxu1 %v4433_v60 }
0x11ee   :  { %2191 = vmatpush1.bf16.msra.mxu1 %v4437_v56 }
0x11ef   :  { %2326 = vmatprep.subr.bf16.mxu1 %v4412_v25 }
0x12b4   :  { %v2076_v18 = vpop.f32.mrb[40].mxu1 }
0x12b5   :  { %v2083_v4 = vadd.f32 %v2076_v18, %v4187_v24  ;;  %v2078_v11 = vpop.f32.mrb[41].mxu1 }
0x12b6   :  { %v2084_v30 = vadd.f32 %v2078_v11, %v4190_v26  ;;  %v2080_v7 = vpop.f32.mrb[42].mxu1 }
0x12b7   :  { %v2085_v32 = vmul.f32 0.5, %v2083_v4  ;;  %v2081_v8 = vpop.f32.mrb[43].mxu1 }
0x12b8   :  { %v2086_v1 = vmul.f32 0.5, %v2084_v30 }
0x12b9   :  { %3670 = vtanh.f32 %v2085_v32 }
0x12ba   :  { %3672 = vtanh.f32 %v2084_v30 }
0x12bb   :  { %3674 = vtanh.f32 %v2086_v1 }
0x12c3   :  { %v3671_v6 = vpop.eup %3670 }
0x12c4   :  { %v2089_v3 = vmul.f32 0.5, %v3671_v6  ;;  %v3673_v34 = vpop.eup %3672 }
0x12c5   :  { %v3675_v52 = vpop.eup %3674 }
0x12c6   :  { %v2091_v9 = vadd.f32 0.5, %v2089_v3  ;;  %v2090_v26 = vmul.f32 0.5, %v3675_v52 }
0x12c8   :  { %v2095_v36 = vmul.f32 %v3673_v34, %v2091_v9  ;;  %v2094_v45 = vmul.f32 %v2091_v9, %v2030_v23  ;;  %v2092_v16 = vadd.f32 0.5, %v2090_v26 }
0x12ca   :  { %2097 = vrot.lane.b32.xlu1 %v2095_v36, %s3870_s4 }
0x133c   :  { %v2098_v47 = vpop.permute.xlu1 %2097 }
0x133d   :  { %v2100_v24 = vadd.f32 %v2098_v47, %v2094_v45 }
0x133f   :  { %3676 = vtanh.f32 %v2100_v24 }
0x1349   :  { %v3677_v59 = vpop.eup %3676 }
0x134a   :  { %v2102_v62 = vmul.f32 %v3677_v59, %v2092_v16 }
0x134c   :  { %v2106_v2 = vpack.c.bf16 %v2102_v62, %v2102_v62  ;;  %v2103_v3 = vmax.f32 %v4468_v37, %v2102_v62 }
0x134e   :  { %2108 = vrot.lane.b32.xlu0 %v2106_v2, %s3870_s4 }
0x13c0   :  { %v2109_v15 = vpop.permute.xlu0 %2108 }
0x13c1   :  { %3332 = vmatmul.mubr.msk.bf16.vlgmr.msra.gmra.mrb[44].mxu0 %vm1352_vm8, %v2109_v15 }
0x13c2   :  { %2256 = vmatpush1.bf16.msra.mxu0 %v4414_v29  ;;  %2287 = vmatprep.mubr.bf16.mxu0 %v4758_v14 }
0x13c3   :  { %2257 = vmatprep.subr.bf16.mxu0 %v4416_v10 }
0x13c6   :  { %2258 = vmatpush1.bf16.msra.mxu0 %v4421_v13 }
0x13c7   :  { %2259 = vmatprep.subr.bf16.mxu0 %v4425_v17 }
0x13ca   :  { %2260 = vmatpush1.bf16.msra.mxu0 %v4429_v48 }
0x13cb   :  { %2261 = vmatprep.subr.bf16.mxu0 %v4433_v60 }
0x13ce   :  { %2262 = vmatpush1.bf16.msra.mxu0 %v4437_v56 }
0x13cf   :  { %2397 = vmatprep.subr.bf16.mxu0 %v4412_v25 }
0x1494   :  { %v2147_v21 = vpop.f32.mrb[44].mxu0 }
0x1495   :  { %v2154_v22 = vadd.f32 %v2147_v21, %v4193_v28  ;;  %v2149_v54 = vpop.f32.mrb[45].mxu0 }
0x1496   :  { %v2155_v23 = vadd.f32 %v2149_v54, %v4196_v31  ;;  %v2151_v42 = vpop.f32.mrb[46].mxu0 }
0x1497   :  { %v2156_v5 = vmul.f32 0.5, %v2154_v22  ;;  %v2152_v46 = vpop.f32.mrb[47].mxu0 }
0x1498   :  { %v2157_v11 = vmul.f32 0.5, %v2155_v23 }
0x1499   :  { %3678 = vtanh.f32 %v2156_v5 }
0x149a   :  { %3680 = vtanh.f32 %v2155_v23 }
0x149b   :  { %3682 = vtanh.f32 %v2157_v11 }
0x14a3   :  { %v3679_v57 = vpop.eup %3678 }
0x14a4   :  { %v2160_v19 = vmul.f32 0.5, %v3679_v57  ;;  %v3681_v18 = vpop.eup %3680 }
0x14a5   :  { %v3683_v32 = vpop.eup %3682 }
0x14a6   :  { %v2162_v12 = vadd.f32 0.5, %v2160_v19  ;;  %v2161_v31 = vmul.f32 0.5, %v3683_v32 }
0x14a8   :  { %v2166_v4 = vmul.f32 %v3681_v18, %v2162_v12  ;;  %v2165_v30 = vmul.f32 %v2162_v12, %v2100_v24  ;;  %v2163_v8 = vadd.f32 0.5, %v2161_v31 }
0x14aa   :  { %2168 = vrot.lane.b32.xlu1 %v2166_v4, %s3870_s4 }
0x151c   :  { %v2169_v7 = vpop.permute.xlu1 %2168 }
0x151d   :  { %v2171_v28 = vadd.f32 %v2169_v7, %v2165_v30 }
0x151f   :  { %3684 = vtanh.f32 %v2171_v28 }
0x1529   :  { %v3685_v6 = vpop.eup %3684 }
0x152a   :  { %v2173_v9 = vmul.f32 %v3685_v6, %v2163_v8 }
0x152c   :  { %v2177_v34 = vpack.c.bf16 %v2173_v9, %v2173_v9  ;;  %v4501_v36 = vmax.f32 %v2103_v3, %v2173_v9 }
0x152e   :  { %2179 = vrot.lane.b32.xlu0 %v2177_v34, %s3870_s4 }
0x15a0   :  { %v2180_v1 = vpop.permute.xlu0 %2179 }
0x15a1   :  { %3333 = vmatmul.mubr.msk.bf16.vlgmr.msra.gmra.mrb[44].mxu1 %vm1352_vm8, %v2180_v1 }
0x15a2   :  { %2327 = vmatpush1.bf16.msra.mxu1 %v4414_v29  ;;  %2358 = vmatprep.mubr.bf16.mxu1 %v4758_v14 }
0x15a3   :  { %2328 = vmatprep.subr.bf16.mxu1 %v4416_v10 }
0x15a6   :  { %2329 = vmatpush1.bf16.msra.mxu1 %v4421_v13 }
0x15a7   :  { %2330 = vmatprep.subr.bf16.mxu1 %v4425_v17 }
0x15aa   :  { %2331 = vmatpush1.bf16.msra.mxu1 %v4429_v48 }
0x15ab   :  { %2332 = vmatprep.subr.bf16.mxu1 %v4433_v60 }
0x15ae   :  { %2333 = vmatpush1.bf16.msra.mxu1 %v4437_v56 }
0x15af   :  { %2468 = vmatprep.subr.bf16.mxu1 %v4412_v25 }
0x1674   :  { %v2218_v37 = vpop.f32.mrb[44].mxu1 }
0x1675   :  { %v2225_v45 = vadd.f32 %v2218_v37, %v4199_v35  ;;  %v2220_v47 = vpop.f32.mrb[45].mxu1 }
0x1676   :  { %v2226_v24 = vadd.f32 %v2220_v47, %v4202_v39  ;;  %v2222_v52 = vpop.f32.mrb[46].mxu1 }
0x1677   :  { %v2227_v26 = vmul.f32 0.5, %v2225_v45  ;;  %v2223_v16 = vpop.f32.mrb[47].mxu1 }
0x1678   :  { %v2228_v22 = vmul.f32 0.5, %v2226_v24 }
0x1679   :  { %3686 = vtanh.f32 %v2227_v26 }
0x167a   :  { %3688 = vtanh.f32 %v2226_v24 }
0x167b   :  { %3690 = vtanh.f32 %v2228_v22 }
0x1683   :  { %v3687_v59 = vpop.eup %3686 }
0x1684   :  { %v2231_v62 = vmul.f32 0.5, %v3687_v59  ;;  %v3689_v15 = vpop.eup %3688 }
0x1685   :  { %v3691_v23 = vpop.eup %3690 }
0x1686   :  { %v2233_v2 = vadd.f32 0.5, %v2231_v62  ;;  %v2232_v39 = vmul.f32 0.5, %v3691_v23 }
0x1688   :  { %v2237_v21 = vmul.f32 %v3689_v15, %v2233_v2  ;;  %v2236_v25 = vmul.f32 %v2233_v2, %v2171_v28  ;;  %v2234_v42 = vadd.f32 0.5, %v2232_v39 }
0x168a   :  { %2239 = vrot.lane.b32.xlu1 %v2237_v21, %s3870_s4 }
0x16fc   :  { %v2240_v54 = vpop.permute.xlu1 %2239 }
0x16fd   :  { %v2242_v35 = vadd.f32 %v2240_v54, %v2236_v25 }
0x16ff   :  { %3692 = vtanh.f32 %v2242_v35 }
0x1709   :  { %v3693_v5 = vpop.eup %3692 }
0x170a   :  { %v2244_v46 = vmul.f32 %v3693_v5, %v2234_v42 }
0x170c   :  { %v2248_v57 = vpack.c.bf16 %v2244_v46, %v2244_v46  ;;  %v2245_v19 = vmax.f32 %v4501_v36, %v2244_v46 }
0x170e   :  { %2250 = vrot.lane.b32.xlu0 %v2248_v57, %s3870_s4 }
0x1780   :  { %v2251_v12 = vpop.permute.xlu0 %2250 }
0x1781   :  { %3334 = vmatmul.mubr.msk.bf16.vlgmr.msra.gmra.mrb[48].mxu0 %vm1352_vm8, %v2251_v12 }
0x1782   :  { %2398 = vmatpush1.bf16.msra.mxu0 %v4414_v29  ;;  %2429 = vmatprep.mubr.bf16.mxu0 %v4758_v14 }
0x1783   :  { %2399 = vmatprep.subr.bf16.mxu0 %v4416_v10 }
0x1786   :  { %2400 = vmatpush1.bf16.msra.mxu0 %v4421_v13 }
0x1787   :  { %2401 = vmatprep.subr.bf16.mxu0 %v4425_v17 }
0x178a   :  { %2402 = vmatpush1.bf16.msra.mxu0 %v4429_v48 }
0x178b   :  { %2403 = vmatprep.subr.bf16.mxu0 %v4433_v60 }
0x178e   :  { %2404 = vmatpush1.bf16.msra.mxu0 %v4437_v56 }
0x1854   :  { %v2289_v18 = vpop.f32.mrb[48].mxu0 }
0x1855   :  { %v2296_v4 = vadd.f32 %v2289_v18, %v4205_v41  ;;  %v2291_v11 = vpop.f32.mrb[49].mxu0 }
0x1856   :  { %v2297_v30 = vadd.f32 %v2291_v11, %v4208_v43  ;;  %v2293_v7 = vpop.f32.mrb[50].mxu0 }
0x1857   :  { %v2298_v28 = vmul.f32 0.5, %v2296_v4  ;;  %v2294_v32 = vpop.f32.mrb[51].mxu0 }
0x1858   :  { %v2299_v34 = vmul.f32 0.5, %v2297_v30 }
0x1859   :  { %3694 = vtanh.f32 %v2298_v28 }
0x185a   :  { %3696 = vtanh.f32 %v2297_v30 }
0x185b   :  { %3698 = vtanh.f32 %v2299_v34 }
0x1863   :  { %v3695_v31 = vpop.eup %3694 }
0x1864   :  { %v2302_v8 = vmul.f32 0.5, %v3695_v31  ;;  %v3697_v3 = vpop.eup %3696 }
0x1865   :  { %v3699_v37 = vpop.eup %3698 }
0x1866   :  { %v2304_v6 = vadd.f32 0.5, %v2302_v8  ;;  %v2303_v43 = vmul.f32 0.5, %v3699_v37 }
0x1868   :  { %v2308_v9 = vmul.f32 %v3697_v3, %v2304_v6  ;;  %v2307_v36 = vmul.f32 %v2304_v6, %v2242_v35  ;;  %v2305_v45 = vadd.f32 0.5, %v2303_v43 }
0x186a   :  { %2310 = vrot.lane.b32.xlu1 %v2308_v9, %s3870_s4 }
0x18dc   :  { %v2311_v1 = vpop.permute.xlu1 %2310 }
0x18dd   :  { %v2313_v41 = vadd.f32 %v2311_v1, %v2307_v36 }
0x18df   :  { %3700 = vtanh.f32 %v2313_v41 }
0x18e9   :  { %v3701_v47 = vpop.eup %3700 }
0x18ea   :  { %v2315_v24 = vmul.f32 %v3701_v47, %v2305_v45 }
0x18ec   :  { %v2319_v52 = vpack.c.bf16 %v2315_v24, %v2315_v24  ;;  %v4531_v26 = vmax.f32 %v2245_v19, %v2315_v24 }
0x18ee   :  { %2321 = vrot.lane.b32.xlu0 %v2319_v52, %s3870_s4 }
0x1960   :  { %v2322_v16 = vpop.permute.xlu0 %2321 }
0x1961   :  { %3335 = vmatmul.mubr.msk.bf16.vlgmr.msra.gmra.mrb[48].mxu1 %vm1352_vm8, %v2322_v16 }
0x1962   :  { %2469 = vmatpush1.bf16.msra.mxu1 %v4414_v29  ;;  %2500 = vmatprep.mubr.bf16.mxu1 %v4758_v14 }
0x1963   :  { %2470 = vmatprep.subr.bf16.mxu1 %v4416_v10 }
0x1966   :  { %2471 = vmatpush1.bf16.msra.mxu1 %v4421_v13 }
0x1967   :  { %2472 = vmatprep.subr.bf16.mxu1 %v4425_v17 }
0x196a   :  { %2473 = vmatpush1.bf16.msra.mxu1 %v4429_v48 }
0x196b   :  { %2474 = vmatprep.subr.bf16.mxu1 %v4433_v60 }
0x196e   :  { %2475 = vmatpush1.bf16.msra.mxu1 %v4437_v56 }
0x1a34   :  { %v2360_v59 = vpop.f32.mrb[48].mxu1 }
0x1a35   :  { %v2367_v62 = vadd.f32 %v2360_v59, %v4211_v49  ;;  %v2362_v2 = vpop.f32.mrb[49].mxu1 }
0x1a36   :  { %v2368_v29 = vadd.f32 %v2362_v2, %v4214_v51  ;;  %v2364_v15 = vpop.f32.mrb[50].mxu1 }
0x1a37   :  { %v2369_v21 = vmul.f32 0.5, %v2367_v62  ;;  %v2365_v22 = vpop.f32.mrb[51].mxu1 }
0x1a38   :  { %v2370_v60 = vmul.f32 0.5, %v2368_v29 }
0x1a39   :  { %3702 = vtanh.f32 %v2369_v21 }
0x1a3a   :  { %3704 = vtanh.f32 %v2368_v29 }
0x1a3b   :  { %3706 = vtanh.f32 %v2370_v60  ;;  %v4582_v60 = vld [vmem:[#allocation7 + $0xb4] ss:$8 sps:$4 sm:$0xff]  }
0x1a43   :  { %v3703_v10 = vpop.eup %3702 }
0x1a44   :  { %v2373_v13 = vmul.f32 0.5, %v3703_v10  ;;  %v3705_v25 = vpop.eup %3704 }
0x1a45   :  { %v3707_v35 = vpop.eup %3706 }
0x1a46   :  { %v2375_v17 = vadd.f32 0.5, %v2373_v13  ;;  %v2374_v51 = vmul.f32 0.5, %v3707_v35  ;;  %v4561_v13 = vld [vmem:[#allocation7 + $0x84] ss:$8 sps:$4 sm:$0xff]  }
0x1a47   :  { %2588 = vmatprep.subr.bf16.mxu0 %v4561_v13  ;;  %2658 = vmatprep.subr.bf16.mxu1 %v4561_v13 }
0x1a48   :  { %v2379_v48 = vmul.f32 %v3705_v25, %v2375_v17  ;;  %v2378_v56 = vmul.f32 %v2375_v17, %v2313_v41  ;;  %v2376_v23 = vadd.f32 0.5, %v2374_v51  ;;  %v4563_v17 = vld [vmem:[#allocation7 + $0x80] ss:$8 sps:$4 sm:$0xff]   ;;  %v4574_v25 = vld [vmem:[#allocation7 + $0xa4] ss:$8 sps:$4 sm:$0xff]  }
0x1a4a   :  { %2381 = vrot.lane.b32.xlu1 %v2379_v48, %s3870_s4  ;;  %v4578_v48 = vld [vmem:[#allocation7 + $0xa0] ss:$8 sps:$4 sm:$0xff]  }
0x1abc   :  { %v2382_v54 = vpop.permute.xlu1 %2381 }
0x1abd   :  { %v2384_v49 = vadd.f32 %v2382_v54, %v2378_v56  ;;  %v4586_v56 = vld [vmem:[#allocation7 + $0xb0] ss:$8 sps:$4 sm:$0xff]  }
0x1abf   :  { %3708 = vtanh.f32 %v2384_v49 }
0x1ac9   :  { %v3709_v39 = vpop.eup %3708 }
0x1aca   :  { %v2386_v42 = vmul.f32 %v3709_v39, %v2376_v23 }
0x1acc   :  { %v2390_v5 = vpack.c.bf16 %v2386_v42, %v2386_v42  ;;  %v2387_v46 = vmax.f32 %v4531_v26, %v2386_v42 }
0x1ace   :  { %2392 = vrot.lane.b32.xlu0 %v2390_v5, %s3870_s4 }
0x1b40   :  { %v2393_v57 = vpop.permute.xlu0 %2392 }
0x1b41   :  { %3336 = vmatmul.mubr.msk.bf16.vlgmr.msra.gmra.mrb[52].mxu0 %vm1352_vm8, %v2393_v57 }
0x1b42   :  { %2620 = vmatprep.mubr.bf16.mxu0 %v4758_v14  ;;  %2589 = vmatpush1.bf16.msra.mxu0 %v4563_v17 }
0x1c14   :  { %v2431_v19 = vpop.f32.mrb[52].mxu0 }
0x1c15   :  { %v2438_v12 = vadd.f32 %v2431_v19, %v4217_v55  ;;  %v2433_v18 = vpop.f32.mrb[53].mxu0 }
0x1c16   :  { %v2439_v4 = vadd.f32 %v2433_v18, %v4221_v58  ;;  %v2435_v11 = vpop.f32.mrb[54].mxu0  ;;  %v1210_v18 = vadd.f32 %v4269_v27, %v4266_v44 }
0x1c17   :  { %v2440_v30 = vmul.f32 0.5, %v2438_v12  ;;  %v2436_v7 = vpop.f32.mrb[55].mxu0 }
0x1c18   :  { %v2441_v3 = vmul.f32 0.5, %v2439_v4 }
0x1c19   :  { %3710 = vtanh.f32 %v2440_v30 }
0x1c1a   :  { %3712 = vtanh.f32 %v2439_v4  ;;  %v1211_v4 = vadd.f32 %v4274_v40, %v4271_v33 }
0x1c1b   :  { %3714 = vtanh.f32 %v2441_v3 }
0x1c23   :  { %v3711_v28 = vpop.eup %3710 }
0x1c24   :  { %v2444_v32 = vmul.f32 0.5, %v3711_v28  ;;  %v3713_v8 = vpop.eup %3712 }
0x1c25   :  { %v3715_v36 = vpop.eup %3714 }
0x1c26   :  { %v2446_v31 = vadd.f32 0.5, %v2444_v32  ;;  %v2445_v58 = vmul.f32 0.5, %v3715_v36 }
0x1c28   :  { %v2450_v6 = vmul.f32 %v3713_v8, %v2446_v31  ;;  %v2449_v9 = vmul.f32 %v2446_v31, %v2384_v49  ;;  %v2447_v1 = vadd.f32 0.5, %v2445_v58 }
0x1c2a   :  { %2452 = vrot.lane.b32.xlu1 %v2450_v6, %s3870_s4 }
0x1c9c   :  { %v2453_v34 = vpop.permute.xlu1 %2452 }
0x1c9d   :  { %v2455_v55 = vadd.f32 %v2453_v34, %v2449_v9 }
0x1c9f   :  { %3716 = vtanh.f32 %v2455_v55 }
0x1ca9   :  { %v3717_v41 = vpop.eup %3716 }
0x1caa   :  { %v2457_v37 = vmul.f32 %v3717_v41, %v2447_v1 }
0x1cac   :  { %v2461_v43 = vpack.c.bf16 %v2457_v37, %v2457_v37  ;;  %v4553_v45 = vmax.f32 %v2387_v46, %v2457_v37 }
0x1cae   :  { %2463 = vrot.lane.b32.xlu0 %v2461_v43, %s3870_s4 }
0x1d20   :  { %v2464_v47 = vpop.permute.xlu0 %2463 }
0x1d21   :  { %3337 = vmatmul.mubr.msk.bf16.vlgmr.msra.gmra.mrb[52].mxu1 %vm1352_vm8, %v2464_v47 }
0x1d22   :  { %2690 = vmatprep.mubr.bf16.mxu1 %v4758_v14  ;;  %2659 = vmatpush1.bf16.msra.mxu1 %v4563_v17 }
0x1df4   :  { %v2502_v24 = vpop.f32.mrb[52].mxu1 }
0x1df5   :  { %v2509_v52 = vadd.f32 %v2502_v24, %v4225_v61  ;;  %v2504_v26 = vpop.f32.mrb[53].mxu1  ;;  %v4565_v61 = vld [vmem:[#allocation7 + $0x94] ss:$8 sps:$4 sm:$0xff]  }
0x1df6   :  { %v2510_v16 = vadd.f32 %v2504_v26, %v4228_v63  ;;  %v2506_v59 = vpop.f32.mrb[54].mxu1  ;;  %v4570_v63 = vld [vmem:[#allocation7 + $0x90] ss:$8 sps:$4 sm:$0xff]   ;;  %2590 = vmatprep.subr.bf16.mxu0 %v4565_v61  ;;  %2660 = vmatprep.subr.bf16.mxu1 %v4565_v61 }
0x1df7   :  { %v2511_v62 = vmul.f32 0.5, %v2509_v52  ;;  %v2507_v2 = vpop.f32.mrb[55].mxu1  ;;  %2591 = vmatpush1.bf16.msra.mxu0 %v4570_v63  ;;  %2661 = vmatpush1.bf16.msra.mxu1 %v4570_v63 }
0x1df8   :  { %2592 = vmatprep.subr.bf16.mxu0 %v4574_v25  ;;  %2662 = vmatprep.subr.bf16.mxu1 %v4574_v25  ;;  %v2512_v54 = vmul.f32 0.5, %v2510_v16 }
0x1df9   :  { %3718 = vtanh.f32 %v2511_v62 }
0x1dfa   :  { %3720 = vtanh.f32 %v2510_v16 }
0x1dfb   :  { %2593 = vmatpush1.bf16.msra.mxu0 %v4578_v48  ;;  %2663 = vmatpush1.bf16.msra.mxu1 %v4578_v48  ;;  %3722 = vtanh.f32 %v2512_v54 }
0x1dfc   :  { %2594 = vmatprep.subr.bf16.mxu0 %v4582_v60  ;;  %2664 = vmatprep.subr.bf16.mxu1 %v4582_v60 }
0x1dff   :  { %2595 = vmatpush1.bf16.msra.mxu0 %v4586_v56  ;;  %2665 = vmatpush1.bf16.msra.mxu1 %v4586_v56 }
0x1e00   :  { %2729 = vmatprep.subr.bf16.mxu0 %v4561_v13  ;;  %2800 = vmatprep.subr.bf16.mxu1 %v4561_v13 }
0x1e03   :  { %v3719_v29 = vpop.eup %3718 }
0x1e04   :  { %v2515_v15 = vmul.f32 0.5, %v3719_v29  ;;  %v3721_v22 = vpop.eup %3720 }
0x1e05   :  { %v3723_v23 = vpop.eup %3722 }
0x1e06   :  { %v2517_v21 = vadd.f32 0.5, %v2515_v15  ;;  %v2516_v39 = vmul.f32 0.5, %v3723_v23 }
0x1e08   :  { %v2521_v10 = vmul.f32 %v3721_v22, %v2517_v21  ;;  %v2520_v49 = vmul.f32 %v2517_v21, %v2455_v55  ;;  %v2518_v42 = vadd.f32 0.5, %v2516_v39 }
0x1e0a   :  { %2523 = vrot.lane.b32.xlu1 %v2521_v10, %s3870_s4 }
0x1e7c   :  { %v2524_v35 = vpop.permute.xlu1 %2523 }
0x1e7d   :  { %v2526_v51 = vadd.f32 %v2524_v35, %v2520_v49 }
0x1e7f   :  { %3724 = vtanh.f32 %v2526_v51 }
0x1e89   :  { %v3725_v5 = vpop.eup %3724 }
0x1e8a   :  { %v4595_v46 = vmul.f32 %v3725_v5, %v2518_v42 }
0x1e8c   :  { %v2541_v57 = vpack.c.bf16 %v4595_v46, %v4595_v46  ;;  %v2529_v19 = vmax.f32 %v4553_v45, %v4595_v46 }
0x1e8e   :  { %2543 = vrot.lane.b32.xlu0 %v2541_v57, %s3870_s4 }
0x1f00   :  { %v2544_v12 = vpop.permute.xlu0 %2543 }
0x1f01   :  { %3346 = vmatmul.mubr.msk.bf16.vlgmr.msra.gmra.mrb[56].mxu0 %vm1352_vm8, %v2544_v12 }
0x1f02   :  { %2730 = vmatpush1.bf16.msra.mxu0 %v4563_v17  ;;  %2761 = vmatprep.mubr.bf16.mxu0 %v4758_v14 }
0x1f03   :  { %2731 = vmatprep.subr.bf16.mxu0 %v4565_v61 }
0x1f06   :  { %2732 = vmatpush1.bf16.msra.mxu0 %v4570_v63 }
0x1f07   :  { %2733 = vmatprep.subr.bf16.mxu0 %v4574_v25 }
0x1f0a   :  { %2734 = vmatpush1.bf16.msra.mxu0 %v4578_v48 }
0x1f0b   :  { %2735 = vmatprep.subr.bf16.mxu0 %v4582_v60 }
0x1f0e   :  { %2736 = vmatpush1.bf16.msra.mxu0 %v4586_v56 }
0x1f0f   :  { %2871 = vmatprep.subr.bf16.mxu0 %v4561_v13 }
0x1fd4   :  { %v2622_v11 = vpop.f32.mrb[56].mxu0 }
0x1fd5   :  { %v2629_v30 = vadd.f32 %v2622_v11, %v1210_v18  ;;  %v2624_v7 = vpop.f32.mrb[57].mxu0  ;;  %v4759_v18 = vld [vmem:[#allocation10_spill] sm:$0xff] }
0x1fd6   :  { %v2630_v28 = vadd.f32 %v2624_v7, %v1211_v4  ;;  %v2626_v32 = vpop.f32.mrb[58].mxu0 }
0x1fd7   :  { %v2631_v31 = vmul.f32 0.5, %v2629_v30  ;;  %v2627_v8 = vpop.f32.mrb[59].mxu0  ;;  %v4760_v30 = vld [vmem:[#allocation11_spill] sm:$0xff] }
0x1fd8   :  { %v2632_v44 = vmul.f32 0.5, %v2630_v28 }
0x1fd9   :  { %3726 = vtanh.f32 %v2631_v31 }
0x1fda   :  { %3728 = vtanh.f32 %v2630_v28 }
0x1fdb   :  { %3730 = vtanh.f32 %v2632_v44 }
0x1fe3   :  { %v3727_v6 = vpop.eup %3726 }
0x1fe4   :  { %v2635_v3 = vmul.f32 0.5, %v3727_v6  ;;  %v3729_v34 = vpop.eup %3728 }
0x1fe5   :  { %v3731_v36 = vpop.eup %3730 }
0x1fe6   :  { %v2637_v9 = vadd.f32 0.5, %v2635_v3  ;;  %v2636_v58 = vmul.f32 0.5, %v3731_v36 }
0x1fe8   :  { %v2641_v55 = vmul.f32 %v3729_v34, %v2637_v9  ;;  %v2640_v27 = vmul.f32 %v2637_v9, %v2526_v51  ;;  %v2638_v1 = vadd.f32 0.5, %v2636_v58 }
0x1fea   :  { %2643 = vrot.lane.b32.xlu1 %v2641_v55, %s3870_s4 }
0x205c   :  { %v2644_v33 = vpop.permute.xlu1 %2643 }
0x205d   :  { %v2646_v40 = vadd.f32 %v2644_v33, %v2640_v27 }
0x205f   :  { %3732 = vtanh.f32 %v2646_v40 }
0x2069   :  { %v3733_v41 = vpop.eup %3732 }
0x206a   :  { %v4617_v37 = vmul.f32 %v3733_v41, %v2638_v1 }
0x206c   :  { %v2651_v43 = vpack.c.bf16 %v4617_v37, %v4617_v37 }
0x206e   :  { %2653 = vrot.lane.b32.xlu0 %v2651_v43, %s3870_s4 }
0x20e0   :  { %v2654_v47 = vpop.permute.xlu0 %2653 }
0x20e1   :  { %3347 = vmatmul.mubr.msk.bf16.vlgmr.msra.gmra.mrb[56].mxu1 %vm1352_vm8, %v2654_v47 }
0x20e2   :  { %2801 = vmatpush1.bf16.msra.mxu1 %v4563_v17  ;;  %2832 = vmatprep.mubr.bf16.mxu1 %v4758_v14 }
0x20e3   :  { %2802 = vmatprep.subr.bf16.mxu1 %v4565_v61 }
0x20e6   :  { %2803 = vmatpush1.bf16.msra.mxu1 %v4570_v63 }
0x20e7   :  { %2804 = vmatprep.subr.bf16.mxu1 %v4574_v25 }
0x20ea   :  { %2805 = vmatpush1.bf16.msra.mxu1 %v4578_v48 }
0x20eb   :  { %2806 = vmatprep.subr.bf16.mxu1 %v4582_v60 }
0x20ee   :  { %2807 = vmatpush1.bf16.msra.mxu1 %v4586_v56 }
0x20ef   :  { %2942 = vmatprep.subr.bf16.mxu1 %v4561_v13 }
0x21b4   :  { %v2692_v24 = vpop.f32.mrb[56].mxu1 }
0x21b5   :  { %v2699_v52 = vadd.f32 %v2692_v24, %v4277_v0  ;;  %v2694_v26 = vpop.f32.mrb[57].mxu1 }
0x21b6   :  { %v2700_v16 = vadd.f32 %v2694_v26, %v4280_v50  ;;  %v2696_v59 = vpop.f32.mrb[58].mxu1  ;;  %v4761_v26 = vld [vmem:[#allocation12_spill] sm:$0xff] }
0x21b7   :  { %v2701_v62 = vmul.f32 0.5, %v2699_v52  ;;  %v2697_v2 = vpop.f32.mrb[59].mxu1 }
0x21b8   :  { %v2702_v54 = vmul.f32 0.5, %v2700_v16 }
0x21b9   :  { %3734 = vtanh.f32 %v2701_v62  ;;  %v4762_v62 = vld [vmem:[#allocation13_spill] sm:$0xff] }
0x21ba   :  { %3736 = vtanh.f32 %v2700_v16 }
0x21bb   :  { %3738 = vtanh.f32 %v2702_v54 }
0x21c3   :  { %v3735_v29 = vpop.eup %3734 }
0x21c4   :  { %v2705_v15 = vmul.f32 0.5, %v3735_v29  ;;  %v3737_v22 = vpop.eup %3736 }
0x21c5   :  { %v3739_v51 = vpop.eup %3738 }
0x21c6   :  { %v2707_v21 = vadd.f32 0.5, %v2705_v15  ;;  %v2706_v50 = vmul.f32 0.5, %v3739_v51 }
0x21c8   :  { %v2711_v10 = vmul.f32 %v3737_v22, %v2707_v21  ;;  %v2710_v49 = vmul.f32 %v2707_v21, %v2646_v40  ;;  %v2708_v23 = vadd.f32 0.5, %v2706_v50 }
0x21ca   :  { %2713 = vrot.lane.b32.xlu1 %v2711_v10, %s3870_s4 }
0x223c   :  { %v2714_v35 = vpop.permute.xlu1 %2713 }
0x223d   :  { %v2716_v0 = vadd.f32 %v2714_v35, %v2710_v49 }
0x223f   :  { %3740 = vtanh.f32 %v2716_v0 }
0x2249   :  { %v3741_v39 = vpop.eup %3740 }
0x224a   :  { %v2718_v42 = vmul.f32 %v3741_v39, %v2708_v23 }
0x224c   :  { %v2722_v5 = vpack.c.bf16 %v2718_v42, %v2718_v42  ;;  %v2719_v41 = vmax.f32 %v4617_v37, %v2718_v42 }
0x224e   :  { %2724 = vrot.lane.b32.xlu0 %v2722_v5, %s3870_s4 }
0x22c0   :  { %v2725_v57 = vpop.permute.xlu0 %2724 }
0x22c1   :  { %3348 = vmatmul.mubr.msk.bf16.vlgmr.msra.gmra.mrb[60].mxu0 %vm1352_vm8, %v2725_v57 }
0x22c2   :  { %2872 = vmatpush1.bf16.msra.mxu0 %v4563_v17  ;;  %2903 = vmatprep.mubr.bf16.mxu0 %v4758_v14 }
0x22c3   :  { %2873 = vmatprep.subr.bf16.mxu0 %v4565_v61 }
0x22c6   :  { %2874 = vmatpush1.bf16.msra.mxu0 %v4570_v63 }
0x22c7   :  { %2875 = vmatprep.subr.bf16.mxu0 %v4574_v25 }
0x22ca   :  { %2876 = vmatpush1.bf16.msra.mxu0 %v4578_v48 }
0x22cb   :  { %2877 = vmatprep.subr.bf16.mxu0 %v4582_v60 }
0x22ce   :  { %2878 = vmatpush1.bf16.msra.mxu0 %v4586_v56 }
0x22cf   :  { %3013 = vmatprep.subr.bf16.mxu0 %v4561_v13 }
0x2394   :  { %v2763_v12 = vpop.f32.mrb[60].mxu0 }
0x2395   :  { %v2770_v4 = vadd.f32 %v2763_v12, %v4759_v18  ;;  %v2765_v11 = vpop.f32.mrb[61].mxu0 }
0x2396   :  { %v2771_v7 = vadd.f32 %v2765_v11, %v4760_v30  ;;  %v2767_v28 = vpop.f32.mrb[62].mxu0  ;;  %v4763_v30 = vld [vmem:[#allocation14_spill] sm:$0xff] }
0x2397   :  { %v2772_v32 = vmul.f32 0.5, %v2770_v4  ;;  %v2768_v31 = vpop.f32.mrb[63].mxu0 }
0x2398   :  { %v2773_v55 = vmul.f32 0.5, %v2771_v7 }
0x2399   :  { %3742 = vtanh.f32 %v2772_v32  ;;  %v4764_v32 = vld [vmem:[#allocation15_spill] sm:$0xff] }
0x239a   :  { %3744 = vtanh.f32 %v2771_v7 }
0x239b   :  { %3746 = vtanh.f32 %v2773_v55 }
0x23a3   :  { %v3743_v8 = vpop.eup %3742 }
0x23a4   :  { %v2776_v6 = vmul.f32 0.5, %v3743_v8  ;;  %v3745_v9 = vpop.eup %3744 }
0x23a5   :  { %v3747_v40 = vpop.eup %3746 }
0x23a6   :  { %v2778_v3 = vadd.f32 0.5, %v2776_v6  ;;  %v2777_v36 = vmul.f32 0.5, %v3747_v40 }
0x23a8   :  { %v2782_v34 = vmul.f32 %v3745_v9, %v2778_v3  ;;  %v2781_v44 = vmul.f32 %v2778_v3, %v2716_v0  ;;  %v2779_v58 = vadd.f32 0.5, %v2777_v36 }
0x23aa   :  { %2784 = vrot.lane.b32.xlu1 %v2782_v34, %s3870_s4 }
0x241c   :  { %v2785_v27 = vpop.permute.xlu1 %2784 }
0x241d   :  { %v2787_v33 = vadd.f32 %v2785_v27, %v2781_v44 }
0x241f   :  { %3748 = vtanh.f32 %v2787_v33 }
0x2429   :  { %v3749_v1 = vpop.eup %3748 }
0x242a   :  { %v2789_v43 = vmul.f32 %v3749_v1, %v2779_v58 }
0x242c   :  { %v2793_v47 = vpack.c.bf16 %v2789_v43, %v2789_v43  ;;  %v4650_v24 = vmax.f32 %v2719_v41, %v2789_v43 }
0x242e   :  { %2795 = vrot.lane.b32.xlu0 %v2793_v47, %s3870_s4 }
0x24a0   :  { %v2796_v52 = vpop.permute.xlu0 %2795 }
0x24a1   :  { %3349 = vmatmul.mubr.msk.bf16.vlgmr.msra.gmra.mrb[60].mxu1 %vm1352_vm8, %v2796_v52 }
0x24a2   :  { %2943 = vmatpush1.bf16.msra.mxu1 %v4563_v17  ;;  %2974 = vmatprep.mubr.bf16.mxu1 %v4758_v14 }
0x24a3   :  { %2944 = vmatprep.subr.bf16.mxu1 %v4565_v61 }
0x24a6   :  { %2945 = vmatpush1.bf16.msra.mxu1 %v4570_v63 }
0x24a7   :  { %2946 = vmatprep.subr.bf16.mxu1 %v4574_v25 }
0x24aa   :  { %2947 = vmatpush1.bf16.msra.mxu1 %v4578_v48 }
0x24ab   :  { %2948 = vmatprep.subr.bf16.mxu1 %v4582_v60 }
0x24ae   :  { %2949 = vmatpush1.bf16.msra.mxu1 %v4586_v56 }
0x24af   :  { %3084 = vmatprep.subr.bf16.mxu1 %v4561_v13 }
0x2574   :  { %v2834_v37 = vpop.f32.mrb[60].mxu1 }
0x2575   :  { %v2841_v16 = vadd.f32 %v2834_v37, %v4761_v26  ;;  %v2836_v59 = vpop.f32.mrb[61].mxu1 }
0x2576   :  { %v2842_v2 = vadd.f32 %v2836_v59, %v4762_v62  ;;  %v2838_v29 = vpop.f32.mrb[62].mxu1  ;;  %v4765_v59 = vld [vmem:[#allocation16_spill] sm:$0xff] }
0x2577   :  { %v2843_v15 = vmul.f32 0.5, %v2841_v16  ;;  %v2839_v21 = vpop.f32.mrb[63].mxu1  ;;  %v4766_v29 = vld [vmem:[#allocation17_spill] sm:$0xff] }
0x2578   :  { %v2844_v0 = vmul.f32 0.5, %v2842_v2 }
0x2579   :  { %3750 = vtanh.f32 %v2843_v15 }
0x257a   :  { %3752 = vtanh.f32 %v2842_v2 }
0x257b   :  { %3754 = vtanh.f32 %v2844_v0 }
0x2583   :  { %v3751_v22 = vpop.eup %3750 }
0x2584   :  { %v2847_v10 = vmul.f32 0.5, %v3751_v22  ;;  %v3753_v49 = vpop.eup %3752 }
0x2585   :  { %v3755_v23 = vpop.eup %3754 }
0x2586   :  { %v2849_v54 = vadd.f32 0.5, %v2847_v10  ;;  %v2848_v39 = vmul.f32 0.5, %v3755_v23 }
0x2588   :  { %v2853_v35 = vmul.f32 %v3753_v49, %v2849_v54  ;;  %v2852_v13 = vmul.f32 %v2849_v54, %v2787_v33  ;;  %v2850_v42 = vadd.f32 0.5, %v2848_v39 }
0x258a   :  { %2855 = vrot.lane.b32.xlu1 %v2853_v35, %s3870_s4 }
0x25fc   :  { %v2856_v51 = vpop.permute.xlu1 %2855 }
0x25fd   :  { %v2858_v50 = vadd.f32 %v2856_v51, %v2852_v13 }
0x25ff   :  { %3756 = vtanh.f32 %v2858_v50 }
0x2609   :  { %v3757_v5 = vpop.eup %3756 }
0x260a   :  { %v2860_v57 = vmul.f32 %v3757_v5, %v2850_v42  ;;  %v4767_v5 = vld [vmem:[#allocation18_spill] sm:$0xff] }
0x260c   :  { %v2864_v12 = vpack.c.bf16 %v2860_v57, %v2860_v57  ;;  %v2861_v18 = vmax.f32 %v4650_v24, %v2860_v57 }
0x260e   :  { %2866 = vrot.lane.b32.xlu0 %v2864_v12, %s3870_s4 }
0x2680   :  { %v2867_v4 = vpop.permute.xlu0 %2866 }
0x2681   :  { %3350 = vmatmul.mubr.msk.bf16.vlgmr.msra.gmra.mrb[64].mxu0 %vm1352_vm8, %v2867_v4 }
0x2682   :  { %3014 = vmatpush1.bf16.msra.mxu0 %v4563_v17  ;;  %3045 = vmatprep.mubr.bf16.mxu0 %v4758_v14 }
0x2683   :  { %3015 = vmatprep.subr.bf16.mxu0 %v4565_v61 }
0x2686   :  { %3016 = vmatpush1.bf16.msra.mxu0 %v4570_v63 }
0x2687   :  { %3017 = vmatprep.subr.bf16.mxu0 %v4574_v25 }
0x268a   :  { %3018 = vmatpush1.bf16.msra.mxu0 %v4578_v48 }
0x268b   :  { %3019 = vmatprep.subr.bf16.mxu0 %v4582_v60 }
0x268e   :  { %3020 = vmatpush1.bf16.msra.mxu0 %v4586_v56 }
0x2754   :  { %v2905_v11 = vpop.f32.mrb[64].mxu0 }
0x2755   :  { %v2912_v7 = vadd.f32 %v2905_v11, %v4763_v30  ;;  %v2907_v28 = vpop.f32.mrb[65].mxu0 }
0x2756   :  { %v2913_v31 = vadd.f32 %v2907_v28, %v4764_v32  ;;  %v2909_v8 = vpop.f32.mrb[66].mxu0 }
0x2757   :  { %v2914_v6 = vmul.f32 0.5, %v2912_v7  ;;  %v2910_v3 = vpop.f32.mrb[67].mxu0 }
0x2758   :  { %v2915_v33 = vmul.f32 0.5, %v2913_v31 }
0x2759   :  { %3758 = vtanh.f32 %v2914_v6 }
0x275a   :  { %3760 = vtanh.f32 %v2913_v31 }
0x275b   :  { %3762 = vtanh.f32 %v2915_v33 }
0x2763   :  { %v3759_v9 = vpop.eup %3758 }
0x2764   :  { %v2918_v34 = vmul.f32 0.5, %v3759_v9  ;;  %v3761_v44 = vpop.eup %3760 }
0x2765   :  { %v3763_v1 = vpop.eup %3762 }
0x2766   :  { %v2920_v55 = vadd.f32 0.5, %v2918_v34  ;;  %v2919_v41 = vmul.f32 0.5, %v3763_v1 }
0x2768   :  { %v2924_v27 = vmul.f32 %v3761_v44, %v2920_v55  ;;  %v2923_v40 = vmul.f32 %v2920_v55, %v2858_v50  ;;  %v2921_v43 = vadd.f32 0.5, %v2919_v41 }
0x276a   :  { %2926 = vrot.lane.b32.xlu1 %v2924_v27, %s3870_s4 }
0x27dc   :  { %v2927_v36 = vpop.permute.xlu1 %2926 }
0x27dd   :  { %v2929_v58 = vadd.f32 %v2927_v36, %v2923_v40 }
0x27df   :  { %3764 = vtanh.f32 %v2929_v58 }
0x27e9   :  { %v3765_v47 = vpop.eup %3764 }
0x27ea   :  { %v2931_v24 = vmul.f32 %v3765_v47, %v2921_v43 }
0x27ec   :  { %v2935_v52 = vpack.c.bf16 %v2931_v24, %v2931_v24  ;;  %v4680_v37 = vmax.f32 %v2861_v18, %v2931_v24  ;;  %v4768_v18 = vld [vmem:[#allocation19_spill] sm:$0xff] }
0x27ee   :  { %2937 = vrot.lane.b32.xlu0 %v2935_v52, %s3870_s4  ;;  %v4769_v52 = vld [vmem:[#allocation20_spill] sm:$0xff] }
0x2860   :  { %v2938_v26 = vpop.permute.xlu0 %2937 }
0x2861   :  { %3351 = vmatmul.mubr.msk.bf16.vlgmr.msra.gmra.mrb[64].mxu1 %vm1352_vm8, %v2938_v26 }
0x2862   :  { %3085 = vmatpush1.bf16.msra.mxu1 %v4563_v17  ;;  %3116 = vmatprep.mubr.bf16.mxu1 %v4758_v14 }
0x2863   :  { %3086 = vmatprep.subr.bf16.mxu1 %v4565_v61 }
0x2866   :  { %3087 = vmatpush1.bf16.msra.mxu1 %v4570_v63 }
0x2867   :  { %3088 = vmatprep.subr.bf16.mxu1 %v4574_v25 }
0x286a   :  { %3089 = vmatpush1.bf16.msra.mxu1 %v4578_v48 }
0x286b   :  { %3090 = vmatprep.subr.bf16.mxu1 %v4582_v60 }
0x286e   :  { %3091 = vmatpush1.bf16.msra.mxu1 %v4586_v56 }
0x2934   :  { %v2976_v16 = vpop.f32.mrb[64].mxu1 }
0x2935   :  { %v2983_v62 = vadd.f32 %v2976_v16, %v4765_v59  ;;  %v2978_v2 = vpop.f32.mrb[65].mxu1  ;;  %v4770_v16 = vld [vmem:[#allocation21_spill] sm:$0xff] }
0x2936   :  { %v2984_v17 = vadd.f32 %v2978_v2, %v4766_v29  ;;  %v2980_v15 = vpop.f32.mrb[66].mxu1 }
0x2937   :  { %v2985_v14 = vmul.f32 0.5, %v2983_v62  ;;  %v2981_v21 = vpop.f32.mrb[67].mxu1 }
0x2938   :  { %v2986_v60 = vmul.f32 0.5, %v2984_v17 }
0x2939   :  { %3766 = vtanh.f32 %v2985_v14 }
0x293a   :  { %3768 = vtanh.f32 %v2984_v17 }
0x293b   :  { %3770 = vtanh.f32 %v2986_v60 }
0x2943   :  { %v3767_v61 = vpop.eup %3766 }
0x2944   :  { %v2989_v63 = vmul.f32 0.5, %v3767_v61  ;;  %v3769_v22 = vpop.eup %3768 }
0x2945   :  { %v3771_v49 = vpop.eup %3770 }
0x2946   :  { %v2991_v25 = vadd.f32 0.5, %v2989_v63  ;;  %v2990_v35 = vmul.f32 0.5, %v3771_v49 }
0x2948   :  { %v2995_v48 = vmul.f32 %v3769_v22, %v2991_v25  ;;  %v2994_v56 = vmul.f32 %v2991_v25, %v2929_v58  ;;  %v2992_v0 = vadd.f32 0.5, %v2990_v35 }
0x294a   :  { %2997 = vrot.lane.b32.xlu1 %v2995_v48, %s3870_s4 }
0x29bc   :  { %v2998_v10 = vpop.permute.xlu1 %2997 }
0x29bd   :  { %v3000_v54 = vadd.f32 %v2998_v10, %v2994_v56 }
0x29bf   :  { %3772 = vtanh.f32 %v3000_v54 }
0x29c9   :  { %v3773_v13 = vpop.eup %3772 }
0x29ca   :  { %v3002_v51 = vmul.f32 %v3773_v13, %v2992_v0 }
0x29cc   :  { %v3006_v50 = vpack.c.bf16 %v3002_v51, %v3002_v51  ;;  %v3003_v23 = vmax.f32 %v4680_v37, %v3002_v51 }
0x29ce   :  { %3008 = vrot.lane.b32.xlu0 %v3006_v50, %s3870_s4 }
0x2a40   :  { %v3009_v39 = vpop.permute.xlu0 %3008 }
0x2a41   :  { %3352 = vmatmul.mubr.msk.bf16.vlgmr.msra.gmra.mrb[68].mxu0 %vm1352_vm8, %v3009_v39 }
0x2b14   :  { %v3047_v42 = vpop.f32.mrb[68].mxu0 }
0x2b15   :  { %v3054_v57 = vadd.f32 %v3047_v42, %v4767_v5  ;;  %v3049_v12 = vpop.f32.mrb[69].mxu0 }
0x2b16   :  { %v3055_v4 = vadd.f32 %v3049_v12, %v4768_v18  ;;  %v3051_v11 = vpop.f32.mrb[70].mxu0 }
0x2b17   :  { %v3056_v30 = vmul.f32 0.5, %v3054_v57  ;;  %v3052_v7 = vpop.f32.mrb[71].mxu0 }
0x2b18   :  { %v3057_v3 = vmul.f32 0.5, %v3055_v4 }
0x2b19   :  { %3774 = vtanh.f32 %v3056_v30 }
0x2b1a   :  { %3776 = vtanh.f32 %v3055_v4 }
0x2b1b   :  { %3778 = vtanh.f32 %v3057_v3 }
0x2b23   :  { %v3775_v28 = vpop.eup %3774 }
0x2b24   :  { %v3060_v32 = vmul.f32 0.5, %v3775_v28  ;;  %v3777_v8 = vpop.eup %3776 }
0x2b25   :  { %v3779_v44 = vpop.eup %3778 }
0x2b26   :  { %v3062_v31 = vadd.f32 0.5, %v3060_v32  ;;  %v3061_v27 = vmul.f32 0.5, %v3779_v44 }
0x2b28   :  { %v3066_v6 = vmul.f32 %v3777_v8, %v3062_v31  ;;  %v3065_v9 = vmul.f32 %v3062_v31, %v3000_v54  ;;  %v3063_v33 = vadd.f32 0.5, %v3061_v27 }
0x2b2a   :  { %3068 = vrot.lane.b32.xlu1 %v3066_v6, %s3870_s4 }
0x2b9c   :  { %v3069_v34 = vpop.permute.xlu1 %3068 }
0x2b9d   :  { %v3071_v55 = vadd.f32 %v3069_v34, %v3065_v9 }
0x2b9f   :  { %3780 = vtanh.f32 %v3071_v55 }
0x2ba9   :  { %v3781_v40 = vpop.eup %3780 }
0x2baa   :  { %v3073_v36 = vmul.f32 %v3781_v40, %v3063_v33 }
0x2bac   :  { %v3077_v58 = vpack.c.bf16 %v3073_v36, %v3073_v36  ;;  %v3074_v1 = vmax.f32 %v3003_v23, %v3073_v36 }
0x2bae   :  { %3079 = vrot.lane.b32.xlu0 %v3077_v58, %s3870_s4 }
0x2bb2   :  { %3147 = vrot.lane.b32.xlu0 %v1913_v53, %s3870_s4 }
0x2c20   :  { %v3080_v41 = vpop.permute.xlu0 %3079 }
0x2c21   :  { %3353 = vmatmul.mubr.msk.bf16.vlgmr.msra.gmra.mrb[68].mxu1 %vm1352_vm8, %v3080_v41 }
0x2c24   :  { %v3148_v43 = vpop.permute.xlu0 %3147 }
0x2c25   :  { %v3154_v47 = vsel %vm1352_vm8, %v3148_v43, %v2529_v19 }
0x2c26   :  { %3155 = vst [vmem:[%s4727_s5] sm:$0xff] %v3154_v47 }
0x2cf4   :  { %v3118_v24 = vpop.f32.mrb[68].mxu1 }
0x2cf5   :  { %v3125_v37 = vadd.f32 %v3118_v24, %v4769_v52  ;;  %v3120_v26 = vpop.f32.mrb[69].mxu1 }
0x2cf6   :  { %v3126_v38 = vadd.f32 %v3120_v26, %v4770_v16  ;;  %v3122_v20 = vpop.f32.mrb[70].mxu1 }
0x2cf7   :  { %v3127_v53 = vmul.f32 0.5, %v3125_v37  ;;  %v3123_v59 = vpop.f32.mrb[71].mxu1 }
0x2cf8   :  { %v3128_v29 = vmul.f32 0.5, %v3126_v38 }
0x2cf9   :  { %3782 = vtanh.f32 %v3127_v53 }
0x2cfa   :  { %3784 = vtanh.f32 %v3126_v38 }
0x2cfb   :  { %3786 = vtanh.f32 %v3128_v29 }
0x2d03   :  { %v3783_v62 = vpop.eup %3782 }
0x2d04   :  { %v3131_v2 = vmul.f32 0.5, %v3783_v62  ;;  %v3785_v46 = vpop.eup %3784 }
0x2d05   :  { %v3787_v21 = vpop.eup %3786 }
0x2d06   :  { %v3133_v45 = vadd.f32 0.5, %v3131_v2  ;;  %v3132_v61 = vmul.f32 0.5, %v3787_v21 }
0x2d08   :  { %v3137_v19 = vmul.f32 %v3785_v46, %v3133_v45  ;;  %v3136_v17 = vmul.f32 %v3133_v45, %v3071_v55  ;;  %v3134_v63 = vadd.f32 0.5, %v3132_v61 }
0x2d0a   :  { %3139 = vrot.lane.b32.xlu1 %v3137_v19, %s3870_s4 }
0x2d7c   :  { %v3140_v15 = vpop.permute.xlu1 %3139 }
0x2d7d   :  { %v3142_v14 = vadd.f32 %v3140_v15, %v3136_v17 }
0x2d7f   :  { %3788 = vtanh.f32 %v3142_v14 }
0x2d89   :  { %v3789_v25 = vpop.eup %3788 }
0x2d8a   :  { %v3144_v22 = vmul.f32 %v3789_v25, %v3134_v63 }
0x2d8c   :  { %v3145_v48 = vmax.f32 %v3074_v1, %v3144_v22 }
0x2d8e   :  { %3151 = vrot.lane.b32.xlu1 %v3145_v48, %s3870_s4 }
0x2e00   :  { %v3152_v60 = vpop.permute.xlu1 %3151 }
0x2e01   :  { %3156 = vst.msk [vmem:[%s4727_s5 + $0x8] sm:$0xff] %vm1352_vm8, %v3152_v60 }
0x2e02   :  { %3161 = vsyncpa [#allocation4], 1 }
0x2e03   :  { %3162 = vsyncpa [#allocation6], 1 }

</bundles_post_ra>
